<compile_context>
chip_gen: v6e
topology: v6e:2x2x1
jax: 0.10.0
libtpu: 0.0.40
codegen_flags: <defaults>
</compile_context>

<pallas_src>
import math
import functools

import numpy as np
import jax
import jax.numpy as jnp
from jax.experimental import pallas as pl
from jax.experimental.pallas import tpu as pltpu

# ----------------------------- model config ---------------------------------
FEAT_DIM = 4
MAX_LEN = 16
D_MODEL = 32
N_HEADS = 4
NUM_LAYERS = 2
DIM_FF = 64
HEAD_DIM = D_MODEL // N_HEADS
BN_EPS = 1e-5


# ------------------------- in-kernel math helpers ----------------------------
def _erf(x):
    # Abramowitz & Stegun 7.1.26 rational approximation (|err| < 1.5e-7),
    # built only from ops with guaranteed Mosaic lowerings (mul/add/div/exp).
    a1, a2, a3, a4, a5 = 0.254829592, -0.284496736, 1.421413741, -1.453152027, 1.061405429
    p = 0.3275911
    sgn = jnp.where(x >= 0.0, 1.0, -1.0)
    ax = jnp.abs(x)
    t = 1.0 / (1.0 + p * ax)
    poly = ((((a5 * t + a4) * t + a3) * t + a2) * t + a1) * t
    return sgn * (1.0 - poly * jnp.exp(-ax * ax))


def _gelu(x):
    # exact (erf-based) GELU, matching PyTorch F.gelu default
    return 0.5 * x * (1.0 + _erf(x * 0.7071067811865476))


# --------------------------------- kernel ------------------------------------
def tst_encoder_kernel(x_ref, kb_ref, wp_ref, pb_ref,
                       wq_ref, bq_ref, wk_ref, bk_ref, wv_ref, bv_ref,
                       woh_ref, ob_ref, l1w_ref, l1b_ref, l2w_ref, l2b_ref,
                       bn1s_ref, bn1t_ref, bn2s_ref, bn2t_ref,
                       out_ref):
    f32 = jnp.float32
    TB, S, F = x_ref.shape
    N = TB * S
    D, H, Dh, L = D_MODEL, N_HEADS, HEAD_DIM, NUM_LAYERS

    def mm(a, w):
        # (N, Din) @ (Din, Dout) -- weights already transposed on the host
        return jax.lax.dot_general(a, w, (((1,), (0,)), ((), ())),
                                   preferred_element_type=f32)

    # ---- input projection (sqrt(d_model) folded) + (bias + pos-enc) term ----
    x2 = x_ref[...].reshape(N, F)
    src = (mm(x2, wp_ref[...]).reshape(TB, S, D) + pb_ref[...]).reshape(N, D)

    kb = kb_ref[...]                                  # (TB, 1, S) additive key bias

    for l in range(L):                                # static unroll over layers
        # ---------------- multi-head self-attention -----------------------
        attn = None
        for h in range(H):                            # static unroll over heads
            # per-head weights pre-split on host -> no lane slices in-kernel
            qh = mm(src, wq_ref[l, h]) + bq_ref[l, h]     # (N, Dh), 1/sqrt(Dh) folded
            kh = mm(src, wk_ref[l, h]) + bk_ref[l, h]
            vh = mm(src, wv_ref[l, h]) + bv_ref[l, h]
            q3 = qh.reshape(TB, S, Dh)
            k3 = kh.reshape(TB, S, Dh)
            v3 = vh.reshape(TB, S, Dh)
            s = jnp.einsum('bqe,bke->bqk', q3, k3, preferred_element_type=f32)
            s = s + kb
            s = s - jnp.max(s, axis=-1, keepdims=True)
            p = jnp.exp(s)
            p = p / jnp.sum(p, axis=-1, keepdims=True)
            ch = jnp.einsum('bqk,bke->bqe', p, v3, preferred_element_type=f32)
            # accumulate per-head output projection == concat(heads) @ W_o
            term = mm(ch.reshape(N, Dh), woh_ref[l, h])
            attn = term if attn is None else attn + term
        attn = attn + ob_ref[l]

        # residual + BatchNorm1d (eval stats folded into scale/shift)
        src = (src + attn) * bn1s_ref[l] + bn1t_ref[l]

        # ---------------- feed-forward block -------------------------------
        ff = _gelu(mm(src, l1w_ref[l]) + l1b_ref[l])
        ff = mm(ff, l2w_ref[l]) + l2b_ref[l]
        src = (src + ff) * bn2s_ref[l] + bn2t_ref[l]

    # final activation; store lane-dense (D=32) slab, final projection in wrapper
    out_ref[...] = _gelu(src).reshape(TB, S, D)


# --------------------------- host-side parameter prep ------------------------
def _prep_kernel_params(params, pe):
    """Transpose / split / fold PyTorch-convention params for the kernel."""
    D, H, Dh, L = D_MODEL, N_HEADS, HEAD_DIM, NUM_LAYERS
    sqrt_d = math.sqrt(D)

    wp_t = params['wp'].T * sqrt_d                 # (F, D), sqrt(d_model) folded
    pos_bias = params['bp'] * sqrt_d + pe          # (S, D) combined bias + pos-enc

    inw, inb = params['inw'], params['inb']        # (L, 3D, D), (L, 1, 3D)

    def split_heads(start, scale=1.0):
        w = jnp.swapaxes(inw[:, start:start + D, :], 1, 2)         # (L, Din, Dout)
        w = jnp.transpose(w.reshape(L, D, H, Dh), (0, 2, 1, 3))    # (L, H, Din, Dh)
        b = jnp.transpose(inb[:, :, start:start + D].reshape(L, 1, H, Dh),
                          (0, 2, 1, 3))                            # (L, H, 1, Dh)
        return w * scale, b * scale

    wq, bq = split_heads(0, 1.0 / math.sqrt(Dh))   # softmax scale folded into Q
    wk, bk = split_heads(D)
    wv, bv = split_heads(2 * D)

    # per-head slabs of the transposed out-projection: concat+matmul == sum of these
    woh = jnp.swapaxes(params['ow'], 1, 2).reshape(L, H, Dh, D)
    ob = params['ob']                              # (L, 1, D)

    l1w = jnp.swapaxes(params['l1w'], 1, 2)        # (L, D, DFF)
    l2w = jnp.swapaxes(params['l2w'], 1, 2)        # (L, DFF, D)

    bn1s = params['bn1g'] * jax.lax.rsqrt(params['bn1v'] + BN_EPS)
    bn1t = params['bn1b'] - params['bn1m'] * bn1s
    bn2s = params['bn2g'] * jax.lax.rsqrt(params['bn2v'] + BN_EPS)
    bn2t = params['bn2b'] - params['bn2m'] * bn2s

    weights = [wp_t, pos_bias, wq, bq, wk, bk, wv, bv, woh, ob,
               l1w, params['l1b'], l2w, params['l2b'],
               bn1s, bn1t, bn2s, bn2t]
    return weights, params['wo'].T, params['bo']


# --------------------------------- wrapper -----------------------------------
@jax.jit
def tst_encoder_forward(X, padding_masks, params, pe):
    B, S, F = X.shape
    D = D_MODEL

    weights, wo_t, bo = _prep_kernel_params(params, pe)
    # key padding bias: padded keys (mask == 0) get -1e30 before softmax.
    # NOTE: rows with zero unmasked keys would produce NaN (same as reference).
    key_bias = jnp.where(padding_masks, 0.0, -1e30).astype(jnp.float32)[:, None, :]

    # batch tile (grid gives software pipelining / megacore sharding at larger B)
    if B <= 8:
        tb = B
    else:
        tb = next(c for c in (8, 4, 2, 1) if B % c == 0)
    grid = (B // tb,)

    def batched_spec(shape):
        nd = len(shape)

        def imap(b):
            return (b,) + (0,) * (nd - 1)

        return pl.BlockSpec(shape, imap)

    def resident_spec(arr):
        zeros = (0,) * arr.ndim

        def imap(b):
            return zeros

        return pl.BlockSpec(arr.shape, imap)

    slab = pl.pallas_call(
        tst_encoder_kernel,
        grid=grid,
        out_shape=jax.ShapeDtypeStruct((B, S, D), jnp.float32),
        in_specs=[batched_spec((tb, S, F)), batched_spec((tb, 1, S))]
                 + [resident_spec(w) for w in weights],
        out_specs=batched_spec((tb, S, D)),
        compiler_params=pltpu.CompilerParams(
            dimension_semantics=("parallel",),
            vmem_limit_bytes=32 * 1024 * 1024),
    )(X, key_bias, *weights)

    # final (D -> feat_dim) projection in the wrapper so the kernel's output
    # store stays lane-dense (32 lanes instead of 4-lane masked stores).
    return jnp.einsum('bsd,df->bsf', slab, wo_t) + bo


# ---------------------- deterministic parameter setup ------------------------
def make_params(key):
    keys = iter(jax.random.split(key, 24))

    def nrm(shape, scale=0.1):
        return jax.random.normal(next(keys), shape, jnp.float32) * scale

    D, F, L, DFF = D_MODEL, FEAT_DIM, NUM_LAYERS, DIM_FF
    return dict(
        wp=nrm((D, F), 0.3), bp=nrm((1, D), 0.1),
        inw=nrm((L, 3 * D, D), 0.1), inb=nrm((L, 1, 3 * D), 0.05),
        ow=nrm((L, D, D), 0.1), ob=nrm((L, 1, D), 0.05),
        l1w=nrm((L, DFF, D), 0.1), l1b=nrm((L, 1, DFF), 0.05),
        l2w=nrm((L, D, DFF), 0.1), l2b=nrm((L, 1, D), 0.05),
        bn1g=1.0 + nrm((L, 1, D), 0.05), bn1b=nrm((L, 1, D), 0.05),
        bn1m=nrm((L, 1, D), 0.05), bn1v=1.0 + jnp.abs(nrm((L, 1, D), 0.1)),
        bn2g=1.0 + nrm((L, 1, D), 0.05), bn2b=nrm((L, 1, D), 0.05),
        bn2m=nrm((L, 1, D), 0.05), bn2v=1.0 + jnp.abs(nrm((L, 1, D), 0.1)),
        wo=nrm((F, D), 0.1), bo=nrm((1, F), 0.05),
    )


def fixed_pe(seq_len, d_model):
    pos = np.arange(seq_len, dtype=np.float32)[:, None]
    div = np.exp(np.arange(0, d_model, 2, dtype=np.float32) *
                 (-math.log(10000.0) / d_model))
    pe = np.zeros((seq_len, d_model), np.float32)
    pe[:, 0::2] = np.sin(pos * div)
    pe[:, 1::2] = np.cos(pos * div)
    return jnp.asarray(pe)


# ------------------------- pure-JAX reference (eval) --------------------------
def reference_forward(X, padding_masks, params, pe):
    D, H, Dh, L = D_MODEL, N_HEADS, HEAD_DIM, NUM_LAYERS
    gelu = functools.partial(jax.nn.gelu, approximate=False)

    def lin(x, w, b):
        return jnp.einsum('bsd,od->bso', x, w) + b

    def bn(x, g, bt, m, v):
        return (x - m) / jnp.sqrt(v + BN_EPS) * g + bt

    src = lin(X, params['wp'], params['bp']) * math.sqrt(D) + pe
    bias = jnp.where(padding_masks, 0.0, -1e30).astype(jnp.float32)[:, None, :]
    scale = 1.0 / math.sqrt(Dh)
    for l in range(L):
        qkv = lin(src, params['inw'][l], params['inb'][l])
        heads = []
        for h in range(H):
            q = qkv[:, :, h * Dh:(h + 1) * Dh] * scale
            k = qkv[:, :, D + h * Dh:D + (h + 1) * Dh]
            v = qkv[:, :, 2 * D + h * Dh:2 * D + (h + 1) * Dh]
            s = jnp.einsum('bqe,bke->bqk', q, k) + bias
            p = jax.nn.softmax(s, axis=-1)
            heads.append(jnp.einsum('bqk,bke->bqe', p, v))
        ctx = jnp.concatenate(heads, axis=-1)
        src = src + lin(ctx, params['ow'][l], params['ob'][l])
        src = bn(src, params['bn1g'][l], params['bn1b'][l],
                 params['bn1m'][l], params['bn1v'][l])
        ff = lin(gelu(lin(src, params['l1w'][l], params['l1b'][l])),
                 params['l2w'][l], params['l2b'][l])
        src = src + ff
        src = bn(src, params['bn2g'][l], params['bn2b'][l],
                 params['bn2m'][l], params['bn2v'][l])
    out = gelu(src)
    return lin(out, params['wo'], params['bo'])


# ----------------------------------- main -------------------------------------
if __name__ == "__main__":
    B, S = 2, 8
    key = jax.random.PRNGKey(0)
    kx, kp = jax.random.split(key, 2)

    X = jax.random.normal(kx, (B, S, FEAT_DIM), jnp.float32)
    padding_masks = jnp.array(
        [[True] * S,
         [True] * (S - 2) + [False] * 2])               # 1 = keep, 0 = padding
    params = make_params(kp)
    pe = fixed_pe(S, D_MODEL)

    out = tst_encoder_forward(X, padding_masks, params, pe)
    out = jax.block_until_ready(out)

    ref = reference_forward(X, padding_masks, params, pe)
    assert out.shape == (B, S, FEAT_DIM)
    np.testing.assert_allclose(np.asarray(out), np.asarray(ref),
                               rtol=2e-3, atol=2e-3)
    print("KERNEL_OK")
</pallas_src>

<mosaic_0001>
module attributes {stable_mosaic.version = 11 : i64} {
  func.func @tst_encoder_kernel(%arg0: i32, %arg1: memref<2x8x4xf32, #tpu.memory_space<vmem>>, %arg2: memref<2x1x8xf32, #tpu.memory_space<vmem>>, %arg3: memref<4x32xf32, #tpu.memory_space<vmem>>, %arg4: memref<8x32xf32, #tpu.memory_space<vmem>>, %arg5: memref<2x4x32x8xf32, #tpu.memory_space<vmem>>, %arg6: memref<2x4x1x8xf32, #tpu.memory_space<vmem>>, %arg7: memref<2x4x32x8xf32, #tpu.memory_space<vmem>>, %arg8: memref<2x4x1x8xf32, #tpu.memory_space<vmem>>, %arg9: memref<2x4x32x8xf32, #tpu.memory_space<vmem>>, %arg10: memref<2x4x1x8xf32, #tpu.memory_space<vmem>>, %arg11: memref<2x4x8x32xf32, #tpu.memory_space<vmem>>, %arg12: memref<2x1x32xf32, #tpu.memory_space<vmem>>, %arg13: memref<2x32x64xf32, #tpu.memory_space<vmem>>, %arg14: memref<2x1x64xf32, #tpu.memory_space<vmem>>, %arg15: memref<2x64x32xf32, #tpu.memory_space<vmem>>, %arg16: memref<2x1x32xf32, #tpu.memory_space<vmem>>, %arg17: memref<2x1x32xf32, #tpu.memory_space<vmem>>, %arg18: memref<2x1x32xf32, #tpu.memory_space<vmem>>, %arg19: memref<2x1x32xf32, #tpu.memory_space<vmem>>, %arg20: memref<2x1x32xf32, #tpu.memory_space<vmem>>, %arg21: memref<2x8x32xf32, #tpu.memory_space<vmem>>) attributes {dimension_semantics = [#tpu.dimension_semantics<parallel>], iteration_bounds = array<i64: 1>, scalar_prefetch = 0 : i64, scratch_operands = 0 : i64, tpu.core_type = #tpu.core_type<tc>, window_params = [{transform_indices = @transform_0, window_bounds = array<i64: 2, 8, 4>}, {transform_indices = @transform_1, window_bounds = array<i64: 2, 1, 8>}, {pipeline_mode = #tpu.pipeline_mode<synchronous>, transform_indices = @transform_2, window_bounds = array<i64: 4, 32>}, {pipeline_mode = #tpu.pipeline_mode<synchronous>, transform_indices = @transform_3, window_bounds = array<i64: 8, 32>}, {pipeline_mode = #tpu.pipeline_mode<synchronous>, transform_indices = @transform_4, window_bounds = array<i64: 2, 4, 32, 8>}, {pipeline_mode = #tpu.pipeline_mode<synchronous>, transform_indices = @transform_5, window_bounds = array<i64: 2, 4, 1, 8>}, {pipeline_mode = #tpu.pipeline_mode<synchronous>, transform_indices = @transform_6, window_bounds = array<i64: 2, 4, 32, 8>}, {pipeline_mode = #tpu.pipeline_mode<synchronous>, transform_indices = @transform_7, window_bounds = array<i64: 2, 4, 1, 8>}, {pipeline_mode = #tpu.pipeline_mode<synchronous>, transform_indices = @transform_8, window_bounds = array<i64: 2, 4, 32, 8>}, {pipeline_mode = #tpu.pipeline_mode<synchronous>, transform_indices = @transform_9, window_bounds = array<i64: 2, 4, 1, 8>}, {pipeline_mode = #tpu.pipeline_mode<synchronous>, transform_indices = @transform_10, window_bounds = array<i64: 2, 4, 8, 32>}, {pipeline_mode = #tpu.pipeline_mode<synchronous>, transform_indices = @transform_11, window_bounds = array<i64: 2, 1, 32>}, {pipeline_mode = #tpu.pipeline_mode<synchronous>, transform_indices = @transform_12, window_bounds = array<i64: 2, 32, 64>}, {pipeline_mode = #tpu.pipeline_mode<synchronous>, transform_indices = @transform_13, window_bounds = array<i64: 2, 1, 64>}, {pipeline_mode = #tpu.pipeline_mode<synchronous>, transform_indices = @transform_14, window_bounds = array<i64: 2, 64, 32>}, {pipeline_mode = #tpu.pipeline_mode<synchronous>, transform_indices = @transform_15, window_bounds = array<i64: 2, 1, 32>}, {pipeline_mode = #tpu.pipeline_mode<synchronous>, transform_indices = @transform_16, window_bounds = array<i64: 2, 1, 32>}, {pipeline_mode = #tpu.pipeline_mode<synchronous>, transform_indices = @transform_17, window_bounds = array<i64: 2, 1, 32>}, {pipeline_mode = #tpu.pipeline_mode<synchronous>, transform_indices = @transform_18, window_bounds = array<i64: 2, 1, 32>}, {pipeline_mode = #tpu.pipeline_mode<synchronous>, transform_indices = @transform_19, window_bounds = array<i64: 2, 1, 32>}, {transform_indices = @transform_20, window_bounds = array<i64: 2, 8, 32>}]} {
    %c0 = arith.constant 0 : index
    %c0_0 = arith.constant 0 : index
    %c0_1 = arith.constant 0 : index
    %0 = vector.load %arg1[%c0, %c0_0, %c0_1] : memref<2x8x4xf32, #tpu.memory_space<vmem>>, vector<2x8x4xf32>
    %1 = vector.shape_cast %0 : vector<2x8x4xf32> to vector<16x4xf32>
    %c0_2 = arith.constant 0 : index
    %c0_3 = arith.constant 0 : index
    %2 = vector.load %arg3[%c0_2, %c0_3] : memref<4x32xf32, #tpu.memory_space<vmem>>, vector<4x32xf32>
    %cst = arith.constant dense<0.000000e+00> : vector<16x32xf32>
    %3 = tpu.matmul %1, %2, %cst {dimension_numbers = #tpu.dot_dimension_numbers<[1], [0], [0], [1], [0, 0, 1, 1], [], []>} : vector<16x4xf32>, vector<4x32xf32>, vector<16x32xf32> -> vector<16x32xf32>
    %4 = vector.shape_cast %3 : vector<16x32xf32> to vector<2x8x32xf32>
    %c0_4 = arith.constant 0 : index
    %c0_5 = arith.constant 0 : index
    %5 = vector.load %arg4[%c0_4, %c0_5] : memref<8x32xf32, #tpu.memory_space<vmem>>, vector<8x32xf32>
    %6 = vector.shape_cast %5 : vector<8x32xf32> to vector<1x8x32xf32>
    %7 = vector.broadcast %6 : vector<1x8x32xf32> to vector<2x8x32xf32>
    %8 = arith.addf %4, %7 : vector<2x8x32xf32>
    %9 = vector.shape_cast %8 : vector<2x8x32xf32> to vector<16x32xf32>
    %c0_6 = arith.constant 0 : index
    %c0_7 = arith.constant 0 : index
    %c0_8 = arith.constant 0 : index
    %10 = vector.load %arg2[%c0_6, %c0_7, %c0_8] : memref<2x1x8xf32, #tpu.memory_space<vmem>>, vector<2x1x8xf32>
    %c0_9 = arith.constant 0 : index
    %c0_10 = arith.constant 0 : index
    %c0_11 = arith.constant 0 : index
    %c0_12 = arith.constant 0 : index
    %11 = vector.load %arg5[%c0_9, %c0_10, %c0_11, %c0_12] : memref<2x4x32x8xf32, #tpu.memory_space<vmem>>, vector<1x1x32x8xf32>
    %12 = vector.shape_cast %11 : vector<1x1x32x8xf32> to vector<32x8xf32>
    %cst_13 = arith.constant dense<0.000000e+00> : vector<16x8xf32>
    %13 = tpu.matmul %9, %12, %cst_13 {dimension_numbers = #tpu.dot_dimension_numbers<[1], [0], [0], [1], [0, 0, 1, 1], [], []>} : vector<16x32xf32>, vector<32x8xf32>, vector<16x8xf32> -> vector<16x8xf32>
    %c0_14 = arith.constant 0 : index
    %c0_15 = arith.constant 0 : index
    %c0_16 = arith.constant 0 : index
    %c0_17 = arith.constant 0 : index
    %14 = vector.load %arg6[%c0_14, %c0_15, %c0_16, %c0_17] : memref<2x4x1x8xf32, #tpu.memory_space<vmem>>, vector<1x1x1x8xf32>
    %15 = vector.shape_cast %14 : vector<1x1x1x8xf32> to vector<1x8xf32>
    %16 = vector.broadcast %15 : vector<1x8xf32> to vector<16x8xf32>
    %17 = arith.addf %13, %16 : vector<16x8xf32>
    %c0_18 = arith.constant 0 : index
    %c0_19 = arith.constant 0 : index
    %c0_20 = arith.constant 0 : index
    %c0_21 = arith.constant 0 : index
    %18 = vector.load %arg7[%c0_18, %c0_19, %c0_20, %c0_21] : memref<2x4x32x8xf32, #tpu.memory_space<vmem>>, vector<1x1x32x8xf32>
    %19 = vector.shape_cast %18 : vector<1x1x32x8xf32> to vector<32x8xf32>
    %cst_22 = arith.constant dense<0.000000e+00> : vector<16x8xf32>
    %20 = tpu.matmul %9, %19, %cst_22 {dimension_numbers = #tpu.dot_dimension_numbers<[1], [0], [0], [1], [0, 0, 1, 1], [], []>} : vector<16x32xf32>, vector<32x8xf32>, vector<16x8xf32> -> vector<16x8xf32>
    %c0_23 = arith.constant 0 : index
    %c0_24 = arith.constant 0 : index
    %c0_25 = arith.constant 0 : index
    %c0_26 = arith.constant 0 : index
    %21 = vector.load %arg8[%c0_23, %c0_24, %c0_25, %c0_26] : memref<2x4x1x8xf32, #tpu.memory_space<vmem>>, vector<1x1x1x8xf32>
    %22 = vector.shape_cast %21 : vector<1x1x1x8xf32> to vector<1x8xf32>
    %23 = vector.broadcast %22 : vector<1x8xf32> to vector<16x8xf32>
    %24 = arith.addf %20, %23 : vector<16x8xf32>
    %c0_27 = arith.constant 0 : index
    %c0_28 = arith.constant 0 : index
    %c0_29 = arith.constant 0 : index
    %c0_30 = arith.constant 0 : index
    %25 = vector.load %arg9[%c0_27, %c0_28, %c0_29, %c0_30] : memref<2x4x32x8xf32, #tpu.memory_space<vmem>>, vector<1x1x32x8xf32>
    %26 = vector.shape_cast %25 : vector<1x1x32x8xf32> to vector<32x8xf32>
    %cst_31 = arith.constant dense<0.000000e+00> : vector<16x8xf32>
    %27 = tpu.matmul %9, %26, %cst_31 {dimension_numbers = #tpu.dot_dimension_numbers<[1], [0], [0], [1], [0, 0, 1, 1], [], []>} : vector<16x32xf32>, vector<32x8xf32>, vector<16x8xf32> -> vector<16x8xf32>
    %c0_32 = arith.constant 0 : index
    %c0_33 = arith.constant 0 : index
    %c0_34 = arith.constant 0 : index
    %c0_35 = arith.constant 0 : index
    %28 = vector.load %arg10[%c0_32, %c0_33, %c0_34, %c0_35] : memref<2x4x1x8xf32, #tpu.memory_space<vmem>>, vector<1x1x1x8xf32>
    %29 = vector.shape_cast %28 : vector<1x1x1x8xf32> to vector<1x8xf32>
    %30 = vector.broadcast %29 : vector<1x8xf32> to vector<16x8xf32>
    %31 = arith.addf %27, %30 : vector<16x8xf32>
    %32 = vector.shape_cast %17 : vector<16x8xf32> to vector<2x8x8xf32>
    %33 = vector.shape_cast %24 : vector<16x8xf32> to vector<2x8x8xf32>
    %34 = vector.shape_cast %31 : vector<16x8xf32> to vector<2x8x8xf32>
    "tpu.trace_start"() <{level = 10 : i32, message = "bqe,bke->bqk"}> : () -> ()
    %cst_36 = arith.constant dense<0.000000e+00> : vector<2x8x8xf32>
    %35 = tpu.matmul %32, %33, %cst_36 {dimension_numbers = #tpu.dot_dimension_numbers<[2], [2], [1], [1], [0, 0, 0, 1, 1, 1], [0], [0]>} : vector<2x8x8xf32>, vector<2x8x8xf32>, vector<2x8x8xf32> -> vector<2x8x8xf32>
    "tpu.trace_stop"() : () -> ()
    %36 = vector.broadcast %10 : vector<2x1x8xf32> to vector<2x8x8xf32>
    %37 = arith.addf %35, %36 : vector<2x8x8xf32>
    %cst_37 = arith.constant dense<0xFF800000> : vector<2x8xf32>
    %38 = vector.multi_reduction <maximumf>, %37, %cst_37 [2] : vector<2x8x8xf32> to vector<2x8xf32>
    %39 = vector.shape_cast %38 : vector<2x8xf32> to vector<2x8x1xf32>
    %40 = vector.broadcast %39 : vector<2x8x1xf32> to vector<2x8x8xf32>
    %41 = arith.subf %37, %40 : vector<2x8x8xf32>
    %42 = math.exp %41 : vector<2x8x8xf32>
    %cst_38 = arith.constant dense<0.000000e+00> : vector<2x8xf32>
    %43 = vector.multi_reduction <add>, %42, %cst_38 [2] : vector<2x8x8xf32> to vector<2x8xf32>
    %44 = vector.shape_cast %43 : vector<2x8xf32> to vector<2x8x1xf32>
    %45 = vector.broadcast %44 : vector<2x8x1xf32> to vector<2x8x8xf32>
    %46 = arith.divf %42, %45 : vector<2x8x8xf32>
    "tpu.trace_start"() <{level = 10 : i32, message = "bqk,bke->bqe"}> : () -> ()
    %cst_39 = arith.constant dense<0.000000e+00> : vector<2x8x8xf32>
    %47 = tpu.matmul %46, %34, %cst_39 {dimension_numbers = #tpu.dot_dimension_numbers<[2], [1], [1], [2], [0, 0, 0, 1, 1, 2], [0], [0]>} : vector<2x8x8xf32>, vector<2x8x8xf32>, vector<2x8x8xf32> -> vector<2x8x8xf32>
    "tpu.trace_stop"() : () -> ()
    %48 = vector.shape_cast %47 : vector<2x8x8xf32> to vector<16x8xf32>
    %c0_40 = arith.constant 0 : index
    %c0_41 = arith.constant 0 : index
    %c0_42 = arith.constant 0 : index
    %c0_43 = arith.constant 0 : index
    %49 = vector.load %arg11[%c0_40, %c0_41, %c0_42, %c0_43] : memref<2x4x8x32xf32, #tpu.memory_space<vmem>>, vector<1x1x8x32xf32>
    %50 = vector.shape_cast %49 : vector<1x1x8x32xf32> to vector<8x32xf32>
    %cst_44 = arith.constant dense<0.000000e+00> : vector<16x32xf32>
    %51 = tpu.matmul %48, %50, %cst_44 {dimension_numbers = #tpu.dot_dimension_numbers<[1], [0], [0], [1], [0, 0, 1, 1], [], []>} : vector<16x8xf32>, vector<8x32xf32>, vector<16x32xf32> -> vector<16x32xf32>
    %c0_45 = arith.constant 0 : index
    %c1 = arith.constant 1 : index
    %c0_46 = arith.constant 0 : index
    %c0_47 = arith.constant 0 : index
    %52 = vector.load %arg5[%c0_45, %c1, %c0_46, %c0_47] : memref<2x4x32x8xf32, #tpu.memory_space<vmem>>, vector<1x1x32x8xf32>
    %53 = vector.shape_cast %52 : vector<1x1x32x8xf32> to vector<32x8xf32>
    %cst_48 = arith.constant dense<0.000000e+00> : vector<16x8xf32>
    %54 = tpu.matmul %9, %53, %cst_48 {dimension_numbers = #tpu.dot_dimension_numbers<[1], [0], [0], [1], [0, 0, 1, 1], [], []>} : vector<16x32xf32>, vector<32x8xf32>, vector<16x8xf32> -> vector<16x8xf32>
    %c0_49 = arith.constant 0 : index
    %c1_50 = arith.constant 1 : index
    %c0_51 = arith.constant 0 : index
    %c0_52 = arith.constant 0 : index
    %55 = vector.load %arg6[%c0_49, %c1_50, %c0_51, %c0_52] : memref<2x4x1x8xf32, #tpu.memory_space<vmem>>, vector<1x1x1x8xf32>
    %56 = vector.shape_cast %55 : vector<1x1x1x8xf32> to vector<1x8xf32>
    %57 = vector.broadcast %56 : vector<1x8xf32> to vector<16x8xf32>
    %58 = arith.addf %54, %57 : vector<16x8xf32>
    %c0_53 = arith.constant 0 : index
    %c1_54 = arith.constant 1 : index
    %c0_55 = arith.constant 0 : index
    %c0_56 = arith.constant 0 : index
    %59 = vector.load %arg7[%c0_53, %c1_54, %c0_55, %c0_56] : memref<2x4x32x8xf32, #tpu.memory_space<vmem>>, vector<1x1x32x8xf32>
    %60 = vector.shape_cast %59 : vector<1x1x32x8xf32> to vector<32x8xf32>
    %cst_57 = arith.constant dense<0.000000e+00> : vector<16x8xf32>
    %61 = tpu.matmul %9, %60, %cst_57 {dimension_numbers = #tpu.dot_dimension_numbers<[1], [0], [0], [1], [0, 0, 1, 1], [], []>} : vector<16x32xf32>, vector<32x8xf32>, vector<16x8xf32> -> vector<16x8xf32>
    %c0_58 = arith.constant 0 : index
    %c1_59 = arith.constant 1 : index
    %c0_60 = arith.constant 0 : index
    %c0_61 = arith.constant 0 : index
    %62 = vector.load %arg8[%c0_58, %c1_59, %c0_60, %c0_61] : memref<2x4x1x8xf32, #tpu.memory_space<vmem>>, vector<1x1x1x8xf32>
    %63 = vector.shape_cast %62 : vector<1x1x1x8xf32> to vector<1x8xf32>
    %64 = vector.broadcast %63 : vector<1x8xf32> to vector<16x8xf32>
    %65 = arith.addf %61, %64 : vector<16x8xf32>
    %c0_62 = arith.constant 0 : index
    %c1_63 = arith.constant 1 : index
    %c0_64 = arith.constant 0 : index
    %c0_65 = arith.constant 0 : index
    %66 = vector.load %arg9[%c0_62, %c1_63, %c0_64, %c0_65] : memref<2x4x32x8xf32, #tpu.memory_space<vmem>>, vector<1x1x32x8xf32>
    %67 = vector.shape_cast %66 : vector<1x1x32x8xf32> to vector<32x8xf32>
    %cst_66 = arith.constant dense<0.000000e+00> : vector<16x8xf32>
    %68 = tpu.matmul %9, %67, %cst_66 {dimension_numbers = #tpu.dot_dimension_numbers<[1], [0], [0], [1], [0, 0, 1, 1], [], []>} : vector<16x32xf32>, vector<32x8xf32>, vector<16x8xf32> -> vector<16x8xf32>
    %c0_67 = arith.constant 0 : index
    %c1_68 = arith.constant 1 : index
    %c0_69 = arith.constant 0 : index
    %c0_70 = arith.constant 0 : index
    %69 = vector.load %arg10[%c0_67, %c1_68, %c0_69, %c0_70] : memref<2x4x1x8xf32, #tpu.memory_space<vmem>>, vector<1x1x1x8xf32>
    %70 = vector.shape_cast %69 : vector<1x1x1x8xf32> to vector<1x8xf32>
    %71 = vector.broadcast %70 : vector<1x8xf32> to vector<16x8xf32>
    %72 = arith.addf %68, %71 : vector<16x8xf32>
    %73 = vector.shape_cast %58 : vector<16x8xf32> to vector<2x8x8xf32>
    %74 = vector.shape_cast %65 : vector<16x8xf32> to vector<2x8x8xf32>
    %75 = vector.shape_cast %72 : vector<16x8xf32> to vector<2x8x8xf32>
    "tpu.trace_start"() <{level = 10 : i32, message = "bqe,bke->bqk"}> : () -> ()
    %cst_71 = arith.constant dense<0.000000e+00> : vector<2x8x8xf32>
    %76 = tpu.matmul %73, %74, %cst_71 {dimension_numbers = #tpu.dot_dimension_numbers<[2], [2], [1], [1], [0, 0, 0, 1, 1, 1], [0], [0]>} : vector<2x8x8xf32>, vector<2x8x8xf32>, vector<2x8x8xf32> -> vector<2x8x8xf32>
    "tpu.trace_stop"() : () -> ()
    %77 = vector.broadcast %10 : vector<2x1x8xf32> to vector<2x8x8xf32>
    %78 = arith.addf %76, %77 : vector<2x8x8xf32>
    %cst_72 = arith.constant dense<0xFF800000> : vector<2x8xf32>
    %79 = vector.multi_reduction <maximumf>, %78, %cst_72 [2] : vector<2x8x8xf32> to vector<2x8xf32>
    %80 = vector.shape_cast %79 : vector<2x8xf32> to vector<2x8x1xf32>
    %81 = vector.broadcast %80 : vector<2x8x1xf32> to vector<2x8x8xf32>
    %82 = arith.subf %78, %81 : vector<2x8x8xf32>
    %83 = math.exp %82 : vector<2x8x8xf32>
    %cst_73 = arith.constant dense<0.000000e+00> : vector<2x8xf32>
    %84 = vector.multi_reduction <add>, %83, %cst_73 [2] : vector<2x8x8xf32> to vector<2x8xf32>
    %85 = vector.shape_cast %84 : vector<2x8xf32> to vector<2x8x1xf32>
    %86 = vector.broadcast %85 : vector<2x8x1xf32> to vector<2x8x8xf32>
    %87 = arith.divf %83, %86 : vector<2x8x8xf32>
    "tpu.trace_start"() <{level = 10 : i32, message = "bqk,bke->bqe"}> : () -> ()
    %cst_74 = arith.constant dense<0.000000e+00> : vector<2x8x8xf32>
    %88 = tpu.matmul %87, %75, %cst_74 {dimension_numbers = #tpu.dot_dimension_numbers<[2], [1], [1], [2], [0, 0, 0, 1, 1, 2], [0], [0]>} : vector<2x8x8xf32>, vector<2x8x8xf32>, vector<2x8x8xf32> -> vector<2x8x8xf32>
    "tpu.trace_stop"() : () -> ()
    %89 = vector.shape_cast %88 : vector<2x8x8xf32> to vector<16x8xf32>
    %c0_75 = arith.constant 0 : index
    %c1_76 = arith.constant 1 : index
    %c0_77 = arith.constant 0 : index
    %c0_78 = arith.constant 0 : index
    %90 = vector.load %arg11[%c0_75, %c1_76, %c0_77, %c0_78] : memref<2x4x8x32xf32, #tpu.memory_space<vmem>>, vector<1x1x8x32xf32>
    %91 = vector.shape_cast %90 : vector<1x1x8x32xf32> to vector<8x32xf32>
    %cst_79 = arith.constant dense<0.000000e+00> : vector<16x32xf32>
    %92 = tpu.matmul %89, %91, %cst_79 {dimension_numbers = #tpu.dot_dimension_numbers<[1], [0], [0], [1], [0, 0, 1, 1], [], []>} : vector<16x8xf32>, vector<8x32xf32>, vector<16x32xf32> -> vector<16x32xf32>
    %93 = arith.addf %51, %92 : vector<16x32xf32>
    %c0_80 = arith.constant 0 : index
    %c2 = arith.constant 2 : index
    %c0_81 = arith.constant 0 : index
    %c0_82 = arith.constant 0 : index
    %94 = vector.load %arg5[%c0_80, %c2, %c0_81, %c0_82] : memref<2x4x32x8xf32, #tpu.memory_space<vmem>>, vector<1x1x32x8xf32>
    %95 = vector.shape_cast %94 : vector<1x1x32x8xf32> to vector<32x8xf32>
    %cst_83 = arith.constant dense<0.000000e+00> : vector<16x8xf32>
    %96 = tpu.matmul %9, %95, %cst_83 {dimension_numbers = #tpu.dot_dimension_numbers<[1], [0], [0], [1], [0, 0, 1, 1], [], []>} : vector<16x32xf32>, vector<32x8xf32>, vector<16x8xf32> -> vector<16x8xf32>
    %c0_84 = arith.constant 0 : index
    %c2_85 = arith.constant 2 : index
    %c0_86 = arith.constant 0 : index
    %c0_87 = arith.constant 0 : index
    %97 = vector.load %arg6[%c0_84, %c2_85, %c0_86, %c0_87] : memref<2x4x1x8xf32, #tpu.memory_space<vmem>>, vector<1x1x1x8xf32>
    %98 = vector.shape_cast %97 : vector<1x1x1x8xf32> to vector<1x8xf32>
    %99 = vector.broadcast %98 : vector<1x8xf32> to vector<16x8xf32>
    %100 = arith.addf %96, %99 : vector<16x8xf32>
    %c0_88 = arith.constant 0 : index
    %c2_89 = arith.constant 2 : index
    %c0_90 = arith.constant 0 : index
    %c0_91 = arith.constant 0 : index
    %101 = vector.load %arg7[%c0_88, %c2_89, %c0_90, %c0_91] : memref<2x4x32x8xf32, #tpu.memory_space<vmem>>, vector<1x1x32x8xf32>
    %102 = vector.shape_cast %101 : vector<1x1x32x8xf32> to vector<32x8xf32>
    %cst_92 = arith.constant dense<0.000000e+00> : vector<16x8xf32>
    %103 = tpu.matmul %9, %102, %cst_92 {dimension_numbers = #tpu.dot_dimension_numbers<[1], [0], [0], [1], [0, 0, 1, 1], [], []>} : vector<16x32xf32>, vector<32x8xf32>, vector<16x8xf32> -> vector<16x8xf32>
    %c0_93 = arith.constant 0 : index
    %c2_94 = arith.constant 2 : index
    %c0_95 = arith.constant 0 : index
    %c0_96 = arith.constant 0 : index
    %104 = vector.load %arg8[%c0_93, %c2_94, %c0_95, %c0_96] : memref<2x4x1x8xf32, #tpu.memory_space<vmem>>, vector<1x1x1x8xf32>
    %105 = vector.shape_cast %104 : vector<1x1x1x8xf32> to vector<1x8xf32>
    %106 = vector.broadcast %105 : vector<1x8xf32> to vector<16x8xf32>
    %107 = arith.addf %103, %106 : vector<16x8xf32>
    %c0_97 = arith.constant 0 : index
    %c2_98 = arith.constant 2 : index
    %c0_99 = arith.constant 0 : index
    %c0_100 = arith.constant 0 : index
    %108 = vector.load %arg9[%c0_97, %c2_98, %c0_99, %c0_100] : memref<2x4x32x8xf32, #tpu.memory_space<vmem>>, vector<1x1x32x8xf32>
    %109 = vector.shape_cast %108 : vector<1x1x32x8xf32> to vector<32x8xf32>
    %cst_101 = arith.constant dense<0.000000e+00> : vector<16x8xf32>
    %110 = tpu.matmul %9, %109, %cst_101 {dimension_numbers = #tpu.dot_dimension_numbers<[1], [0], [0], [1], [0, 0, 1, 1], [], []>} : vector<16x32xf32>, vector<32x8xf32>, vector<16x8xf32> -> vector<16x8xf32>
    %c0_102 = arith.constant 0 : index
    %c2_103 = arith.constant 2 : index
    %c0_104 = arith.constant 0 : index
    %c0_105 = arith.constant 0 : index
    %111 = vector.load %arg10[%c0_102, %c2_103, %c0_104, %c0_105] : memref<2x4x1x8xf32, #tpu.memory_space<vmem>>, vector<1x1x1x8xf32>
    %112 = vector.shape_cast %111 : vector<1x1x1x8xf32> to vector<1x8xf32>
    %113 = vector.broadcast %112 : vector<1x8xf32> to vector<16x8xf32>
    %114 = arith.addf %110, %113 : vector<16x8xf32>
    %115 = vector.shape_cast %100 : vector<16x8xf32> to vector<2x8x8xf32>
    %116 = vector.shape_cast %107 : vector<16x8xf32> to vector<2x8x8xf32>
    %117 = vector.shape_cast %114 : vector<16x8xf32> to vector<2x8x8xf32>
    "tpu.trace_start"() <{level = 10 : i32, message = "bqe,bke->bqk"}> : () -> ()
    %cst_106 = arith.constant dense<0.000000e+00> : vector<2x8x8xf32>
    %118 = tpu.matmul %115, %116, %cst_106 {dimension_numbers = #tpu.dot_dimension_numbers<[2], [2], [1], [1], [0, 0, 0, 1, 1, 1], [0], [0]>} : vector<2x8x8xf32>, vector<2x8x8xf32>, vector<2x8x8xf32> -> vector<2x8x8xf32>
    "tpu.trace_stop"() : () -> ()
    %119 = vector.broadcast %10 : vector<2x1x8xf32> to vector<2x8x8xf32>
    %120 = arith.addf %118, %119 : vector<2x8x8xf32>
    %cst_107 = arith.constant dense<0xFF800000> : vector<2x8xf32>
    %121 = vector.multi_reduction <maximumf>, %120, %cst_107 [2] : vector<2x8x8xf32> to vector<2x8xf32>
    %122 = vector.shape_cast %121 : vector<2x8xf32> to vector<2x8x1xf32>
    %123 = vector.broadcast %122 : vector<2x8x1xf32> to vector<2x8x8xf32>
    %124 = arith.subf %120, %123 : vector<2x8x8xf32>
    %125 = math.exp %124 : vector<2x8x8xf32>
    %cst_108 = arith.constant dense<0.000000e+00> : vector<2x8xf32>
    %126 = vector.multi_reduction <add>, %125, %cst_108 [2] : vector<2x8x8xf32> to vector<2x8xf32>
    %127 = vector.shape_cast %126 : vector<2x8xf32> to vector<2x8x1xf32>
    %128 = vector.broadcast %127 : vector<2x8x1xf32> to vector<2x8x8xf32>
    %129 = arith.divf %125, %128 : vector<2x8x8xf32>
    "tpu.trace_start"() <{level = 10 : i32, message = "bqk,bke->bqe"}> : () -> ()
    %cst_109 = arith.constant dense<0.000000e+00> : vector<2x8x8xf32>
    %130 = tpu.matmul %129, %117, %cst_109 {dimension_numbers = #tpu.dot_dimension_numbers<[2], [1], [1], [2], [0, 0, 0, 1, 1, 2], [0], [0]>} : vector<2x8x8xf32>, vector<2x8x8xf32>, vector<2x8x8xf32> -> vector<2x8x8xf32>
    "tpu.trace_stop"() : () -> ()
    %131 = vector.shape_cast %130 : vector<2x8x8xf32> to vector<16x8xf32>
    %c0_110 = arith.constant 0 : index
    %c2_111 = arith.constant 2 : index
    %c0_112 = arith.constant 0 : index
    %c0_113 = arith.constant 0 : index
    %132 = vector.load %arg11[%c0_110, %c2_111, %c0_112, %c0_113] : memref<2x4x8x32xf32, #tpu.memory_space<vmem>>, vector<1x1x8x32xf32>
    %133 = vector.shape_cast %132 : vector<1x1x8x32xf32> to vector<8x32xf32>
    %cst_114 = arith.constant dense<0.000000e+00> : vector<16x32xf32>
    %134 = tpu.matmul %131, %133, %cst_114 {dimension_numbers = #tpu.dot_dimension_numbers<[1], [0], [0], [1], [0, 0, 1, 1], [], []>} : vector<16x8xf32>, vector<8x32xf32>, vector<16x32xf32> -> vector<16x32xf32>
    %135 = arith.addf %93, %134 : vector<16x32xf32>
    %c0_115 = arith.constant 0 : index
    %c3 = arith.constant 3 : index
    %c0_116 = arith.constant 0 : index
    %c0_117 = arith.constant 0 : index
    %136 = vector.load %arg5[%c0_115, %c3, %c0_116, %c0_117] : memref<2x4x32x8xf32, #tpu.memory_space<vmem>>, vector<1x1x32x8xf32>
    %137 = vector.shape_cast %136 : vector<1x1x32x8xf32> to vector<32x8xf32>
    %cst_118 = arith.constant dense<0.000000e+00> : vector<16x8xf32>
    %138 = tpu.matmul %9, %137, %cst_118 {dimension_numbers = #tpu.dot_dimension_numbers<[1], [0], [0], [1], [0, 0, 1, 1], [], []>} : vector<16x32xf32>, vector<32x8xf32>, vector<16x8xf32> -> vector<16x8xf32>
    %c0_119 = arith.constant 0 : index
    %c3_120 = arith.constant 3 : index
    %c0_121 = arith.constant 0 : index
    %c0_122 = arith.constant 0 : index
    %139 = vector.load %arg6[%c0_119, %c3_120, %c0_121, %c0_122] : memref<2x4x1x8xf32, #tpu.memory_space<vmem>>, vector<1x1x1x8xf32>
    %140 = vector.shape_cast %139 : vector<1x1x1x8xf32> to vector<1x8xf32>
    %141 = vector.broadcast %140 : vector<1x8xf32> to vector<16x8xf32>
    %142 = arith.addf %138, %141 : vector<16x8xf32>
    %c0_123 = arith.constant 0 : index
    %c3_124 = arith.constant 3 : index
    %c0_125 = arith.constant 0 : index
    %c0_126 = arith.constant 0 : index
    %143 = vector.load %arg7[%c0_123, %c3_124, %c0_125, %c0_126] : memref<2x4x32x8xf32, #tpu.memory_space<vmem>>, vector<1x1x32x8xf32>
    %144 = vector.shape_cast %143 : vector<1x1x32x8xf32> to vector<32x8xf32>
    %cst_127 = arith.constant dense<0.000000e+00> : vector<16x8xf32>
    %145 = tpu.matmul %9, %144, %cst_127 {dimension_numbers = #tpu.dot_dimension_numbers<[1], [0], [0], [1], [0, 0, 1, 1], [], []>} : vector<16x32xf32>, vector<32x8xf32>, vector<16x8xf32> -> vector<16x8xf32>
    %c0_128 = arith.constant 0 : index
    %c3_129 = arith.constant 3 : index
    %c0_130 = arith.constant 0 : index
    %c0_131 = arith.constant 0 : index
    %146 = vector.load %arg8[%c0_128, %c3_129, %c0_130, %c0_131] : memref<2x4x1x8xf32, #tpu.memory_space<vmem>>, vector<1x1x1x8xf32>
    %147 = vector.shape_cast %146 : vector<1x1x1x8xf32> to vector<1x8xf32>
    %148 = vector.broadcast %147 : vector<1x8xf32> to vector<16x8xf32>
    %149 = arith.addf %145, %148 : vector<16x8xf32>
    %c0_132 = arith.constant 0 : index
    %c3_133 = arith.constant 3 : index
    %c0_134 = arith.constant 0 : index
    %c0_135 = arith.constant 0 : index
    %150 = vector.load %arg9[%c0_132, %c3_133, %c0_134, %c0_135] : memref<2x4x32x8xf32, #tpu.memory_space<vmem>>, vector<1x1x32x8xf32>
    %151 = vector.shape_cast %150 : vector<1x1x32x8xf32> to vector<32x8xf32>
    %cst_136 = arith.constant dense<0.000000e+00> : vector<16x8xf32>
    %152 = tpu.matmul %9, %151, %cst_136 {dimension_numbers = #tpu.dot_dimension_numbers<[1], [0], [0], [1], [0, 0, 1, 1], [], []>} : vector<16x32xf32>, vector<32x8xf32>, vector<16x8xf32> -> vector<16x8xf32>
    %c0_137 = arith.constant 0 : index
    %c3_138 = arith.constant 3 : index
    %c0_139 = arith.constant 0 : index
    %c0_140 = arith.constant 0 : index
    %153 = vector.load %arg10[%c0_137, %c3_138, %c0_139, %c0_140] : memref<2x4x1x8xf32, #tpu.memory_space<vmem>>, vector<1x1x1x8xf32>
    %154 = vector.shape_cast %153 : vector<1x1x1x8xf32> to vector<1x8xf32>
    %155 = vector.broadcast %154 : vector<1x8xf32> to vector<16x8xf32>
    %156 = arith.addf %152, %155 : vector<16x8xf32>
    %157 = vector.shape_cast %142 : vector<16x8xf32> to vector<2x8x8xf32>
    %158 = vector.shape_cast %149 : vector<16x8xf32> to vector<2x8x8xf32>
    %159 = vector.shape_cast %156 : vector<16x8xf32> to vector<2x8x8xf32>
    "tpu.trace_start"() <{level = 10 : i32, message = "bqe,bke->bqk"}> : () -> ()
    %cst_141 = arith.constant dense<0.000000e+00> : vector<2x8x8xf32>
    %160 = tpu.matmul %157, %158, %cst_141 {dimension_numbers = #tpu.dot_dimension_numbers<[2], [2], [1], [1], [0, 0, 0, 1, 1, 1], [0], [0]>} : vector<2x8x8xf32>, vector<2x8x8xf32>, vector<2x8x8xf32> -> vector<2x8x8xf32>
    "tpu.trace_stop"() : () -> ()
    %161 = vector.broadcast %10 : vector<2x1x8xf32> to vector<2x8x8xf32>
    %162 = arith.addf %160, %161 : vector<2x8x8xf32>
    %cst_142 = arith.constant dense<0xFF800000> : vector<2x8xf32>
    %163 = vector.multi_reduction <maximumf>, %162, %cst_142 [2] : vector<2x8x8xf32> to vector<2x8xf32>
    %164 = vector.shape_cast %163 : vector<2x8xf32> to vector<2x8x1xf32>
    %165 = vector.broadcast %164 : vector<2x8x1xf32> to vector<2x8x8xf32>
    %166 = arith.subf %162, %165 : vector<2x8x8xf32>
    %167 = math.exp %166 : vector<2x8x8xf32>
    %cst_143 = arith.constant dense<0.000000e+00> : vector<2x8xf32>
    %168 = vector.multi_reduction <add>, %167, %cst_143 [2] : vector<2x8x8xf32> to vector<2x8xf32>
    %169 = vector.shape_cast %168 : vector<2x8xf32> to vector<2x8x1xf32>
    %170 = vector.broadcast %169 : vector<2x8x1xf32> to vector<2x8x8xf32>
    %171 = arith.divf %167, %170 : vector<2x8x8xf32>
    "tpu.trace_start"() <{level = 10 : i32, message = "bqk,bke->bqe"}> : () -> ()
    %cst_144 = arith.constant dense<0.000000e+00> : vector<2x8x8xf32>
    %172 = tpu.matmul %171, %159, %cst_144 {dimension_numbers = #tpu.dot_dimension_numbers<[2], [1], [1], [2], [0, 0, 0, 1, 1, 2], [0], [0]>} : vector<2x8x8xf32>, vector<2x8x8xf32>, vector<2x8x8xf32> -> vector<2x8x8xf32>
    "tpu.trace_stop"() : () -> ()
    %173 = vector.shape_cast %172 : vector<2x8x8xf32> to vector<16x8xf32>
    %c0_145 = arith.constant 0 : index
    %c3_146 = arith.constant 3 : index
    %c0_147 = arith.constant 0 : index
    %c0_148 = arith.constant 0 : index
    %174 = vector.load %arg11[%c0_145, %c3_146, %c0_147, %c0_148] : memref<2x4x8x32xf32, #tpu.memory_space<vmem>>, vector<1x1x8x32xf32>
    %175 = vector.shape_cast %174 : vector<1x1x8x32xf32> to vector<8x32xf32>
    %cst_149 = arith.constant dense<0.000000e+00> : vector<16x32xf32>
    %176 = tpu.matmul %173, %175, %cst_149 {dimension_numbers = #tpu.dot_dimension_numbers<[1], [0], [0], [1], [0, 0, 1, 1], [], []>} : vector<16x8xf32>, vector<8x32xf32>, vector<16x32xf32> -> vector<16x32xf32>
    %177 = arith.addf %135, %176 : vector<16x32xf32>
    %c0_150 = arith.constant 0 : index
    %c0_151 = arith.constant 0 : index
    %c0_152 = arith.constant 0 : index
    %178 = vector.load %arg12[%c0_150, %c0_151, %c0_152] : memref<2x1x32xf32, #tpu.memory_space<vmem>>, vector<1x1x32xf32>
    %179 = vector.shape_cast %178 : vector<1x1x32xf32> to vector<1x32xf32>
    %180 = vector.broadcast %179 : vector<1x32xf32> to vector<16x32xf32>
    %181 = arith.addf %177, %180 : vector<16x32xf32>
    %182 = arith.addf %9, %181 : vector<16x32xf32>
    %c0_153 = arith.constant 0 : index
    %c0_154 = arith.constant 0 : index
    %c0_155 = arith.constant 0 : index
    %183 = vector.load %arg17[%c0_153, %c0_154, %c0_155] : memref<2x1x32xf32, #tpu.memory_space<vmem>>, vector<1x1x32xf32>
    %184 = vector.shape_cast %183 : vector<1x1x32xf32> to vector<1x32xf32>
    %185 = vector.broadcast %184 : vector<1x32xf32> to vector<16x32xf32>
    %186 = arith.mulf %182, %185 : vector<16x32xf32>
    %c0_156 = arith.constant 0 : index
    %c0_157 = arith.constant 0 : index
    %c0_158 = arith.constant 0 : index
    %187 = vector.load %arg18[%c0_156, %c0_157, %c0_158] : memref<2x1x32xf32, #tpu.memory_space<vmem>>, vector<1x1x32xf32>
    %188 = vector.shape_cast %187 : vector<1x1x32xf32> to vector<1x32xf32>
    %189 = vector.broadcast %188 : vector<1x32xf32> to vector<16x32xf32>
    %190 = arith.addf %186, %189 : vector<16x32xf32>
    %c0_159 = arith.constant 0 : index
    %c0_160 = arith.constant 0 : index
    %c0_161 = arith.constant 0 : index
    %191 = vector.load %arg13[%c0_159, %c0_160, %c0_161] : memref<2x32x64xf32, #tpu.memory_space<vmem>>, vector<1x32x64xf32>
    %192 = vector.shape_cast %191 : vector<1x32x64xf32> to vector<32x64xf32>
    %cst_162 = arith.constant dense<0.000000e+00> : vector<16x64xf32>
    %193 = tpu.matmul %190, %192, %cst_162 {dimension_numbers = #tpu.dot_dimension_numbers<[1], [0], [0], [1], [0, 0, 1, 1], [], []>} : vector<16x32xf32>, vector<32x64xf32>, vector<16x64xf32> -> vector<16x64xf32>
    %c0_163 = arith.constant 0 : index
    %c0_164 = arith.constant 0 : index
    %c0_165 = arith.constant 0 : index
    %194 = vector.load %arg14[%c0_163, %c0_164, %c0_165] : memref<2x1x64xf32, #tpu.memory_space<vmem>>, vector<1x1x64xf32>
    %195 = vector.shape_cast %194 : vector<1x1x64xf32> to vector<1x64xf32>
    %196 = vector.broadcast %195 : vector<1x64xf32> to vector<16x64xf32>
    %197 = arith.addf %193, %196 : vector<16x64xf32>
    %cst_166 = arith.constant 5.000000e-01 : f32
    %198 = vector.broadcast %cst_166 : f32 to vector<16x64xf32>
    %199 = arith.mulf %198, %197 : vector<16x64xf32>
    %cst_167 = arith.constant 0.707106769 : f32
    %200 = vector.broadcast %cst_167 : f32 to vector<16x64xf32>
    %201 = arith.mulf %197, %200 : vector<16x64xf32>
    %cst_168 = arith.constant 0.000000e+00 : f32
    %202 = vector.broadcast %cst_168 : f32 to vector<16x64xf32>
    %203 = arith.cmpf oge, %201, %202 : vector<16x64xf32>
    %cst_169 = arith.constant 1.000000e+00 : f32
    %cst_170 = arith.constant -1.000000e+00 : f32
    %204 = vector.broadcast %cst_169 : f32 to vector<16x64xf32>
    %205 = vector.broadcast %cst_170 : f32 to vector<16x64xf32>
    %206 = arith.select %203, %204, %205 : vector<16x64xi1>, vector<16x64xf32>
    %207 = math.absf %201 : vector<16x64xf32>
    %cst_171 = arith.constant 0.327591091 : f32
    %208 = vector.broadcast %cst_171 : f32 to vector<16x64xf32>
    %209 = arith.mulf %208, %207 : vector<16x64xf32>
    %cst_172 = arith.constant 1.000000e+00 : f32
    %210 = vector.broadcast %cst_172 : f32 to vector<16x64xf32>
    %211 = arith.addf %210, %209 : vector<16x64xf32>
    %cst_173 = arith.constant 1.000000e+00 : f32
    %212 = vector.broadcast %cst_173 : f32 to vector<16x64xf32>
    %213 = arith.divf %212, %211 : vector<16x64xf32>
    %cst_174 = arith.constant 1.06140542 : f32
    %214 = vector.broadcast %cst_174 : f32 to vector<16x64xf32>
    %215 = arith.mulf %214, %213 : vector<16x64xf32>
    %cst_175 = arith.constant -1.45315206 : f32
    %216 = vector.broadcast %cst_175 : f32 to vector<16x64xf32>
    %217 = arith.addf %215, %216 : vector<16x64xf32>
    %218 = arith.mulf %217, %213 : vector<16x64xf32>
    %cst_176 = arith.constant 1.42141378 : f32
    %219 = vector.broadcast %cst_176 : f32 to vector<16x64xf32>
    %220 = arith.addf %218, %219 : vector<16x64xf32>
    %221 = arith.mulf %220, %213 : vector<16x64xf32>
    %cst_177 = arith.constant -0.284496725 : f32
    %222 = vector.broadcast %cst_177 : f32 to vector<16x64xf32>
    %223 = arith.addf %221, %222 : vector<16x64xf32>
    %224 = arith.mulf %223, %213 : vector<16x64xf32>
    %cst_178 = arith.constant 0.254829586 : f32
    %225 = vector.broadcast %cst_178 : f32 to vector<16x64xf32>
    %226 = arith.addf %224, %225 : vector<16x64xf32>
    %227 = arith.mulf %226, %213 : vector<16x64xf32>
    %cst_179 = arith.constant 0.000000e+00 : f32
    %228 = vector.broadcast %cst_179 : f32 to vector<16x64xf32>
    %229 = arith.subf %228, %207 : vector<16x64xf32>
    %230 = arith.mulf %229, %207 : vector<16x64xf32>
    %231 = math.exp %230 : vector<16x64xf32>
    %232 = arith.mulf %227, %231 : vector<16x64xf32>
    %cst_180 = arith.constant 1.000000e+00 : f32
    %233 = vector.broadcast %cst_180 : f32 to vector<16x64xf32>
    %234 = arith.subf %233, %232 : vector<16x64xf32>
    %235 = arith.mulf %206, %234 : vector<16x64xf32>
    %cst_181 = arith.constant 1.000000e+00 : f32
    %236 = vector.broadcast %cst_181 : f32 to vector<16x64xf32>
    %237 = arith.addf %236, %235 : vector<16x64xf32>
    %238 = arith.mulf %199, %237 : vector<16x64xf32>
    %c0_182 = arith.constant 0 : index
    %c0_183 = arith.constant 0 : index
    %c0_184 = arith.constant 0 : index
    %239 = vector.load %arg15[%c0_182, %c0_183, %c0_184] : memref<2x64x32xf32, #tpu.memory_space<vmem>>, vector<1x64x32xf32>
    %240 = vector.shape_cast %239 : vector<1x64x32xf32> to vector<64x32xf32>
    %cst_185 = arith.constant dense<0.000000e+00> : vector<16x32xf32>
    %241 = tpu.matmul %238, %240, %cst_185 {dimension_numbers = #tpu.dot_dimension_numbers<[1], [0], [0], [1], [0, 0, 1, 1], [], []>} : vector<16x64xf32>, vector<64x32xf32>, vector<16x32xf32> -> vector<16x32xf32>
    %c0_186 = arith.constant 0 : index
    %c0_187 = arith.constant 0 : index
    %c0_188 = arith.constant 0 : index
    %242 = vector.load %arg16[%c0_186, %c0_187, %c0_188] : memref<2x1x32xf32, #tpu.memory_space<vmem>>, vector<1x1x32xf32>
    %243 = vector.shape_cast %242 : vector<1x1x32xf32> to vector<1x32xf32>
    %244 = vector.broadcast %243 : vector<1x32xf32> to vector<16x32xf32>
    %245 = arith.addf %241, %244 : vector<16x32xf32>
    %246 = arith.addf %190, %245 : vector<16x32xf32>
    %c0_189 = arith.constant 0 : index
    %c0_190 = arith.constant 0 : index
    %c0_191 = arith.constant 0 : index
    %247 = vector.load %arg19[%c0_189, %c0_190, %c0_191] : memref<2x1x32xf32, #tpu.memory_space<vmem>>, vector<1x1x32xf32>
    %248 = vector.shape_cast %247 : vector<1x1x32xf32> to vector<1x32xf32>
    %249 = vector.broadcast %248 : vector<1x32xf32> to vector<16x32xf32>
    %250 = arith.mulf %246, %249 : vector<16x32xf32>
    %c0_192 = arith.constant 0 : index
    %c0_193 = arith.constant 0 : index
    %c0_194 = arith.constant 0 : index
    %251 = vector.load %arg20[%c0_192, %c0_193, %c0_194] : memref<2x1x32xf32, #tpu.memory_space<vmem>>, vector<1x1x32xf32>
    %252 = vector.shape_cast %251 : vector<1x1x32xf32> to vector<1x32xf32>
    %253 = vector.broadcast %252 : vector<1x32xf32> to vector<16x32xf32>
    %254 = arith.addf %250, %253 : vector<16x32xf32>
    %c1_195 = arith.constant 1 : index
    %c0_196 = arith.constant 0 : index
    %c0_197 = arith.constant 0 : index
    %c0_198 = arith.constant 0 : index
    %255 = vector.load %arg5[%c1_195, %c0_196, %c0_197, %c0_198] : memref<2x4x32x8xf32, #tpu.memory_space<vmem>>, vector<1x1x32x8xf32>
    %256 = vector.shape_cast %255 : vector<1x1x32x8xf32> to vector<32x8xf32>
    %cst_199 = arith.constant dense<0.000000e+00> : vector<16x8xf32>
    %257 = tpu.matmul %254, %256, %cst_199 {dimension_numbers = #tpu.dot_dimension_numbers<[1], [0], [0], [1], [0, 0, 1, 1], [], []>} : vector<16x32xf32>, vector<32x8xf32>, vector<16x8xf32> -> vector<16x8xf32>
    %c1_200 = arith.constant 1 : index
    %c0_201 = arith.constant 0 : index
    %c0_202 = arith.constant 0 : index
    %c0_203 = arith.constant 0 : index
    %258 = vector.load %arg6[%c1_200, %c0_201, %c0_202, %c0_203] : memref<2x4x1x8xf32, #tpu.memory_space<vmem>>, vector<1x1x1x8xf32>
    %259 = vector.shape_cast %258 : vector<1x1x1x8xf32> to vector<1x8xf32>
    %260 = vector.broadcast %259 : vector<1x8xf32> to vector<16x8xf32>
    %261 = arith.addf %257, %260 : vector<16x8xf32>
    %c1_204 = arith.constant 1 : index
    %c0_205 = arith.constant 0 : index
    %c0_206 = arith.constant 0 : index
    %c0_207 = arith.constant 0 : index
    %262 = vector.load %arg7[%c1_204, %c0_205, %c0_206, %c0_207] : memref<2x4x32x8xf32, #tpu.memory_space<vmem>>, vector<1x1x32x8xf32>
    %263 = vector.shape_cast %262 : vector<1x1x32x8xf32> to vector<32x8xf32>
    %cst_208 = arith.constant dense<0.000000e+00> : vector<16x8xf32>
    %264 = tpu.matmul %254, %263, %cst_208 {dimension_numbers = #tpu.dot_dimension_numbers<[1], [0], [0], [1], [0, 0, 1, 1], [], []>} : vector<16x32xf32>, vector<32x8xf32>, vector<16x8xf32> -> vector<16x8xf32>
    %c1_209 = arith.constant 1 : index
    %c0_210 = arith.constant 0 : index
    %c0_211 = arith.constant 0 : index
    %c0_212 = arith.constant 0 : index
    %265 = vector.load %arg8[%c1_209, %c0_210, %c0_211, %c0_212] : memref<2x4x1x8xf32, #tpu.memory_space<vmem>>, vector<1x1x1x8xf32>
    %266 = vector.shape_cast %265 : vector<1x1x1x8xf32> to vector<1x8xf32>
    %267 = vector.broadcast %266 : vector<1x8xf32> to vector<16x8xf32>
    %268 = arith.addf %264, %267 : vector<16x8xf32>
    %c1_213 = arith.constant 1 : index
    %c0_214 = arith.constant 0 : index
    %c0_215 = arith.constant 0 : index
    %c0_216 = arith.constant 0 : index
    %269 = vector.load %arg9[%c1_213, %c0_214, %c0_215, %c0_216] : memref<2x4x32x8xf32, #tpu.memory_space<vmem>>, vector<1x1x32x8xf32>
    %270 = vector.shape_cast %269 : vector<1x1x32x8xf32> to vector<32x8xf32>
    %cst_217 = arith.constant dense<0.000000e+00> : vector<16x8xf32>
    %271 = tpu.matmul %254, %270, %cst_217 {dimension_numbers = #tpu.dot_dimension_numbers<[1], [0], [0], [1], [0, 0, 1, 1], [], []>} : vector<16x32xf32>, vector<32x8xf32>, vector<16x8xf32> -> vector<16x8xf32>
    %c1_218 = arith.constant 1 : index
    %c0_219 = arith.constant 0 : index
    %c0_220 = arith.constant 0 : index
    %c0_221 = arith.constant 0 : index
    %272 = vector.load %arg10[%c1_218, %c0_219, %c0_220, %c0_221] : memref<2x4x1x8xf32, #tpu.memory_space<vmem>>, vector<1x1x1x8xf32>
    %273 = vector.shape_cast %272 : vector<1x1x1x8xf32> to vector<1x8xf32>
    %274 = vector.broadcast %273 : vector<1x8xf32> to vector<16x8xf32>
    %275 = arith.addf %271, %274 : vector<16x8xf32>
    %276 = vector.shape_cast %261 : vector<16x8xf32> to vector<2x8x8xf32>
    %277 = vector.shape_cast %268 : vector<16x8xf32> to vector<2x8x8xf32>
    %278 = vector.shape_cast %275 : vector<16x8xf32> to vector<2x8x8xf32>
    "tpu.trace_start"() <{level = 10 : i32, message = "bqe,bke->bqk"}> : () -> ()
    %cst_222 = arith.constant dense<0.000000e+00> : vector<2x8x8xf32>
    %279 = tpu.matmul %276, %277, %cst_222 {dimension_numbers = #tpu.dot_dimension_numbers<[2], [2], [1], [1], [0, 0, 0, 1, 1, 1], [0], [0]>} : vector<2x8x8xf32>, vector<2x8x8xf32>, vector<2x8x8xf32> -> vector<2x8x8xf32>
    "tpu.trace_stop"() : () -> ()
    %280 = vector.broadcast %10 : vector<2x1x8xf32> to vector<2x8x8xf32>
    %281 = arith.addf %279, %280 : vector<2x8x8xf32>
    %cst_223 = arith.constant dense<0xFF800000> : vector<2x8xf32>
    %282 = vector.multi_reduction <maximumf>, %281, %cst_223 [2] : vector<2x8x8xf32> to vector<2x8xf32>
    %283 = vector.shape_cast %282 : vector<2x8xf32> to vector<2x8x1xf32>
    %284 = vector.broadcast %283 : vector<2x8x1xf32> to vector<2x8x8xf32>
    %285 = arith.subf %281, %284 : vector<2x8x8xf32>
    %286 = math.exp %285 : vector<2x8x8xf32>
    %cst_224 = arith.constant dense<0.000000e+00> : vector<2x8xf32>
    %287 = vector.multi_reduction <add>, %286, %cst_224 [2] : vector<2x8x8xf32> to vector<2x8xf32>
    %288 = vector.shape_cast %287 : vector<2x8xf32> to vector<2x8x1xf32>
    %289 = vector.broadcast %288 : vector<2x8x1xf32> to vector<2x8x8xf32>
    %290 = arith.divf %286, %289 : vector<2x8x8xf32>
    "tpu.trace_start"() <{level = 10 : i32, message = "bqk,bke->bqe"}> : () -> ()
    %cst_225 = arith.constant dense<0.000000e+00> : vector<2x8x8xf32>
    %291 = tpu.matmul %290, %278, %cst_225 {dimension_numbers = #tpu.dot_dimension_numbers<[2], [1], [1], [2], [0, 0, 0, 1, 1, 2], [0], [0]>} : vector<2x8x8xf32>, vector<2x8x8xf32>, vector<2x8x8xf32> -> vector<2x8x8xf32>
    "tpu.trace_stop"() : () -> ()
    %292 = vector.shape_cast %291 : vector<2x8x8xf32> to vector<16x8xf32>
    %c1_226 = arith.constant 1 : index
    %c0_227 = arith.constant 0 : index
    %c0_228 = arith.constant 0 : index
    %c0_229 = arith.constant 0 : index
    %293 = vector.load %arg11[%c1_226, %c0_227, %c0_228, %c0_229] : memref<2x4x8x32xf32, #tpu.memory_space<vmem>>, vector<1x1x8x32xf32>
    %294 = vector.shape_cast %293 : vector<1x1x8x32xf32> to vector<8x32xf32>
    %cst_230 = arith.constant dense<0.000000e+00> : vector<16x32xf32>
    %295 = tpu.matmul %292, %294, %cst_230 {dimension_numbers = #tpu.dot_dimension_numbers<[1], [0], [0], [1], [0, 0, 1, 1], [], []>} : vector<16x8xf32>, vector<8x32xf32>, vector<16x32xf32> -> vector<16x32xf32>
    %c1_231 = arith.constant 1 : index
    %c1_232 = arith.constant 1 : index
    %c0_233 = arith.constant 0 : index
    %c0_234 = arith.constant 0 : index
    %296 = vector.load %arg5[%c1_231, %c1_232, %c0_233, %c0_234] : memref<2x4x32x8xf32, #tpu.memory_space<vmem>>, vector<1x1x32x8xf32>
    %297 = vector.shape_cast %296 : vector<1x1x32x8xf32> to vector<32x8xf32>
    %cst_235 = arith.constant dense<0.000000e+00> : vector<16x8xf32>
    %298 = tpu.matmul %254, %297, %cst_235 {dimension_numbers = #tpu.dot_dimension_numbers<[1], [0], [0], [1], [0, 0, 1, 1], [], []>} : vector<16x32xf32>, vector<32x8xf32>, vector<16x8xf32> -> vector<16x8xf32>
    %c1_236 = arith.constant 1 : index
    %c1_237 = arith.constant 1 : index
    %c0_238 = arith.constant 0 : index
    %c0_239 = arith.constant 0 : index
    %299 = vector.load %arg6[%c1_236, %c1_237, %c0_238, %c0_239] : memref<2x4x1x8xf32, #tpu.memory_space<vmem>>, vector<1x1x1x8xf32>
    %300 = vector.shape_cast %299 : vector<1x1x1x8xf32> to vector<1x8xf32>
    %301 = vector.broadcast %300 : vector<1x8xf32> to vector<16x8xf32>
    %302 = arith.addf %298, %301 : vector<16x8xf32>
    %c1_240 = arith.constant 1 : index
    %c1_241 = arith.constant 1 : index
    %c0_242 = arith.constant 0 : index
    %c0_243 = arith.constant 0 : index
    %303 = vector.load %arg7[%c1_240, %c1_241, %c0_242, %c0_243] : memref<2x4x32x8xf32, #tpu.memory_space<vmem>>, vector<1x1x32x8xf32>
    %304 = vector.shape_cast %303 : vector<1x1x32x8xf32> to vector<32x8xf32>
    %cst_244 = arith.constant dense<0.000000e+00> : vector<16x8xf32>
    %305 = tpu.matmul %254, %304, %cst_244 {dimension_numbers = #tpu.dot_dimension_numbers<[1], [0], [0], [1], [0, 0, 1, 1], [], []>} : vector<16x32xf32>, vector<32x8xf32>, vector<16x8xf32> -> vector<16x8xf32>
    %c1_245 = arith.constant 1 : index
    %c1_246 = arith.constant 1 : index
    %c0_247 = arith.constant 0 : index
    %c0_248 = arith.constant 0 : index
    %306 = vector.load %arg8[%c1_245, %c1_246, %c0_247, %c0_248] : memref<2x4x1x8xf32, #tpu.memory_space<vmem>>, vector<1x1x1x8xf32>
    %307 = vector.shape_cast %306 : vector<1x1x1x8xf32> to vector<1x8xf32>
    %308 = vector.broadcast %307 : vector<1x8xf32> to vector<16x8xf32>
    %309 = arith.addf %305, %308 : vector<16x8xf32>
    %c1_249 = arith.constant 1 : index
    %c1_250 = arith.constant 1 : index
    %c0_251 = arith.constant 0 : index
    %c0_252 = arith.constant 0 : index
    %310 = vector.load %arg9[%c1_249, %c1_250, %c0_251, %c0_252] : memref<2x4x32x8xf32, #tpu.memory_space<vmem>>, vector<1x1x32x8xf32>
    %311 = vector.shape_cast %310 : vector<1x1x32x8xf32> to vector<32x8xf32>
    %cst_253 = arith.constant dense<0.000000e+00> : vector<16x8xf32>
    %312 = tpu.matmul %254, %311, %cst_253 {dimension_numbers = #tpu.dot_dimension_numbers<[1], [0], [0], [1], [0, 0, 1, 1], [], []>} : vector<16x32xf32>, vector<32x8xf32>, vector<16x8xf32> -> vector<16x8xf32>
    %c1_254 = arith.constant 1 : index
    %c1_255 = arith.constant 1 : index
    %c0_256 = arith.constant 0 : index
    %c0_257 = arith.constant 0 : index
    %313 = vector.load %arg10[%c1_254, %c1_255, %c0_256, %c0_257] : memref<2x4x1x8xf32, #tpu.memory_space<vmem>>, vector<1x1x1x8xf32>
    %314 = vector.shape_cast %313 : vector<1x1x1x8xf32> to vector<1x8xf32>
    %315 = vector.broadcast %314 : vector<1x8xf32> to vector<16x8xf32>
    %316 = arith.addf %312, %315 : vector<16x8xf32>
    %317 = vector.shape_cast %302 : vector<16x8xf32> to vector<2x8x8xf32>
    %318 = vector.shape_cast %309 : vector<16x8xf32> to vector<2x8x8xf32>
    %319 = vector.shape_cast %316 : vector<16x8xf32> to vector<2x8x8xf32>
    "tpu.trace_start"() <{level = 10 : i32, message = "bqe,bke->bqk"}> : () -> ()
    %cst_258 = arith.constant dense<0.000000e+00> : vector<2x8x8xf32>
    %320 = tpu.matmul %317, %318, %cst_258 {dimension_numbers = #tpu.dot_dimension_numbers<[2], [2], [1], [1], [0, 0, 0, 1, 1, 1], [0], [0]>} : vector<2x8x8xf32>, vector<2x8x8xf32>, vector<2x8x8xf32> -> vector<2x8x8xf32>
    "tpu.trace_stop"() : () -> ()
    %321 = vector.broadcast %10 : vector<2x1x8xf32> to vector<2x8x8xf32>
    %322 = arith.addf %320, %321 : vector<2x8x8xf32>
    %cst_259 = arith.constant dense<0xFF800000> : vector<2x8xf32>
    %323 = vector.multi_reduction <maximumf>, %322, %cst_259 [2] : vector<2x8x8xf32> to vector<2x8xf32>
    %324 = vector.shape_cast %323 : vector<2x8xf32> to vector<2x8x1xf32>
    %325 = vector.broadcast %324 : vector<2x8x1xf32> to vector<2x8x8xf32>
    %326 = arith.subf %322, %325 : vector<2x8x8xf32>
    %327 = math.exp %326 : vector<2x8x8xf32>
    %cst_260 = arith.constant dense<0.000000e+00> : vector<2x8xf32>
    %328 = vector.multi_reduction <add>, %327, %cst_260 [2] : vector<2x8x8xf32> to vector<2x8xf32>
    %329 = vector.shape_cast %328 : vector<2x8xf32> to vector<2x8x1xf32>
    %330 = vector.broadcast %329 : vector<2x8x1xf32> to vector<2x8x8xf32>
    %331 = arith.divf %327, %330 : vector<2x8x8xf32>
    "tpu.trace_start"() <{level = 10 : i32, message = "bqk,bke->bqe"}> : () -> ()
    %cst_261 = arith.constant dense<0.000000e+00> : vector<2x8x8xf32>
    %332 = tpu.matmul %331, %319, %cst_261 {dimension_numbers = #tpu.dot_dimension_numbers<[2], [1], [1], [2], [0, 0, 0, 1, 1, 2], [0], [0]>} : vector<2x8x8xf32>, vector<2x8x8xf32>, vector<2x8x8xf32> -> vector<2x8x8xf32>
    "tpu.trace_stop"() : () -> ()
    %333 = vector.shape_cast %332 : vector<2x8x8xf32> to vector<16x8xf32>
    %c1_262 = arith.constant 1 : index
    %c1_263 = arith.constant 1 : index
    %c0_264 = arith.constant 0 : index
    %c0_265 = arith.constant 0 : index
    %334 = vector.load %arg11[%c1_262, %c1_263, %c0_264, %c0_265] : memref<2x4x8x32xf32, #tpu.memory_space<vmem>>, vector<1x1x8x32xf32>
    %335 = vector.shape_cast %334 : vector<1x1x8x32xf32> to vector<8x32xf32>
    %cst_266 = arith.constant dense<0.000000e+00> : vector<16x32xf32>
    %336 = tpu.matmul %333, %335, %cst_266 {dimension_numbers = #tpu.dot_dimension_numbers<[1], [0], [0], [1], [0, 0, 1, 1], [], []>} : vector<16x8xf32>, vector<8x32xf32>, vector<16x32xf32> -> vector<16x32xf32>
    %337 = arith.addf %295, %336 : vector<16x32xf32>
    %c1_267 = arith.constant 1 : index
    %c2_268 = arith.constant 2 : index
    %c0_269 = arith.constant 0 : index
    %c0_270 = arith.constant 0 : index
    %338 = vector.load %arg5[%c1_267, %c2_268, %c0_269, %c0_270] : memref<2x4x32x8xf32, #tpu.memory_space<vmem>>, vector<1x1x32x8xf32>
    %339 = vector.shape_cast %338 : vector<1x1x32x8xf32> to vector<32x8xf32>
    %cst_271 = arith.constant dense<0.000000e+00> : vector<16x8xf32>
    %340 = tpu.matmul %254, %339, %cst_271 {dimension_numbers = #tpu.dot_dimension_numbers<[1], [0], [0], [1], [0, 0, 1, 1], [], []>} : vector<16x32xf32>, vector<32x8xf32>, vector<16x8xf32> -> vector<16x8xf32>
    %c1_272 = arith.constant 1 : index
    %c2_273 = arith.constant 2 : index
    %c0_274 = arith.constant 0 : index
    %c0_275 = arith.constant 0 : index
    %341 = vector.load %arg6[%c1_272, %c2_273, %c0_274, %c0_275] : memref<2x4x1x8xf32, #tpu.memory_space<vmem>>, vector<1x1x1x8xf32>
    %342 = vector.shape_cast %341 : vector<1x1x1x8xf32> to vector<1x8xf32>
    %343 = vector.broadcast %342 : vector<1x8xf32> to vector<16x8xf32>
    %344 = arith.addf %340, %343 : vector<16x8xf32>
    %c1_276 = arith.constant 1 : index
    %c2_277 = arith.constant 2 : index
    %c0_278 = arith.constant 0 : index
    %c0_279 = arith.constant 0 : index
    %345 = vector.load %arg7[%c1_276, %c2_277, %c0_278, %c0_279] : memref<2x4x32x8xf32, #tpu.memory_space<vmem>>, vector<1x1x32x8xf32>
    %346 = vector.shape_cast %345 : vector<1x1x32x8xf32> to vector<32x8xf32>
    %cst_280 = arith.constant dense<0.000000e+00> : vector<16x8xf32>
    %347 = tpu.matmul %254, %346, %cst_280 {dimension_numbers = #tpu.dot_dimension_numbers<[1], [0], [0], [1], [0, 0, 1, 1], [], []>} : vector<16x32xf32>, vector<32x8xf32>, vector<16x8xf32> -> vector<16x8xf32>
    %c1_281 = arith.constant 1 : index
    %c2_282 = arith.constant 2 : index
    %c0_283 = arith.constant 0 : index
    %c0_284 = arith.constant 0 : index
    %348 = vector.load %arg8[%c1_281, %c2_282, %c0_283, %c0_284] : memref<2x4x1x8xf32, #tpu.memory_space<vmem>>, vector<1x1x1x8xf32>
    %349 = vector.shape_cast %348 : vector<1x1x1x8xf32> to vector<1x8xf32>
    %350 = vector.broadcast %349 : vector<1x8xf32> to vector<16x8xf32>
    %351 = arith.addf %347, %350 : vector<16x8xf32>
    %c1_285 = arith.constant 1 : index
    %c2_286 = arith.constant 2 : index
    %c0_287 = arith.constant 0 : index
    %c0_288 = arith.constant 0 : index
    %352 = vector.load %arg9[%c1_285, %c2_286, %c0_287, %c0_288] : memref<2x4x32x8xf32, #tpu.memory_space<vmem>>, vector<1x1x32x8xf32>
    %353 = vector.shape_cast %352 : vector<1x1x32x8xf32> to vector<32x8xf32>
    %cst_289 = arith.constant dense<0.000000e+00> : vector<16x8xf32>
    %354 = tpu.matmul %254, %353, %cst_289 {dimension_numbers = #tpu.dot_dimension_numbers<[1], [0], [0], [1], [0, 0, 1, 1], [], []>} : vector<16x32xf32>, vector<32x8xf32>, vector<16x8xf32> -> vector<16x8xf32>
    %c1_290 = arith.constant 1 : index
    %c2_291 = arith.constant 2 : index
    %c0_292 = arith.constant 0 : index
    %c0_293 = arith.constant 0 : index
    %355 = vector.load %arg10[%c1_290, %c2_291, %c0_292, %c0_293] : memref<2x4x1x8xf32, #tpu.memory_space<vmem>>, vector<1x1x1x8xf32>
    %356 = vector.shape_cast %355 : vector<1x1x1x8xf32> to vector<1x8xf32>
    %357 = vector.broadcast %356 : vector<1x8xf32> to vector<16x8xf32>
    %358 = arith.addf %354, %357 : vector<16x8xf32>
    %359 = vector.shape_cast %344 : vector<16x8xf32> to vector<2x8x8xf32>
    %360 = vector.shape_cast %351 : vector<16x8xf32> to vector<2x8x8xf32>
    %361 = vector.shape_cast %358 : vector<16x8xf32> to vector<2x8x8xf32>
    "tpu.trace_start"() <{level = 10 : i32, message = "bqe,bke->bqk"}> : () -> ()
    %cst_294 = arith.constant dense<0.000000e+00> : vector<2x8x8xf32>
    %362 = tpu.matmul %359, %360, %cst_294 {dimension_numbers = #tpu.dot_dimension_numbers<[2], [2], [1], [1], [0, 0, 0, 1, 1, 1], [0], [0]>} : vector<2x8x8xf32>, vector<2x8x8xf32>, vector<2x8x8xf32> -> vector<2x8x8xf32>
    "tpu.trace_stop"() : () -> ()
    %363 = vector.broadcast %10 : vector<2x1x8xf32> to vector<2x8x8xf32>
    %364 = arith.addf %362, %363 : vector<2x8x8xf32>
    %cst_295 = arith.constant dense<0xFF800000> : vector<2x8xf32>
    %365 = vector.multi_reduction <maximumf>, %364, %cst_295 [2] : vector<2x8x8xf32> to vector<2x8xf32>
    %366 = vector.shape_cast %365 : vector<2x8xf32> to vector<2x8x1xf32>
    %367 = vector.broadcast %366 : vector<2x8x1xf32> to vector<2x8x8xf32>
    %368 = arith.subf %364, %367 : vector<2x8x8xf32>
    %369 = math.exp %368 : vector<2x8x8xf32>
    %cst_296 = arith.constant dense<0.000000e+00> : vector<2x8xf32>
    %370 = vector.multi_reduction <add>, %369, %cst_296 [2] : vector<2x8x8xf32> to vector<2x8xf32>
    %371 = vector.shape_cast %370 : vector<2x8xf32> to vector<2x8x1xf32>
    %372 = vector.broadcast %371 : vector<2x8x1xf32> to vector<2x8x8xf32>
    %373 = arith.divf %369, %372 : vector<2x8x8xf32>
    "tpu.trace_start"() <{level = 10 : i32, message = "bqk,bke->bqe"}> : () -> ()
    %cst_297 = arith.constant dense<0.000000e+00> : vector<2x8x8xf32>
    %374 = tpu.matmul %373, %361, %cst_297 {dimension_numbers = #tpu.dot_dimension_numbers<[2], [1], [1], [2], [0, 0, 0, 1, 1, 2], [0], [0]>} : vector<2x8x8xf32>, vector<2x8x8xf32>, vector<2x8x8xf32> -> vector<2x8x8xf32>
    "tpu.trace_stop"() : () -> ()
    %375 = vector.shape_cast %374 : vector<2x8x8xf32> to vector<16x8xf32>
    %c1_298 = arith.constant 1 : index
    %c2_299 = arith.constant 2 : index
    %c0_300 = arith.constant 0 : index
    %c0_301 = arith.constant 0 : index
    %376 = vector.load %arg11[%c1_298, %c2_299, %c0_300, %c0_301] : memref<2x4x8x32xf32, #tpu.memory_space<vmem>>, vector<1x1x8x32xf32>
    %377 = vector.shape_cast %376 : vector<1x1x8x32xf32> to vector<8x32xf32>
    %cst_302 = arith.constant dense<0.000000e+00> : vector<16x32xf32>
    %378 = tpu.matmul %375, %377, %cst_302 {dimension_numbers = #tpu.dot_dimension_numbers<[1], [0], [0], [1], [0, 0, 1, 1], [], []>} : vector<16x8xf32>, vector<8x32xf32>, vector<16x32xf32> -> vector<16x32xf32>
    %379 = arith.addf %337, %378 : vector<16x32xf32>
    %c1_303 = arith.constant 1 : index
    %c3_304 = arith.constant 3 : index
    %c0_305 = arith.constant 0 : index
    %c0_306 = arith.constant 0 : index
    %380 = vector.load %arg5[%c1_303, %c3_304, %c0_305, %c0_306] : memref<2x4x32x8xf32, #tpu.memory_space<vmem>>, vector<1x1x32x8xf32>
    %381 = vector.shape_cast %380 : vector<1x1x32x8xf32> to vector<32x8xf32>
    %cst_307 = arith.constant dense<0.000000e+00> : vector<16x8xf32>
    %382 = tpu.matmul %254, %381, %cst_307 {dimension_numbers = #tpu.dot_dimension_numbers<[1], [0], [0], [1], [0, 0, 1, 1], [], []>} : vector<16x32xf32>, vector<32x8xf32>, vector<16x8xf32> -> vector<16x8xf32>
    %c1_308 = arith.constant 1 : index
    %c3_309 = arith.constant 3 : index
    %c0_310 = arith.constant 0 : index
    %c0_311 = arith.constant 0 : index
    %383 = vector.load %arg6[%c1_308, %c3_309, %c0_310, %c0_311] : memref<2x4x1x8xf32, #tpu.memory_space<vmem>>, vector<1x1x1x8xf32>
    %384 = vector.shape_cast %383 : vector<1x1x1x8xf32> to vector<1x8xf32>
    %385 = vector.broadcast %384 : vector<1x8xf32> to vector<16x8xf32>
    %386 = arith.addf %382, %385 : vector<16x8xf32>
    %c1_312 = arith.constant 1 : index
    %c3_313 = arith.constant 3 : index
    %c0_314 = arith.constant 0 : index
    %c0_315 = arith.constant 0 : index
    %387 = vector.load %arg7[%c1_312, %c3_313, %c0_314, %c0_315] : memref<2x4x32x8xf32, #tpu.memory_space<vmem>>, vector<1x1x32x8xf32>
    %388 = vector.shape_cast %387 : vector<1x1x32x8xf32> to vector<32x8xf32>
    %cst_316 = arith.constant dense<0.000000e+00> : vector<16x8xf32>
    %389 = tpu.matmul %254, %388, %cst_316 {dimension_numbers = #tpu.dot_dimension_numbers<[1], [0], [0], [1], [0, 0, 1, 1], [], []>} : vector<16x32xf32>, vector<32x8xf32>, vector<16x8xf32> -> vector<16x8xf32>
    %c1_317 = arith.constant 1 : index
    %c3_318 = arith.constant 3 : index
    %c0_319 = arith.constant 0 : index
    %c0_320 = arith.constant 0 : index
    %390 = vector.load %arg8[%c1_317, %c3_318, %c0_319, %c0_320] : memref<2x4x1x8xf32, #tpu.memory_space<vmem>>, vector<1x1x1x8xf32>
    %391 = vector.shape_cast %390 : vector<1x1x1x8xf32> to vector<1x8xf32>
    %392 = vector.broadcast %391 : vector<1x8xf32> to vector<16x8xf32>
    %393 = arith.addf %389, %392 : vector<16x8xf32>
    %c1_321 = arith.constant 1 : index
    %c3_322 = arith.constant 3 : index
    %c0_323 = arith.constant 0 : index
    %c0_324 = arith.constant 0 : index
    %394 = vector.load %arg9[%c1_321, %c3_322, %c0_323, %c0_324] : memref<2x4x32x8xf32, #tpu.memory_space<vmem>>, vector<1x1x32x8xf32>
    %395 = vector.shape_cast %394 : vector<1x1x32x8xf32> to vector<32x8xf32>
    %cst_325 = arith.constant dense<0.000000e+00> : vector<16x8xf32>
    %396 = tpu.matmul %254, %395, %cst_325 {dimension_numbers = #tpu.dot_dimension_numbers<[1], [0], [0], [1], [0, 0, 1, 1], [], []>} : vector<16x32xf32>, vector<32x8xf32>, vector<16x8xf32> -> vector<16x8xf32>
    %c1_326 = arith.constant 1 : index
    %c3_327 = arith.constant 3 : index
    %c0_328 = arith.constant 0 : index
    %c0_329 = arith.constant 0 : index
    %397 = vector.load %arg10[%c1_326, %c3_327, %c0_328, %c0_329] : memref<2x4x1x8xf32, #tpu.memory_space<vmem>>, vector<1x1x1x8xf32>
    %398 = vector.shape_cast %397 : vector<1x1x1x8xf32> to vector<1x8xf32>
    %399 = vector.broadcast %398 : vector<1x8xf32> to vector<16x8xf32>
    %400 = arith.addf %396, %399 : vector<16x8xf32>
    %401 = vector.shape_cast %386 : vector<16x8xf32> to vector<2x8x8xf32>
    %402 = vector.shape_cast %393 : vector<16x8xf32> to vector<2x8x8xf32>
    %403 = vector.shape_cast %400 : vector<16x8xf32> to vector<2x8x8xf32>
    "tpu.trace_start"() <{level = 10 : i32, message = "bqe,bke->bqk"}> : () -> ()
    %cst_330 = arith.constant dense<0.000000e+00> : vector<2x8x8xf32>
    %404 = tpu.matmul %401, %402, %cst_330 {dimension_numbers = #tpu.dot_dimension_numbers<[2], [2], [1], [1], [0, 0, 0, 1, 1, 1], [0], [0]>} : vector<2x8x8xf32>, vector<2x8x8xf32>, vector<2x8x8xf32> -> vector<2x8x8xf32>
    "tpu.trace_stop"() : () -> ()
    %405 = vector.broadcast %10 : vector<2x1x8xf32> to vector<2x8x8xf32>
    %406 = arith.addf %404, %405 : vector<2x8x8xf32>
    %cst_331 = arith.constant dense<0xFF800000> : vector<2x8xf32>
    %407 = vector.multi_reduction <maximumf>, %406, %cst_331 [2] : vector<2x8x8xf32> to vector<2x8xf32>
    %408 = vector.shape_cast %407 : vector<2x8xf32> to vector<2x8x1xf32>
    %409 = vector.broadcast %408 : vector<2x8x1xf32> to vector<2x8x8xf32>
    %410 = arith.subf %406, %409 : vector<2x8x8xf32>
    %411 = math.exp %410 : vector<2x8x8xf32>
    %cst_332 = arith.constant dense<0.000000e+00> : vector<2x8xf32>
    %412 = vector.multi_reduction <add>, %411, %cst_332 [2] : vector<2x8x8xf32> to vector<2x8xf32>
    %413 = vector.shape_cast %412 : vector<2x8xf32> to vector<2x8x1xf32>
    %414 = vector.broadcast %413 : vector<2x8x1xf32> to vector<2x8x8xf32>
    %415 = arith.divf %411, %414 : vector<2x8x8xf32>
    "tpu.trace_start"() <{level = 10 : i32, message = "bqk,bke->bqe"}> : () -> ()
    %cst_333 = arith.constant dense<0.000000e+00> : vector<2x8x8xf32>
    %416 = tpu.matmul %415, %403, %cst_333 {dimension_numbers = #tpu.dot_dimension_numbers<[2], [1], [1], [2], [0, 0, 0, 1, 1, 2], [0], [0]>} : vector<2x8x8xf32>, vector<2x8x8xf32>, vector<2x8x8xf32> -> vector<2x8x8xf32>
    "tpu.trace_stop"() : () -> ()
    %417 = vector.shape_cast %416 : vector<2x8x8xf32> to vector<16x8xf32>
    %c1_334 = arith.constant 1 : index
    %c3_335 = arith.constant 3 : index
    %c0_336 = arith.constant 0 : index
    %c0_337 = arith.constant 0 : index
    %418 = vector.load %arg11[%c1_334, %c3_335, %c0_336, %c0_337] : memref<2x4x8x32xf32, #tpu.memory_space<vmem>>, vector<1x1x8x32xf32>
    %419 = vector.shape_cast %418 : vector<1x1x8x32xf32> to vector<8x32xf32>
    %cst_338 = arith.constant dense<0.000000e+00> : vector<16x32xf32>
    %420 = tpu.matmul %417, %419, %cst_338 {dimension_numbers = #tpu.dot_dimension_numbers<[1], [0], [0], [1], [0, 0, 1, 1], [], []>} : vector<16x8xf32>, vector<8x32xf32>, vector<16x32xf32> -> vector<16x32xf32>
    %421 = arith.addf %379, %420 : vector<16x32xf32>
    %c1_339 = arith.constant 1 : index
    %c0_340 = arith.constant 0 : index
    %c0_341 = arith.constant 0 : index
    %422 = vector.load %arg12[%c1_339, %c0_340, %c0_341] : memref<2x1x32xf32, #tpu.memory_space<vmem>>, vector<1x1x32xf32>
    %423 = vector.shape_cast %422 : vector<1x1x32xf32> to vector<1x32xf32>
    %424 = vector.broadcast %423 : vector<1x32xf32> to vector<16x32xf32>
    %425 = arith.addf %421, %424 : vector<16x32xf32>
    %426 = arith.addf %254, %425 : vector<16x32xf32>
    %c1_342 = arith.constant 1 : index
    %c0_343 = arith.constant 0 : index
    %c0_344 = arith.constant 0 : index
    %427 = vector.load %arg17[%c1_342, %c0_343, %c0_344] : memref<2x1x32xf32, #tpu.memory_space<vmem>>, vector<1x1x32xf32>
    %428 = vector.shape_cast %427 : vector<1x1x32xf32> to vector<1x32xf32>
    %429 = vector.broadcast %428 : vector<1x32xf32> to vector<16x32xf32>
    %430 = arith.mulf %426, %429 : vector<16x32xf32>
    %c1_345 = arith.constant 1 : index
    %c0_346 = arith.constant 0 : index
    %c0_347 = arith.constant 0 : index
    %431 = vector.load %arg18[%c1_345, %c0_346, %c0_347] : memref<2x1x32xf32, #tpu.memory_space<vmem>>, vector<1x1x32xf32>
    %432 = vector.shape_cast %431 : vector<1x1x32xf32> to vector<1x32xf32>
    %433 = vector.broadcast %432 : vector<1x32xf32> to vector<16x32xf32>
    %434 = arith.addf %430, %433 : vector<16x32xf32>
    %c1_348 = arith.constant 1 : index
    %c0_349 = arith.constant 0 : index
    %c0_350 = arith.constant 0 : index
    %435 = vector.load %arg13[%c1_348, %c0_349, %c0_350] : memref<2x32x64xf32, #tpu.memory_space<vmem>>, vector<1x32x64xf32>
    %436 = vector.shape_cast %435 : vector<1x32x64xf32> to vector<32x64xf32>
    %cst_351 = arith.constant dense<0.000000e+00> : vector<16x64xf32>
    %437 = tpu.matmul %434, %436, %cst_351 {dimension_numbers = #tpu.dot_dimension_numbers<[1], [0], [0], [1], [0, 0, 1, 1], [], []>} : vector<16x32xf32>, vector<32x64xf32>, vector<16x64xf32> -> vector<16x64xf32>
    %c1_352 = arith.constant 1 : index
    %c0_353 = arith.constant 0 : index
    %c0_354 = arith.constant 0 : index
    %438 = vector.load %arg14[%c1_352, %c0_353, %c0_354] : memref<2x1x64xf32, #tpu.memory_space<vmem>>, vector<1x1x64xf32>
    %439 = vector.shape_cast %438 : vector<1x1x64xf32> to vector<1x64xf32>
    %440 = vector.broadcast %439 : vector<1x64xf32> to vector<16x64xf32>
    %441 = arith.addf %437, %440 : vector<16x64xf32>
    %cst_355 = arith.constant 5.000000e-01 : f32
    %442 = vector.broadcast %cst_355 : f32 to vector<16x64xf32>
    %443 = arith.mulf %442, %441 : vector<16x64xf32>
    %cst_356 = arith.constant 0.707106769 : f32
    %444 = vector.broadcast %cst_356 : f32 to vector<16x64xf32>
    %445 = arith.mulf %441, %444 : vector<16x64xf32>
    %cst_357 = arith.constant 0.000000e+00 : f32
    %446 = vector.broadcast %cst_357 : f32 to vector<16x64xf32>
    %447 = arith.cmpf oge, %445, %446 : vector<16x64xf32>
    %cst_358 = arith.constant 1.000000e+00 : f32
    %cst_359 = arith.constant -1.000000e+00 : f32
    %448 = vector.broadcast %cst_358 : f32 to vector<16x64xf32>
    %449 = vector.broadcast %cst_359 : f32 to vector<16x64xf32>
    %450 = arith.select %447, %448, %449 : vector<16x64xi1>, vector<16x64xf32>
    %451 = math.absf %445 : vector<16x64xf32>
    %cst_360 = arith.constant 0.327591091 : f32
    %452 = vector.broadcast %cst_360 : f32 to vector<16x64xf32>
    %453 = arith.mulf %452, %451 : vector<16x64xf32>
    %cst_361 = arith.constant 1.000000e+00 : f32
    %454 = vector.broadcast %cst_361 : f32 to vector<16x64xf32>
    %455 = arith.addf %454, %453 : vector<16x64xf32>
    %cst_362 = arith.constant 1.000000e+00 : f32
    %456 = vector.broadcast %cst_362 : f32 to vector<16x64xf32>
    %457 = arith.divf %456, %455 : vector<16x64xf32>
    %cst_363 = arith.constant 1.06140542 : f32
    %458 = vector.broadcast %cst_363 : f32 to vector<16x64xf32>
    %459 = arith.mulf %458, %457 : vector<16x64xf32>
    %cst_364 = arith.constant -1.45315206 : f32
    %460 = vector.broadcast %cst_364 : f32 to vector<16x64xf32>
    %461 = arith.addf %459, %460 : vector<16x64xf32>
    %462 = arith.mulf %461, %457 : vector<16x64xf32>
    %cst_365 = arith.constant 1.42141378 : f32
    %463 = vector.broadcast %cst_365 : f32 to vector<16x64xf32>
    %464 = arith.addf %462, %463 : vector<16x64xf32>
    %465 = arith.mulf %464, %457 : vector<16x64xf32>
    %cst_366 = arith.constant -0.284496725 : f32
    %466 = vector.broadcast %cst_366 : f32 to vector<16x64xf32>
    %467 = arith.addf %465, %466 : vector<16x64xf32>
    %468 = arith.mulf %467, %457 : vector<16x64xf32>
    %cst_367 = arith.constant 0.254829586 : f32
    %469 = vector.broadcast %cst_367 : f32 to vector<16x64xf32>
    %470 = arith.addf %468, %469 : vector<16x64xf32>
    %471 = arith.mulf %470, %457 : vector<16x64xf32>
    %cst_368 = arith.constant 0.000000e+00 : f32
    %472 = vector.broadcast %cst_368 : f32 to vector<16x64xf32>
    %473 = arith.subf %472, %451 : vector<16x64xf32>
    %474 = arith.mulf %473, %451 : vector<16x64xf32>
    %475 = math.exp %474 : vector<16x64xf32>
    %476 = arith.mulf %471, %475 : vector<16x64xf32>
    %cst_369 = arith.constant 1.000000e+00 : f32
    %477 = vector.broadcast %cst_369 : f32 to vector<16x64xf32>
    %478 = arith.subf %477, %476 : vector<16x64xf32>
    %479 = arith.mulf %450, %478 : vector<16x64xf32>
    %cst_370 = arith.constant 1.000000e+00 : f32
    %480 = vector.broadcast %cst_370 : f32 to vector<16x64xf32>
    %481 = arith.addf %480, %479 : vector<16x64xf32>
    %482 = arith.mulf %443, %481 : vector<16x64xf32>
    %c1_371 = arith.constant 1 : index
    %c0_372 = arith.constant 0 : index
    %c0_373 = arith.constant 0 : index
    %483 = vector.load %arg15[%c1_371, %c0_372, %c0_373] : memref<2x64x32xf32, #tpu.memory_space<vmem>>, vector<1x64x32xf32>
    %484 = vector.shape_cast %483 : vector<1x64x32xf32> to vector<64x32xf32>
    %cst_374 = arith.constant dense<0.000000e+00> : vector<16x32xf32>
    %485 = tpu.matmul %482, %484, %cst_374 {dimension_numbers = #tpu.dot_dimension_numbers<[1], [0], [0], [1], [0, 0, 1, 1], [], []>} : vector<16x64xf32>, vector<64x32xf32>, vector<16x32xf32> -> vector<16x32xf32>
    %c1_375 = arith.constant 1 : index
    %c0_376 = arith.constant 0 : index
    %c0_377 = arith.constant 0 : index
    %486 = vector.load %arg16[%c1_375, %c0_376, %c0_377] : memref<2x1x32xf32, #tpu.memory_space<vmem>>, vector<1x1x32xf32>
    %487 = vector.shape_cast %486 : vector<1x1x32xf32> to vector<1x32xf32>
    %488 = vector.broadcast %487 : vector<1x32xf32> to vector<16x32xf32>
    %489 = arith.addf %485, %488 : vector<16x32xf32>
    %490 = arith.addf %434, %489 : vector<16x32xf32>
    %c1_378 = arith.constant 1 : index
    %c0_379 = arith.constant 0 : index
    %c0_380 = arith.constant 0 : index
    %491 = vector.load %arg19[%c1_378, %c0_379, %c0_380] : memref<2x1x32xf32, #tpu.memory_space<vmem>>, vector<1x1x32xf32>
    %492 = vector.shape_cast %491 : vector<1x1x32xf32> to vector<1x32xf32>
    %493 = vector.broadcast %492 : vector<1x32xf32> to vector<16x32xf32>
    %494 = arith.mulf %490, %493 : vector<16x32xf32>
    %c1_381 = arith.constant 1 : index
    %c0_382 = arith.constant 0 : index
    %c0_383 = arith.constant 0 : index
    %495 = vector.load %arg20[%c1_381, %c0_382, %c0_383] : memref<2x1x32xf32, #tpu.memory_space<vmem>>, vector<1x1x32xf32>
    %496 = vector.shape_cast %495 : vector<1x1x32xf32> to vector<1x32xf32>
    %497 = vector.broadcast %496 : vector<1x32xf32> to vector<16x32xf32>
    %498 = arith.addf %494, %497 : vector<16x32xf32>
    %cst_384 = arith.constant 5.000000e-01 : f32
    %499 = vector.broadcast %cst_384 : f32 to vector<16x32xf32>
    %500 = arith.mulf %499, %498 : vector<16x32xf32>
    %cst_385 = arith.constant 0.707106769 : f32
    %501 = vector.broadcast %cst_385 : f32 to vector<16x32xf32>
    %502 = arith.mulf %498, %501 : vector<16x32xf32>
    %cst_386 = arith.constant 0.000000e+00 : f32
    %503 = vector.broadcast %cst_386 : f32 to vector<16x32xf32>
    %504 = arith.cmpf oge, %502, %503 : vector<16x32xf32>
    %cst_387 = arith.constant 1.000000e+00 : f32
    %cst_388 = arith.constant -1.000000e+00 : f32
    %505 = vector.broadcast %cst_387 : f32 to vector<16x32xf32>
    %506 = vector.broadcast %cst_388 : f32 to vector<16x32xf32>
    %507 = arith.select %504, %505, %506 : vector<16x32xi1>, vector<16x32xf32>
    %508 = math.absf %502 : vector<16x32xf32>
    %cst_389 = arith.constant 0.327591091 : f32
    %509 = vector.broadcast %cst_389 : f32 to vector<16x32xf32>
    %510 = arith.mulf %509, %508 : vector<16x32xf32>
    %cst_390 = arith.constant 1.000000e+00 : f32
    %511 = vector.broadcast %cst_390 : f32 to vector<16x32xf32>
    %512 = arith.addf %511, %510 : vector<16x32xf32>
    %cst_391 = arith.constant 1.000000e+00 : f32
    %513 = vector.broadcast %cst_391 : f32 to vector<16x32xf32>
    %514 = arith.divf %513, %512 : vector<16x32xf32>
    %cst_392 = arith.constant 1.06140542 : f32
    %515 = vector.broadcast %cst_392 : f32 to vector<16x32xf32>
    %516 = arith.mulf %515, %514 : vector<16x32xf32>
    %cst_393 = arith.constant -1.45315206 : f32
    %517 = vector.broadcast %cst_393 : f32 to vector<16x32xf32>
    %518 = arith.addf %516, %517 : vector<16x32xf32>
    %519 = arith.mulf %518, %514 : vector<16x32xf32>
    %cst_394 = arith.constant 1.42141378 : f32
    %520 = vector.broadcast %cst_394 : f32 to vector<16x32xf32>
    %521 = arith.addf %519, %520 : vector<16x32xf32>
    %522 = arith.mulf %521, %514 : vector<16x32xf32>
    %cst_395 = arith.constant -0.284496725 : f32
    %523 = vector.broadcast %cst_395 : f32 to vector<16x32xf32>
    %524 = arith.addf %522, %523 : vector<16x32xf32>
    %525 = arith.mulf %524, %514 : vector<16x32xf32>
    %cst_396 = arith.constant 0.254829586 : f32
    %526 = vector.broadcast %cst_396 : f32 to vector<16x32xf32>
    %527 = arith.addf %525, %526 : vector<16x32xf32>
    %528 = arith.mulf %527, %514 : vector<16x32xf32>
    %cst_397 = arith.constant 0.000000e+00 : f32
    %529 = vector.broadcast %cst_397 : f32 to vector<16x32xf32>
    %530 = arith.subf %529, %508 : vector<16x32xf32>
    %531 = arith.mulf %530, %508 : vector<16x32xf32>
    %532 = math.exp %531 : vector<16x32xf32>
    %533 = arith.mulf %528, %532 : vector<16x32xf32>
    %cst_398 = arith.constant 1.000000e+00 : f32
    %534 = vector.broadcast %cst_398 : f32 to vector<16x32xf32>
    %535 = arith.subf %534, %533 : vector<16x32xf32>
    %536 = arith.mulf %507, %535 : vector<16x32xf32>
    %cst_399 = arith.constant 1.000000e+00 : f32
    %537 = vector.broadcast %cst_399 : f32 to vector<16x32xf32>
    %538 = arith.addf %537, %536 : vector<16x32xf32>
    %539 = arith.mulf %500, %538 : vector<16x32xf32>
    %540 = vector.shape_cast %539 : vector<16x32xf32> to vector<2x8x32xf32>
    %c0_400 = arith.constant 0 : index
    %c0_401 = arith.constant 0 : index
    %c0_402 = arith.constant 0 : index
    %541 = vector.load %arg21[%c0_400, %c0_401, %c0_402] : memref<2x8x32xf32, #tpu.memory_space<vmem>>, vector<2x8x32xf32>
    tpu.vector_store %arg21[%c0_400, %c0_401, %c0_402], %540 {strides = array<i32>} : memref<2x8x32xf32, #tpu.memory_space<vmem>>, vector<2x8x32xf32>,
    return
  }
  func.func @transform_0(%arg0: i32) -> (i32, i32, i32) {
    %c0_i32 = arith.constant 0 : i32
    %c0_i32_0 = arith.constant 0 : i32
    %c0_i32_1 = arith.constant 0 : i32
    return %arg0, %c0_i32, %c0_i32_0 : i32, i32, i32
  }
  func.func @transform_1(%arg0: i32) -> (i32, i32, i32) {
    %c0_i32 = arith.constant 0 : i32
    %c0_i32_0 = arith.constant 0 : i32
    %c0_i32_1 = arith.constant 0 : i32
    return %arg0, %c0_i32, %c0_i32_0 : i32, i32, i32
  }
  func.func @transform_2(%arg0: i32) -> (i32, i32) {
    %c0_i32 = arith.constant 0 : i32
    %c0_i32_0 = arith.constant 0 : i32
    %c0_i32_1 = arith.constant 0 : i32
    return %c0_i32, %c0_i32_0 : i32, i32
  }
  func.func @transform_3(%arg0: i32) -> (i32, i32) {
    %c0_i32 = arith.constant 0 : i32
    %c0_i32_0 = arith.constant 0 : i32
    %c0_i32_1 = arith.constant 0 : i32
    return %c0_i32, %c0_i32_0 : i32, i32
  }
  func.func @transform_4(%arg0: i32) -> (i32, i32, i32, i32) {
    %c0_i32 = arith.constant 0 : i32
    %c0_i32_0 = arith.constant 0 : i32
    %c0_i32_1 = arith.constant 0 : i32
    %c0_i32_2 = arith.constant 0 : i32
    %c0_i32_3 = arith.constant 0 : i32
    return %c0_i32, %c0_i32_0, %c0_i32_1, %c0_i32_2 : i32, i32, i32, i32
  }
  func.func @transform_5(%arg0: i32) -> (i32, i32, i32, i32) {
    %c0_i32 = arith.constant 0 : i32
    %c0_i32_0 = arith.constant 0 : i32
    %c0_i32_1 = arith.constant 0 : i32
    %c0_i32_2 = arith.constant 0 : i32
    %c0_i32_3 = arith.constant 0 : i32
    return %c0_i32, %c0_i32_0, %c0_i32_1, %c0_i32_2 : i32, i32, i32, i32
  }
  func.func @transform_6(%arg0: i32) -> (i32, i32, i32, i32) {
    %c0_i32 = arith.constant 0 : i32
    %c0_i32_0 = arith.constant 0 : i32
    %c0_i32_1 = arith.constant 0 : i32
    %c0_i32_2 = arith.constant 0 : i32
    %c0_i32_3 = arith.constant 0 : i32
    return %c0_i32, %c0_i32_0, %c0_i32_1, %c0_i32_2 : i32, i32, i32, i32
  }
  func.func @transform_7(%arg0: i32) -> (i32, i32, i32, i32) {
    %c0_i32 = arith.constant 0 : i32
    %c0_i32_0 = arith.constant 0 : i32
    %c0_i32_1 = arith.constant 0 : i32
    %c0_i32_2 = arith.constant 0 : i32
    %c0_i32_3 = arith.constant 0 : i32
    return %c0_i32, %c0_i32_0, %c0_i32_1, %c0_i32_2 : i32, i32, i32, i32
  }
  func.func @transform_8(%arg0: i32) -> (i32, i32, i32, i32) {
    %c0_i32 = arith.constant 0 : i32
    %c0_i32_0 = arith.constant 0 : i32
    %c0_i32_1 = arith.constant 0 : i32
    %c0_i32_2 = arith.constant 0 : i32
    %c0_i32_3 = arith.constant 0 : i32
    return %c0_i32, %c0_i32_0, %c0_i32_1, %c0_i32_2 : i32, i32, i32, i32
  }
  func.func @transform_9(%arg0: i32) -> (i32, i32, i32, i32) {
    %c0_i32 = arith.constant 0 : i32
    %c0_i32_0 = arith.constant 0 : i32
    %c0_i32_1 = arith.constant 0 : i32
    %c0_i32_2 = arith.constant 0 : i32
    %c0_i32_3 = arith.constant 0 : i32
    return %c0_i32, %c0_i32_0, %c0_i32_1, %c0_i32_2 : i32, i32, i32, i32
  }
  func.func @transform_10(%arg0: i32) -> (i32, i32, i32, i32) {
    %c0_i32 = arith.constant 0 : i32
    %c0_i32_0 = arith.constant 0 : i32
    %c0_i32_1 = arith.constant 0 : i32
    %c0_i32_2 = arith.constant 0 : i32
    %c0_i32_3 = arith.constant 0 : i32
    return %c0_i32, %c0_i32_0, %c0_i32_1, %c0_i32_2 : i32, i32, i32, i32
  }
  func.func @transform_11(%arg0: i32) -> (i32, i32, i32) {
    %c0_i32 = arith.constant 0 : i32
    %c0_i32_0 = arith.constant 0 : i32
    %c0_i32_1 = arith.constant 0 : i32
    %c0_i32_2 = arith.constant 0 : i32
    return %c0_i32, %c0_i32_0, %c0_i32_1 : i32, i32, i32
  }
  func.func @transform_12(%arg0: i32) -> (i32, i32, i32) {
    %c0_i32 = arith.constant 0 : i32
    %c0_i32_0 = arith.constant 0 : i32
    %c0_i32_1 = arith.constant 0 : i32
    %c0_i32_2 = arith.constant 0 : i32
    return %c0_i32, %c0_i32_0, %c0_i32_1 : i32, i32, i32
  }
  func.func @transform_13(%arg0: i32) -> (i32, i32, i32) {
    %c0_i32 = arith.constant 0 : i32
    %c0_i32_0 = arith.constant 0 : i32
    %c0_i32_1 = arith.constant 0 : i32
    %c0_i32_2 = arith.constant 0 : i32
    return %c0_i32, %c0_i32_0, %c0_i32_1 : i32, i32, i32
  }
  func.func @transform_14(%arg0: i32) -> (i32, i32, i32) {
    %c0_i32 = arith.constant 0 : i32
    %c0_i32_0 = arith.constant 0 : i32
    %c0_i32_1 = arith.constant 0 : i32
    %c0_i32_2 = arith.constant 0 : i32
    return %c0_i32, %c0_i32_0, %c0_i32_1 : i32, i32, i32
  }
  func.func @transform_15(%arg0: i32) -> (i32, i32, i32) {
    %c0_i32 = arith.constant 0 : i32
    %c0_i32_0 = arith.constant 0 : i32
    %c0_i32_1 = arith.constant 0 : i32
    %c0_i32_2 = arith.constant 0 : i32
    return %c0_i32, %c0_i32_0, %c0_i32_1 : i32, i32, i32
  }
  func.func @transform_16(%arg0: i32) -> (i32, i32, i32) {
    %c0_i32 = arith.constant 0 : i32
    %c0_i32_0 = arith.constant 0 : i32
    %c0_i32_1 = arith.constant 0 : i32
    %c0_i32_2 = arith.constant 0 : i32
    return %c0_i32, %c0_i32_0, %c0_i32_1 : i32, i32, i32
  }
  func.func @transform_17(%arg0: i32) -> (i32, i32, i32) {
    %c0_i32 = arith.constant 0 : i32
    %c0_i32_0 = arith.constant 0 : i32
    %c0_i32_1 = arith.constant 0 : i32
    %c0_i32_2 = arith.constant 0 : i32
    return %c0_i32, %c0_i32_0, %c0_i32_1 : i32, i32, i32
  }
  func.func @transform_18(%arg0: i32) -> (i32, i32, i32) {
    %c0_i32 = arith.constant 0 : i32
    %c0_i32_0 = arith.constant 0 : i32
    %c0_i32_1 = arith.constant 0 : i32
    %c0_i32_2 = arith.constant 0 : i32
    return %c0_i32, %c0_i32_0, %c0_i32_1 : i32, i32, i32
  }
  func.func @transform_19(%arg0: i32) -> (i32, i32, i32) {
    %c0_i32 = arith.constant 0 : i32
    %c0_i32_0 = arith.constant 0 : i32
    %c0_i32_1 = arith.constant 0 : i32
    %c0_i32_2 = arith.constant 0 : i32
    return %c0_i32, %c0_i32_0, %c0_i32_1 : i32, i32, i32
  }
  func.func @transform_20(%arg0: i32) -> (i32, i32, i32) {
    %c0_i32 = arith.constant 0 : i32
    %c0_i32_0 = arith.constant 0 : i32
    %c0_i32_1 = arith.constant 0 : i32
    return %arg0, %c0_i32, %c0_i32_0 : i32, i32, i32
  }
}

</mosaic_0001>

<bundles_post_ra>
// kernel: tst_encoder_forward.1
= control target key start
LH: loop header
LB: loop body
LE: loop exit
PB: predicated region body
PF: predicated region fallthrough
CT: control target
= control target key end

     0   :  { %vm75_vm0 = vcmask 1043456   ;;  %vm68_vm1 = vcmask 31744   ;;  %vm170_vm2 = vcmask 261120   ;;  %v7357_v20 = vmov 0.0   ;;  %s8397_s2 = inlined_call_operand.vmem [shape: f32[4,32], index: 2, kind: input, shape index: {}]   ;;  %s8398_s0 = inlined_call_operand.vmem [shape: f32[2,8,4], index: 0, kind: input, shape index: {}]   ;;  %s8399_s4 = inlined_call_operand.vmem [shape: f32[2,4,32,8], index: 4, kind: input, shape index: {}]   ;;  %s8400_s6 = inlined_call_operand.vmem [shape: f32[2,4,32,8], index: 6, kind: input, shape index: {}]   ;;  %s8401_s8 = inlined_call_operand.vmem [shape: f32[2,4,32,8], index: 8, kind: input, shape index: {}]   ;;  %s8402_s3 = inlined_call_operand.vmem [shape: f32[8,32], index: 3, kind: input, shape index: {}]   ;;  %s8403_s7 = inlined_call_operand.vmem [shape: f32[2,4,1,8], index: 7, kind: input, shape index: {}]   ;;  %s8404_s5 = inlined_call_operand.vmem [shape: f32[2,4,1,8], index: 5, kind: input, shape index: {}]   ;;  %s8405_s9 = inlined_call_operand.vmem [shape: f32[2,4,1,8], index: 9, kind: input, shape index: {}]   ;;  %s8406_s1 = inlined_call_operand.vmem [shape: f32[2,1,8], index: 1, kind: input, shape index: {}]   ;;  %s8407_s10 = inlined_call_operand.vmem [shape: f32[2,4,8,32], index: 10, kind: input, shape index: {}]   ;;  %s8408_s12 = inlined_call_operand.vmem [shape: f32[2,32,64], index: 12, kind: input, shape index: {}]   ;;  %s8409_s11 = inlined_call_operand.vmem [shape: f32[2,1,32], index: 11, kind: input, shape index: {}]   ;;  %s8410_s16 = inlined_call_operand.vmem [shape: f32[2,1,32], index: 16, kind: input, shape index: {}]   ;;  %s8411_s17 = inlined_call_operand.vmem [shape: f32[2,1,32], index: 17, kind: input, shape index: {}]   ;;  %s8412_s14 = inlined_call_operand.vmem [shape: f32[2,64,32], index: 14, kind: input, shape index: {}]   ;;  %s8413_s13 = inlined_call_operand.vmem [shape: f32[2,1,64], index: 13, kind: input, shape index: {}]   ;;  %s8414_s15 = inlined_call_operand.vmem [shape: f32[2,1,32], index: 15, kind: input, shape index: {}]   ;;  %s8415_s18 = inlined_call_operand.vmem [shape: f32[2,1,32], index: 18, kind: input, shape index: {}]   ;;  %s8416_s19 = inlined_call_operand.vmem [shape: f32[2,1,32], index: 19, kind: input, shape index: {}]   ;;  %s8417_s20 = inlined_call_operand.vmem [shape: f32[2,8,32], index: 20, kind: output, shape index: {}]  }
   0x1   :  { %8422 = sst [smem:[#allocation2_spill]] %s8397_s2  ;;  %v154_v13 = vld [vmem:[%s8402_s3] sm:$0xff]  ;;  %vm7358_vm3 = vmmov 0   ;;  %vm436_vm4 = vcmask 64512   ;;  %vm3034_vm7 = vcmask 523264  }
   0x2   :  { %8423 = sst [smem:[#allocation3_spill]] %s8398_s0  ;;  %v6180_v21 = vld [vmem:[%s8403_s7] ss:$0 sm:$0xff]  ;;  %v7557_v36 = vld [vmem:[%s8406_s1 + $0x1] ss:$0 sm:$0xff] }
   0x3   :  { %8424 = sst [smem:[#allocation4_spill]] %s8399_s4  ;;  %v6177_v24 = vld [vmem:[%s8404_s5] ss:$0 sm:$0xff] }
   0x4   :  { %8425 = sst [smem:[#allocation5_spill]] %s8400_s6  ;;  %v6183_v31 = vld [vmem:[%s8405_s9] ss:$0 sm:$0xff] }
   0x5   :  { %8426 = sst [smem:[#allocation6_spill]] %s8401_s8  ;;  %v7562_v38 = vld [vmem:[%s8406_s1] ss:$0 sm:$0xff] }
   0x6   :  { %s8427_s23 = sld [smem:[#allocation2_spill]] }
   0x7   :  { %s8428_s25 = sld [smem:[#allocation3_spill]] }
   0x8   :  { %s8429_s8 = sld [smem:[#allocation4_spill]] }
   0x9   :  { %s8430_s2 = sld [smem:[#allocation5_spill]] }
   0xa   :  { %s8431_s0 = sld [smem:[#allocation6_spill]] }
   0xc   :  { %v67_v0 = vld [vmem:[%s8427_s23] sm:$0xf] }
   0xd   :  { %v65_v1 = vld [vmem:[%s8428_s25] sm:$0xff]  ;;  %v66_v2 = vld [vmem:[%s8428_s25 + $0x8] sm:$0xff]  ;;  %6735 = vmatprep.subr.msk.mxu0 %vm75_vm0, %v67_v0 }
   0xe   :  { %6737 = vmatprep.mubr.msk.f32.mxu0 %vm68_vm1, %v65_v1  ;;  %v162_v3 = vld [vmem:[%s8429_s8 + $0x18] sm:$0xff]  ;;  %v161_v5 = vld [vmem:[%s8429_s8 + $0x10] sm:$0xff]  ;;  %6736 = vmatpush3.msk.msra.mxu0 %vm75_vm0, %v67_v0  ;;  %v160_v7 = vld [vmem:[%s8429_s8 + $0x8] sm:$0xff] }
   0xf   :  { %v255_v4 = vld [vmem:[%s8430_s2 + $0x18] sm:$0xff]  ;;  %6740 = vmatprep.subr.mxu1 %v162_v3  ;;  %6738 = vmatmul.mubr.msk.f32.vlgmr.msra.gmra.mxu0 %vm68_vm1, %v66_v2  ;;  %v254_v6 = vld [vmem:[%s8430_s2 + $0x10] sm:$0xff]  ;;  %v253_v8 = vld [vmem:[%s8430_s2 + $0x8] sm:$0xff] }
  0x10   :  { %6741 = vmatpush3.msra.mxu1 %v162_v3  ;;  %6751 = vmatprep.subr.mxu0 %v255_v4  ;;  %v159_v9 = vld [vmem:[%s8429_s8] sm:$0xff]  ;;  %v341_v11 = vld [vmem:[%s8431_s0 + $0x18] sm:$0xff]  ;;  %v340_v17 = vld [vmem:[%s8431_s0 + $0x10] sm:$0xff] }
  0x11   :  { %6742 = vmatprep.subr.mxu1 %v161_v5  ;;  %6752 = vmatpush3.msra.mxu0 %v255_v4  ;;  %v252_v10 = vld [vmem:[%s8430_s2] sm:$0xff]  ;;  %v339_v18 = vld [vmem:[%s8431_s0 + $0x8] sm:$0xff]  ;;  %v6205_v56 = vld [vmem:[%s8430_s2 + $0x38] sm:$0xff] }
  0x12   :  { %6743 = vmatpush3.msra.mxu1 %v161_v5  ;;  %6753 = vmatprep.subr.mxu0 %v254_v6  ;;  %v338_v19 = vld [vmem:[%s8431_s0] sm:$0xff]  ;;  %v6197_v57 = vld [vmem:[%s8429_s8 + $0x38] sm:$0xff]  ;;  %v6204_v62 = vld [vmem:[%s8430_s2 + $0x30] sm:$0xff] }
  0x13   :  { %6744 = vmatprep.subr.mxu1 %v160_v7  ;;  %6754 = vmatpush3.msra.mxu0 %v254_v6  ;;  %v6203_v0 = vld [vmem:[%s8430_s2 + $0x28] sm:$0xff]  ;;  %v6196_v2 = vld [vmem:[%s8429_s8 + $0x30] sm:$0xff]  ;;  %v6202_v3 = vld [vmem:[%s8430_s2 + $0x20] sm:$0xff] }
  0x14   :  { %6745 = vmatpush3.msra.mxu1 %v160_v7  ;;  %6755 = vmatprep.subr.mxu0 %v253_v8  ;;  %v6195_v4 = vld [vmem:[%s8429_s8 + $0x28] sm:$0xff]  ;;  %v6194_v5 = vld [vmem:[%s8429_s8 + $0x20] sm:$0xff]  ;;  %v6213_v6 = vld [vmem:[%s8431_s0 + $0x38] sm:$0xff] }
  0x15   :  { %6746 = vmatprep.subr.mxu1 %v159_v9  ;;  %6756 = vmatpush3.msra.mxu0 %v253_v8  ;;  %v6212_v7 = vld [vmem:[%s8431_s0 + $0x30] sm:$0xff]  ;;  %v6211_v8 = vld [vmem:[%s8431_s0 + $0x28] sm:$0xff] }
  0x16   :  { %6747 = vmatpush3.msra.mxu1 %v159_v9  ;;  %6757 = vmatprep.subr.mxu0 %v252_v10  ;;  %v6210_v9 = vld [vmem:[%s8431_s0 + $0x20] sm:$0xff] }
  0x17   :  { %6758 = vmatpush3.msra.mxu0 %v252_v10  ;;  %6762 = vmatprep.subr.mxu1 %v341_v11 }
  0x18   :  { %6778 = vmatprep.subr.mxu0 %v7357_v20 }
  0xcf   :  { %v6739_v12 = vpop.f32.mrf.mxu0 }
  0xd0   :  { %v7506_v16 = vadd.f32 %v6739_v12, %v154_v13 }
  0xd1   :  { %v145_v14 = vpop.f32.mrf.mxu0 }
  0xd2   :  { %v7504_v15 = vadd.f32 %v154_v13, %v145_v14 }
  0xd4   :  { %6748 = vmatprep.mubr.msk.f32.mxu1 %vm170_vm2, %v7504_v15  ;;  %6759 = vmatprep.mubr.msk.f32.mxu0 %vm170_vm2, %v7504_v15 }
  0xd5   :  { %6749 = vmatmul.mubr.msk.f32.vlgmr.msra.gmra.mxu1 %vm170_vm2, %v7506_v16  ;;  %6760 = vmatmul.mubr.msk.f32.vlgmr.msra.gmra.mxu0 %vm170_vm2, %v7506_v16 }
  0xd6   :  { %6763 = vmatpush3.msra.mxu1 %v341_v11  ;;  %6770 = vmatprep.mubr.msk.f32.mxu1 %vm170_vm2, %v7504_v15 }
  0xd7   :  { %6764 = vmatprep.subr.mxu1 %v340_v17  ;;  %6780 = vmatprep.mubr.msk.f32.mxu0 %vm7358_vm3, %v7357_v20 }
  0xd8   :  { %6765 = vmatpush3.msra.mxu1 %v340_v17  ;;  %v6207_v17 = vld [vmem:[%s8403_s7 + $0x1] ss:$0 sm:$0xff] }
  0xd9   :  { %6766 = vmatprep.subr.mxu1 %v339_v18 }
  0xda   :  { %6767 = vmatpush3.msra.mxu1 %v339_v18 }
  0xdb   :  { %6768 = vmatprep.subr.mxu1 %v338_v19 }
  0xdc   :  { %6769 = vmatpush3.msra.mxu1 %v338_v19 }
  0xdd   :  { %6771 = vmatmul.mubr.msk.f32.vlgmr.msra.gmra.mxu1 %vm170_vm2, %v7506_v16  ;;  %6773 = vmatprep.subr.mxu1 %v7357_v20 }
  0xde   :  { %6775 = vmatprep.mubr.msk.f32.mxu1 %vm7358_vm3, %v7357_v20 }
 0x195   :  { %v6750_v22 = vpop.f32.mrf.mxu1  ;;  %v6761_v23 = vpop.f32.mrf.mxu0 }
 0x196   :  { %v335_v25 = vadd.f32 %v6761_v23, %v6180_v21  ;;  %v249_v29 = vadd.f32 %v6750_v22, %v6177_v24  ;;  %v6199_v22 = vld [vmem:[%s8404_s5 + $0x1] ss:$0 sm:$0xff] }
 0x197   :  { %v329_v26 = vpop.f32.mrf.mxu0  ;;  %v243_v27 = vpop.f32.mrf.mxu1 }
 0x198   :  { %v330_v28 = vadd.f32 %v6180_v21, %v329_v26  ;;  %6779 = vmatpush3.xpose.msk.msra.mxu0 %vm436_vm4, %v335_v25  ;;  %v244_v30 = vadd.f32 %v6177_v24, %v243_v27  ;;  %v6215_v26 = vld [vmem:[%s8405_s9 + $0x1] ss:$0 sm:$0xff] }
 0x199   :  { %6788 = vmatprep.subr.mxu0 %v7357_v20 }
 0x19a   :  { %6774 = vmatpush3.xpose.msk.msra.mxu1 %vm436_vm4, %v330_v28 }
 0x19b   :  { %6781 = vmatmul.mubr.msk.f32.vlgmr.msra.gmra.mxu0 %vm436_vm4, %v249_v29  ;;  %6783 = vmatprep.subr.mxu1 %v7357_v20 }
 0x19c   :  { %6790 = vmatprep.mubr.msk.f32.mxu0 %vm7358_vm3, %v7357_v20 }
 0x19d   :  { %v6772_v32 = vpop.f32.mrf.mxu1  ;;  %6776 = vmatmul.mubr.msk.f32.vlgmr.msra.gmra.mxu1 %vm436_vm4, %v244_v30 }
 0x19e   :  { %v421_v33 = vadd.f32 %v6772_v32, %v6183_v31  ;;  %6785 = vmatprep.mubr.msk.f32.mxu1 %vm7358_vm3, %v7357_v20 }
 0x19f   :  { %v415_v34 = vpop.f32.mrf.mxu1 }
 0x1a0   :  { %v416_v35 = vadd.f32 %v6183_v31, %v415_v34  ;;  %6789 = vmatpush3.msra.mxu0 %v421_v33 }
 0x1a1   :  { %6804 = vmatprep.subr.mxu0 %v6205_v56 }
 0x1a2   :  { %6784 = vmatpush3.msra.mxu1 %v416_v35 }
 0x1a3   :  { %6793 = vmatprep.subr.mxu1 %v6197_v57 }
 0x25b   :  { %v585_v37 = vpop.f32.mrf.mxu0 }
 0x25c   :  { %v586_v39 = vadd.f32 %v7557_v36, %v585_v37 }
 0x25d   :  { %v509_v40 = vpop.f32.mrf.mxu1  ;;  %v6782_v41 = vpop.f32.mrf.mxu0 }
 0x25e   :  { %v510_v42 = vadd.f32 %v7562_v38, %v509_v40  ;;  %v592_v43 = vsel %vm436_vm4, %v586_v39, -inf }
 0x25f   :  { %593 = vmax.xlane.f32.xlu0 %v592_v43  ;;  %v6777_v44 = vpop.f32.mrf.mxu1 }
 0x260   :  { %v589_v45 = vsel %vm436_vm4, %v510_v42, -inf }
 0x263   :  { %590 = vmax.xlane.f32.xlu0 %v589_v45 }
 0x2e8   :  { %v594_v46 = vpop.xlane.xlu0 %593 }
 0x2e9   :  { %v596_v47 = vsub.f32 %v586_v39, %v594_v46 }
 0x2eb   :  { %v599_v48 = vmul.f32 1.442695, %v596_v47 }
 0x2ec   :  { %v591_v49 = vpop.xlane.xlu0 %590 }
 0x2ed   :  { %7267 = vpow2.f32 %v599_v48  ;;  %v595_v50 = vsub.f32 %v510_v42, %v591_v49 }
 0x2ef   :  { %v597_v51 = vmul.f32 1.442695, %v595_v50 }
 0x2f1   :  { %7269 = vpow2.f32 %v597_v51 }
 0x2fa   :  { %v7268_v52 = vpop.eup %7267 }
 0x2fb   :  { %v604_v53 = vsel %vm436_vm4, %v7268_v52, 0.0 }
 0x2fc   :  { %605 = vadd.xlane.f32.xlu1 %v604_v53 }
 0x2fe   :  { %v7270_v54 = vpop.eup %7269 }
 0x2ff   :  { %v601_v55 = vsel %vm436_vm4, %v7270_v54, 0.0 }
 0x300   :  { %602 = vadd.xlane.f32.xlu1 %v601_v55 }
 0x385   :  { %v606_v58 = vpop.xlane.xlu1 %605 }
 0x386   :  { %7271 = vrcp.f32 %v606_v58 }
 0x389   :  { %v603_v59 = vpop.xlane.xlu1 %602 }
 0x38a   :  { %7273 = vrcp.f32 %v603_v59  ;;  %v6240_v59 = vld [vmem:[%s8430_s2 + $0x58] sm:$0xff] }
 0x393   :  { %v7272_v60 = vpop.eup %7271 }
 0x394   :  { %v610_v61 = vmul.f32 %v7272_v60, %v7268_v52  ;;  %v757_v52 = vld [vmem:[%s8407_s10] sm:$0xff]  ;;  %v6239_v60 = vld [vmem:[%s8430_s2 + $0x50] sm:$0xff] }
 0x396   :  { %6791 = vmatmul.mubr.msk.f32.vlgmr.msra.gmra.mxu0 %vm436_vm4, %v610_v61  ;;  %v6238_v61 = vld [vmem:[%s8430_s2 + $0x48] sm:$0xff] }
 0x397   :  { %v7274_v63 = vpop.eup %7273  ;;  %6805 = vmatpush3.msra.mxu0 %v6205_v56  ;;  %6812 = vmatprep.mubr.msk.f32.mxu0 %vm170_vm2, %v7504_v15 }
 0x398   :  { %6806 = vmatprep.subr.mxu0 %v6204_v62  ;;  %v608_v1 = vmul.f32 %v7274_v63, %v7270_v54  ;;  %v6224_v63 = vld [vmem:[%s8407_s10 + $0x8] sm:$0xff] }
 0x399   :  { %6807 = vmatpush3.msra.mxu0 %v6204_v62  ;;  %v6237_v62 = vld [vmem:[%s8430_s2 + $0x40] sm:$0xff] }
 0x39a   :  { %6808 = vmatprep.subr.mxu0 %v6203_v0  ;;  %6786 = vmatmul.mubr.msk.f32.vlgmr.msra.gmra.mxu1 %vm436_vm4, %v608_v1 }
 0x39b   :  { %6794 = vmatpush3.msra.mxu1 %v6197_v57  ;;  %6809 = vmatpush3.msra.mxu0 %v6203_v0  ;;  %v6232_v0 = vld [vmem:[%s8429_s8 + $0x58] sm:$0xff] }
 0x39c   :  { %6795 = vmatprep.subr.mxu1 %v6196_v2  ;;  %6801 = vmatprep.mubr.msk.f32.mxu1 %vm170_vm2, %v7504_v15 }
 0x39d   :  { %6810 = vmatprep.subr.mxu0 %v6202_v3  ;;  %6796 = vmatpush3.msra.mxu1 %v6196_v2 }
 0x39e   :  { %6811 = vmatpush3.msra.mxu0 %v6202_v3  ;;  %6797 = vmatprep.subr.mxu1 %v6195_v4 }
 0x39f   :  { %6813 = vmatmul.mubr.msk.f32.vlgmr.msra.gmra.mxu0 %vm170_vm2, %v7506_v16  ;;  %6798 = vmatpush3.msra.mxu1 %v6195_v4  ;;  %v6231_v4 = vld [vmem:[%s8429_s8 + $0x50] sm:$0xff] }
 0x3a0   :  { %6799 = vmatprep.subr.mxu1 %v6194_v5  ;;  %6826 = vmatprep.subr.mxu0 %v7357_v20 }
 0x3a1   :  { %6800 = vmatpush3.msra.mxu1 %v6194_v5  ;;  %6828 = vmatprep.mubr.msk.f32.mxu0 %vm7358_vm3, %v7357_v20 }
 0x3a2   :  { %6802 = vmatmul.mubr.msk.f32.vlgmr.msra.gmra.mxu1 %vm170_vm2, %v7506_v16  ;;  %6815 = vmatprep.subr.mxu1 %v6213_v6 }
 0x3a3   :  { %6816 = vmatpush3.msra.mxu1 %v6213_v6  ;;  %6823 = vmatprep.mubr.msk.f32.mxu1 %vm170_vm2, %v7504_v15  ;;  %v6230_v6 = vld [vmem:[%s8429_s8 + $0x48] sm:$0xff] }
 0x3a4   :  { %6817 = vmatprep.subr.mxu1 %v6212_v7 }
 0x3a5   :  { %6818 = vmatpush3.msra.mxu1 %v6212_v7  ;;  %v6229_v7 = vld [vmem:[%s8429_s8 + $0x40] sm:$0xff] }
 0x3a6   :  { %6819 = vmatprep.subr.mxu1 %v6211_v8 }
 0x3a7   :  { %6820 = vmatpush3.msra.mxu1 %v6211_v8 }
 0x3a8   :  { %6821 = vmatprep.subr.mxu1 %v6210_v9 }
 0x3a9   :  { %6822 = vmatpush3.msra.mxu1 %v6210_v9  ;;  %v6248_v9 = vld [vmem:[%s8431_s0 + $0x58] sm:$0xff] }
 0x3aa   :  { %6824 = vmatmul.mubr.msk.f32.vlgmr.msra.gmra.mxu1 %vm170_vm2, %v7506_v16  ;;  %6836 = vmatprep.subr.mxu1 %v7357_v20 }
 0x3ab   :  { %6838 = vmatprep.mubr.msk.f32.mxu1 %vm7358_vm3, %v7357_v20 }
 0x456   :  { %v7626_v10 = vpop.f32.mrf.mxu0 }
 0x458   :  { %v6792_v11 = vpop.f32.mrf.mxu0 }
 0x45a   :  { %v7628_v12 = vpop.f32.mrf.mxu1 }
 0x45c   :  { %v6787_v13 = vpop.f32.mrf.mxu1 }
 0x45d   :  { %v6246_v13 = vld [vmem:[%s8431_s0 + $0x48] sm:$0xff] }
 0x45f   :  { %v6814_v14 = vpop.f32.mrf.mxu0 }
 0x460   :  { %v931_v25 = vadd.f32 %v6814_v14, %v6207_v17 }
 0x461   :  { %v925_v18 = vpop.f32.mrf.mxu0 }
 0x462   :  { %v926_v19 = vadd.f32 %v6207_v17, %v925_v18  ;;  %v6803_v21 = vpop.f32.mrf.mxu1  ;;  %v6245_v17 = vld [vmem:[%s8431_s0 + $0x40] sm:$0xff] }
 0x463   :  { %v843_v27 = vadd.f32 %v6803_v21, %v6199_v22 }
 0x464   :  { %6827 = vmatpush3.xpose.msk.msra.mxu0 %vm436_vm4, %v926_v19  ;;  %v837_v23 = vpop.f32.mrf.mxu1 }
 0x465   :  { %v838_v24 = vadd.f32 %v6199_v22, %v837_v23  ;;  %6831 = vmatprep.subr.mxu0 %v7357_v20 }
 0x467   :  { %6829 = vmatmul.mubr.msk.f32.vlgmr.msra.gmra.mxu0 %vm436_vm4, %v838_v24 }
 0x468   :  { %6832 = vmatpush3.xpose.msk.msra.mxu0 %vm436_vm4, %v931_v25  ;;  %6833 = vmatprep.mubr.msk.f32.mxu0 %vm7358_vm3, %v7357_v20  ;;  %v6234_v25 = vld [vmem:[%s8404_s5 + $0x2] ss:$0 sm:$0xff] }
 0x469   :  { %6841 = vmatprep.subr.mxu0 %v7357_v20 }
 0x46a   :  { %v6825_v28 = vpop.f32.mrf.mxu1 }
 0x46b   :  { %v1019_v29 = vadd.f32 %v6825_v28, %v6215_v26  ;;  %6834 = vmatmul.mubr.msk.f32.vlgmr.msra.gmra.mxu0 %vm436_vm4, %v843_v27  ;;  %v6250_v28 = vld [vmem:[%s8405_s9 + $0x2] ss:$0 sm:$0xff] }
 0x46c   :  { %v1013_v30 = vpop.f32.mrf.mxu1  ;;  %6843 = vmatprep.mubr.msk.f32.mxu0 %vm7358_vm3, %v7357_v20 }
 0x46d   :  { %v1014_v31 = vadd.f32 %v6215_v26, %v1013_v30  ;;  %6842 = vmatpush3.msra.mxu0 %v1019_v29 }
 0x46e   :  { %6851 = vmatprep.subr.mxu0 %v757_v52 }
 0x46f   :  { %6837 = vmatpush3.msra.mxu1 %v1014_v31 }
 0x470   :  { %6846 = vmatprep.subr.mxu1 %v6224_v63 }
 0x527   :  { %v1094_v32 = vpop.f32.mrf.mxu0 }
 0x528   :  { %v1095_v33 = vadd.f32 %v7562_v38, %v1094_v32 }
 0x529   :  { %v6830_v34 = vpop.f32.mrf.mxu0 }
 0x52a   :  { %v1174_v35 = vsel %vm436_vm4, %v1095_v33, -inf }
 0x52b   :  { %1175 = vmax.xlane.f32.xlu0 %v1174_v35  ;;  %v1170_v37 = vpop.f32.mrf.mxu0 }
 0x52c   :  { %v1171_v39 = vadd.f32 %v7557_v36, %v1170_v37 }
 0x52d   :  { %v6835_v40 = vpop.f32.mrf.mxu0 }
 0x52e   :  { %v1177_v41 = vsel %vm436_vm4, %v1171_v39, -inf }
 0x52f   :  { %1178 = vmax.xlane.f32.xlu1 %v1177_v41 }
 0x5b4   :  { %v1176_v42 = vpop.xlane.xlu0 %1175 }
 0x5b5   :  { %v1180_v43 = vsub.f32 %v1095_v33, %v1176_v42 }
 0x5b7   :  { %v1182_v44 = vmul.f32 1.442695, %v1180_v43 }
 0x5b8   :  { %v1179_v45 = vpop.xlane.xlu1 %1178 }
 0x5b9   :  { %7275 = vpow2.f32 %v1182_v44  ;;  %v1181_v46 = vsub.f32 %v1171_v39, %v1179_v45 }
 0x5bb   :  { %v1184_v47 = vmul.f32 1.442695, %v1181_v46 }
 0x5bd   :  { %7277 = vpow2.f32 %v1184_v47 }
 0x5c6   :  { %v7276_v48 = vpop.eup %7275 }
 0x5c7   :  { %v1186_v49 = vsel %vm436_vm4, %v7276_v48, 0.0 }
 0x5c8   :  { %1187 = vadd.xlane.f32.xlu0 %v1186_v49 }
 0x5ca   :  { %v7278_v50 = vpop.eup %7277 }
 0x5cb   :  { %v1189_v51 = vsel %vm436_vm4, %v7278_v50, 0.0 }
 0x5cc   :  { %1190 = vadd.xlane.f32.xlu1 %v1189_v51 }
 0x651   :  { %v1188_v53 = vpop.xlane.xlu0 %1187 }
 0x652   :  { %7279 = vrcp.f32 %v1188_v53 }
 0x655   :  { %v1191_v54 = vpop.xlane.xlu1 %1190 }
 0x656   :  { %7281 = vrcp.f32 %v1191_v54  ;;  %v6265_v54 = vld [vmem:[%s8429_s8 + $0x78] sm:$0xff] }
 0x65f   :  { %v7280_v55 = vpop.eup %7279 }
 0x660   :  { %v1193_v56 = vmul.f32 %v7280_v55, %v7276_v48 }
 0x662   :  { %6839 = vmatmul.mubr.msk.f32.vlgmr.msra.gmra.mxu1 %vm436_vm4, %v1193_v56 }
 0x663   :  { %v7282_v57 = vpop.eup %7281  ;;  %6847 = vmatpush3.msra.mxu1 %v6224_v63  ;;  %v6262_v63 = vld [vmem:[%s8429_s8 + $0x60] sm:$0xff] }
 0x664   :  { %v1195_v58 = vmul.f32 %v7282_v57, %v7278_v50  ;;  %6856 = vmatprep.subr.mxu1 %v6232_v0 }
 0x666   :  { %6844 = vmatmul.mubr.msk.f32.vlgmr.msra.gmra.mxu0 %vm436_vm4, %v1195_v58 }
 0x667   :  { %6853 = vmatprep.mubr.msk.f32.mxu0 %vm436_vm4, %v7628_v12  ;;  %6852 = vmatpush3.msra.mxu0 %v757_v52  ;;  %v6242_v12 = vld [vmem:[%s8403_s7 + $0x2] ss:$0 sm:$0xff] }
 0x668   :  { %6867 = vmatprep.subr.mxu0 %v6240_v59 }
 0x66a   :  { %6854 = vmatmul.mubr.msk.f32.vlgmr.msra.gmra.mxu0 %vm436_vm4, %v7626_v10  ;;  %v6247_v10 = vld [vmem:[%s8431_s0 + $0x50] sm:$0xff] }
 0x66b   :  { %6868 = vmatpush3.msra.mxu0 %v6240_v59  ;;  %6875 = vmatprep.mubr.msk.f32.mxu0 %vm170_vm2, %v7504_v15 }
 0x66c   :  { %6869 = vmatprep.subr.mxu0 %v6239_v60 }
 0x66d   :  { %6870 = vmatpush3.msra.mxu0 %v6239_v60 }
 0x66e   :  { %6871 = vmatprep.subr.mxu0 %v6238_v61 }
 0x66f   :  { %6872 = vmatpush3.msra.mxu0 %v6238_v61  ;;  %v6264_v61 = vld [vmem:[%s8429_s8 + $0x70] sm:$0xff] }
 0x670   :  { %6873 = vmatprep.subr.mxu0 %v6237_v62 }
 0x671   :  { %6874 = vmatpush3.msra.mxu0 %v6237_v62  ;;  %v6263_v62 = vld [vmem:[%s8429_s8 + $0x68] sm:$0xff] }
 0x672   :  { %6876 = vmatmul.mubr.msk.f32.vlgmr.msra.gmra.mxu0 %vm170_vm2, %v7506_v16  ;;  %6889 = vmatprep.subr.mxu0 %v7357_v20 }
 0x673   :  { %6891 = vmatprep.mubr.msk.f32.mxu0 %vm7358_vm3, %v7357_v20 }
 0x722   :  { %v1265_v1 = vpop.f32.mrf.mxu1 }
 0x723   :  { %6848 = vmatprep.mubr.msk.f32.mxu1 %vm436_vm4, %v1265_v1  ;;  %v6280_v1 = vld [vmem:[%s8431_s0 + $0x70] sm:$0xff] }
 0x724   :  { %v6840_v2 = vpop.f32.mrf.mxu1 }
 0x725   :  { %v6279_v2 = vld [vmem:[%s8431_s0 + $0x68] sm:$0xff] }
 0x726   :  { %v1338_v3 = vpop.f32.mrf.mxu0 }
 0x727   :  { %6849 = vmatmul.mubr.msk.f32.vlgmr.msra.gmra.mxu1 %vm436_vm4, %v1338_v3  ;;  %v6278_v3 = vld [vmem:[%s8431_s0 + $0x60] sm:$0xff] }
 0x728   :  { %6857 = vmatpush3.msra.mxu1 %v6232_v0  ;;  %v6845_v5 = vpop.f32.mrf.mxu0  ;;  %6864 = vmatprep.mubr.msk.f32.mxu1 %vm170_vm2, %v7504_v15  ;;  %v6281_v0 = vld [vmem:[%s8431_s0 + $0x78] sm:$0xff] }
 0x729   :  { %6858 = vmatprep.subr.mxu1 %v6231_v4  ;;  %v6273_v5 = vld [vmem:[%s8430_s2 + $0x78] sm:$0xff] }
 0x72a   :  { %6859 = vmatpush3.msra.mxu1 %v6231_v4  ;;  %v7702_v8 = vpop.f32.mrf.mxu0  ;;  %v6259_v4 = vld [vmem:[%s8407_s10 + $0x10] sm:$0xff] }
 0x72b   :  { %6860 = vmatprep.subr.mxu1 %v6230_v6 }
 0x72c   :  { %6861 = vmatpush3.msra.mxu1 %v6230_v6  ;;  %v7712_v11 = vpop.f32.mrf.mxu0 }
 0x72d   :  { %6862 = vmatprep.subr.mxu1 %v6229_v7 }
 0x72e   :  { %6863 = vmatpush3.msra.mxu1 %v6229_v7 }
 0x72f   :  { %6865 = vmatmul.mubr.msk.f32.vlgmr.msra.gmra.mxu1 %vm170_vm2, %v7506_v16  ;;  %6878 = vmatprep.subr.mxu1 %v6248_v9 }
 0x730   :  { %6879 = vmatpush3.msra.mxu1 %v6248_v9  ;;  %6886 = vmatprep.mubr.msk.f32.mxu1 %vm170_vm2, %v7504_v15 }
 0x731   :  { %6880 = vmatprep.subr.mxu1 %v6247_v10 }
 0x732   :  { %v6877_v14 = vpop.f32.mrf.mxu0  ;;  %6881 = vmatpush3.msra.mxu1 %v6247_v10  ;;  %v6272_v10 = vld [vmem:[%s8430_s2 + $0x70] sm:$0xff] }
 0x733   :  { %v1679_v18 = vadd.f32 %v6877_v14, %v6242_v12  ;;  %6882 = vmatprep.subr.mxu1 %v6246_v13  ;;  %v6270_v14 = vld [vmem:[%s8430_s2 + $0x60] sm:$0xff] }
 0x734   :  { %v1673_v19 = vpop.f32.mrf.mxu0  ;;  %6883 = vmatpush3.msra.mxu1 %v6246_v13  ;;  %v6271_v13 = vld [vmem:[%s8430_s2 + $0x68] sm:$0xff] }
 0x735   :  { %v1674_v21 = vadd.f32 %v6242_v12, %v1673_v19  ;;  %6884 = vmatprep.subr.mxu1 %v6245_v17  ;;  %v6283_v19 = vld [vmem:[%s8405_s9 + $0x3] ss:$0 sm:$0xff] }
 0x736   :  { %6885 = vmatpush3.msra.mxu1 %v6245_v17 }
 0x737   :  { %6887 = vmatmul.mubr.msk.f32.vlgmr.msra.gmra.mxu1 %vm170_vm2, %v7506_v16  ;;  %6890 = vmatpush3.xpose.msk.msra.mxu0 %vm436_vm4, %v1674_v21 }
 0x738   :  { %6894 = vmatprep.subr.mxu0 %v7357_v20  ;;  %6899 = vmatprep.subr.mxu1 %v7357_v20 }
 0x739   :  { %6901 = vmatprep.mubr.msk.f32.mxu1 %vm7358_vm3, %v7357_v20 }
 0x7e7   :  { %v7732_v22 = vpop.f32.mrf.mxu1 }
 0x7e9   :  { %v7734_v23 = vpop.f32.mrf.mxu1 }
 0x7ef   :  { %v6866_v24 = vpop.f32.mrf.mxu1 }
 0x7f0   :  { %v1591_v29 = vadd.f32 %v6866_v24, %v6234_v25 }
 0x7f1   :  { %v1585_v26 = vpop.f32.mrf.mxu1 }
 0x7f2   :  { %v1586_v27 = vadd.f32 %v6234_v25, %v1585_v26 }
 0x7f4   :  { %6892 = vmatmul.mubr.msk.f32.vlgmr.msra.gmra.mxu0 %vm436_vm4, %v1586_v27  ;;  %v1503_v27 = vadd.f32 %v7702_v8, %v7732_v22  ;;  %v6267_v8 = vld [vmem:[%s8404_s5 + $0x3] ss:$0 sm:$0xff] }
 0x7f5   :  { %6895 = vmatpush3.xpose.msk.msra.mxu0 %vm436_vm4, %v1679_v18  ;;  %6896 = vmatprep.mubr.msk.f32.mxu0 %vm7358_vm3, %v7357_v20 }
 0x7f6   :  { %6904 = vmatprep.subr.mxu0 %v7357_v20 }
 0x7f7   :  { %v6888_v30 = vpop.f32.mrf.mxu1 }
 0x7f8   :  { %v1767_v31 = vadd.f32 %v6888_v30, %v6250_v28  ;;  %6897 = vmatmul.mubr.msk.f32.vlgmr.msra.gmra.mxu0 %vm436_vm4, %v1591_v29  ;;  %v1498_v29 = vadd.f32 %v7712_v11, %v7734_v23 }
 0x7f9   :  { %v1761_v32 = vpop.f32.mrf.mxu1  ;;  %6906 = vmatprep.mubr.msk.f32.mxu0 %vm7358_vm3, %v7357_v20 }
 0x7fa   :  { %v1762_v33 = vadd.f32 %v6250_v28, %v1761_v32  ;;  %6905 = vmatpush3.msra.mxu0 %v1767_v31 }
 0x7fb   :  { %6914 = vmatprep.subr.mxu0 %v6265_v54 }
 0x7fc   :  { %6900 = vmatpush3.msra.mxu1 %v1762_v33 }
 0x7fd   :  { %6909 = vmatprep.subr.mxu1 %v6259_v4 }
 0x8b4   :  { %v1842_v34 = vpop.f32.mrf.mxu0 }
 0x8b5   :  { %v1843_v35 = vadd.f32 %v7562_v38, %v1842_v34  ;;  %v6275_v34 = vld [vmem:[%s8403_s7 + $0x3] ss:$0 sm:$0xff] }
 0x8b6   :  { %v6893_v37 = vpop.f32.mrf.mxu0 }
 0x8b7   :  { %v1922_v39 = vsel %vm436_vm4, %v1843_v35, -inf }
 0x8b8   :  { %1923 = vmax.xlane.f32.xlu0 %v1922_v39  ;;  %v1918_v40 = vpop.f32.mrf.mxu0 }
 0x8b9   :  { %v1919_v41 = vadd.f32 %v7557_v36, %v1918_v40 }
 0x8ba   :  { %v6898_v42 = vpop.f32.mrf.mxu0 }
 0x8bb   :  { %v1925_v43 = vsel %vm436_vm4, %v1919_v41, -inf }
 0x8bc   :  { %1926 = vmax.xlane.f32.xlu1 %v1925_v43 }
 0x941   :  { %v1924_v44 = vpop.xlane.xlu0 %1923 }
 0x942   :  { %v1928_v45 = vsub.f32 %v1843_v35, %v1924_v44 }
 0x944   :  { %v1930_v46 = vmul.f32 1.442695, %v1928_v45 }
 0x945   :  { %v1927_v47 = vpop.xlane.xlu1 %1926 }
 0x946   :  { %7283 = vpow2.f32 %v1930_v46  ;;  %v1929_v48 = vsub.f32 %v1919_v41, %v1927_v47 }
 0x948   :  { %v1932_v49 = vmul.f32 1.442695, %v1929_v48 }
 0x94a   :  { %7285 = vpow2.f32 %v1932_v49 }
 0x953   :  { %v7284_v50 = vpop.eup %7283 }
 0x954   :  { %v1934_v51 = vsel %vm436_vm4, %v7284_v50, 0.0 }
 0x955   :  { %1935 = vadd.xlane.f32.xlu0 %v1934_v51 }
 0x957   :  { %v7286_v52 = vpop.eup %7285 }
 0x958   :  { %v1937_v53 = vsel %vm436_vm4, %v7286_v52, 0.0 }
 0x959   :  { %1938 = vadd.xlane.f32.xlu1 %v1937_v53 }
 0x9de   :  { %v1936_v55 = vpop.xlane.xlu0 %1935 }
 0x9df   :  { %7287 = vrcp.f32 %v1936_v55 }
 0x9e2   :  { %v1939_v56 = vpop.xlane.xlu1 %1938 }
 0x9e3   :  { %7289 = vrcp.f32 %v1939_v56 }
 0x9ec   :  { %v7288_v57 = vpop.eup %7287 }
 0x9ed   :  { %v1941_v58 = vmul.f32 %v7288_v57, %v7284_v50 }
 0x9ef   :  { %6902 = vmatmul.mubr.msk.f32.vlgmr.msra.gmra.mxu1 %vm436_vm4, %v1941_v58 }
 0x9f0   :  { %v7290_v59 = vpop.eup %7289  ;;  %6910 = vmatpush3.msra.mxu1 %v6259_v4  ;;  %v2874_v4 = vld [vmem:[%s8408_s12 + $0x8] sm:$0xff] }
 0x9f1   :  { %v1943_v60 = vmul.f32 %v7290_v59, %v7286_v52  ;;  %6925 = vmatprep.subr.mxu1 %v6273_v5 }
 0x9f3   :  { %6907 = vmatmul.mubr.msk.f32.vlgmr.msra.gmra.mxu0 %vm436_vm4, %v1943_v60 }
 0x9f4   :  { %6915 = vmatpush3.msra.mxu0 %v6265_v54  ;;  %6922 = vmatprep.mubr.msk.f32.mxu0 %vm170_vm2, %v7504_v15 }
 0x9f5   :  { %6916 = vmatprep.subr.mxu0 %v6264_v61 }
 0x9f6   :  { %6917 = vmatpush3.msra.mxu0 %v6264_v61  ;;  %v6292_v61 = vld [vmem:[%s8407_s10 + $0x18] sm:$0xff] }
 0x9f7   :  { %6918 = vmatprep.subr.mxu0 %v6263_v62 }
 0x9f8   :  { %6919 = vmatpush3.msra.mxu0 %v6263_v62 }
 0x9f9   :  { %6920 = vmatprep.subr.mxu0 %v6262_v63 }
 0x9fa   :  { %6921 = vmatpush3.msra.mxu0 %v6262_v63 }
 0x9fb   :  { %6923 = vmatmul.mubr.msk.f32.vlgmr.msra.gmra.mxu0 %vm170_vm2, %v7506_v16  ;;  %6936 = vmatprep.subr.mxu0 %v6281_v0 }
 0x9fc   :  { %6937 = vmatpush3.msra.mxu0 %v6281_v0  ;;  %6944 = vmatprep.mubr.msk.f32.mxu0 %vm170_vm2, %v7504_v15 }
 0x9fd   :  { %6938 = vmatprep.subr.mxu0 %v6280_v1 }
 0x9fe   :  { %6939 = vmatpush3.msra.mxu0 %v6280_v1 }
 0x9ff   :  { %6940 = vmatprep.subr.mxu0 %v6279_v2 }
 0xa00   :  { %6941 = vmatpush3.msra.mxu0 %v6279_v2  ;;  %v2876_v2 = vld [vmem:[%s8408_s12 + $0x18] sm:$0xff] }
 0xa01   :  { %6942 = vmatprep.subr.mxu0 %v6278_v3 }
 0xa02   :  { %6943 = vmatpush3.msra.mxu0 %v6278_v3  ;;  %v2875_v3 = vld [vmem:[%s8408_s12 + $0x10] sm:$0xff] }
 0xa03   :  { %6945 = vmatmul.mubr.msk.f32.vlgmr.msra.gmra.mxu0 %vm170_vm2, %v7506_v16  ;;  %6957 = vmatprep.subr.mxu0 %v7357_v20 }
 0xa04   :  { %6959 = vmatprep.mubr.msk.f32.mxu0 %vm7358_vm3, %v7357_v20 }
 0xaaf   :  { %v2013_v6 = vpop.f32.mrf.mxu1 }
 0xab0   :  { %6911 = vmatprep.mubr.msk.f32.mxu1 %vm436_vm4, %v2013_v6 }
 0xab1   :  { %v6903_v7 = vpop.f32.mrf.mxu1 }
 0xab2   :  { %v6295_v7 = vld [vmem:[%s8409_s11] ss:$0 sm:$0xff] }
 0xab3   :  { %v2086_v9 = vpop.f32.mrf.mxu0 }
 0xab4   :  { %6912 = vmatmul.mubr.msk.f32.vlgmr.msra.gmra.mxu1 %vm436_vm4, %v2086_v9 }
 0xab5   :  { %6926 = vmatpush3.msra.mxu1 %v6273_v5  ;;  %v6908_v12 = vpop.f32.mrf.mxu0  ;;  %6933 = vmatprep.mubr.msk.f32.mxu1 %vm170_vm2, %v7504_v15  ;;  %v2873_v5 = vld [vmem:[%s8408_s12] sm:$0xff] }
 0xab6   :  { %6927 = vmatprep.subr.mxu1 %v6272_v10 }
 0xab7   :  { %6928 = vmatpush3.msra.mxu1 %v6272_v10 }
 0xab8   :  { %6929 = vmatprep.subr.mxu1 %v6271_v13 }
 0xab9   :  { %6930 = vmatpush3.msra.mxu1 %v6271_v13 }
 0xaba   :  { %6931 = vmatprep.subr.mxu1 %v6270_v14 }
 0xabb   :  { %6932 = vmatpush3.msra.mxu1 %v6270_v14  ;;  %v6924_v17 = vpop.f32.mrf.mxu0 }
 0xabc   :  { %6934 = vmatmul.mubr.msk.f32.vlgmr.msra.gmra.mxu1 %vm170_vm2, %v7506_v16  ;;  %6947 = vmatprep.subr.mxu1 %v7357_v20  ;;  %v2260_v23 = vadd.f32 %v6924_v17, %v6267_v8  ;;  %v6296_v17 = vld [vmem:[%s8410_s16] ss:$0 sm:$0xff] }
 0xabd   :  { %6949 = vmatprep.mubr.msk.f32.mxu1 %vm7358_vm3, %v7357_v20  ;;  %v2254_v18 = vpop.f32.mrf.mxu0 }
 0xabe   :  { %v2255_v22 = vadd.f32 %v6267_v8, %v2254_v18 }
 0xac3   :  { %v6946_v21 = vpop.f32.mrf.mxu0 }
 0xac4   :  { %v2436_v24 = vadd.f32 %v6946_v21, %v6283_v19 }
 0xac5   :  { %v2430_v25 = vpop.f32.mrf.mxu0 }
 0xac6   :  { %v2431_v26 = vadd.f32 %v6283_v19, %v2430_v25 }
 0xac8   :  { %6958 = vmatpush3.msra.mxu0 %v2431_v26 }
 0xac9   :  { %6967 = vmatprep.subr.mxu0 %v6292_v61 }
 0xb74   :  { %v6913_v28 = vpop.f32.mrf.mxu1 }
 0xb75   :  { %v7824_v30 = vadd.f32 %v6913_v28, %v1503_v27  ;;  %v3024_v28 = vld [vmem:[%s8412_s14 + $0x28] sm:$0xff] }
 0xb76   :  { %v2164_v31 = vpop.f32.mrf.mxu1 }
 0xb77   :  { %v7826_v32 = vadd.f32 %v2164_v31, %v1498_v29  ;;  %v3023_v29 = vld [vmem:[%s8412_s14 + $0x20] sm:$0xff]  ;;  %v3021_v31 = vld [vmem:[%s8412_s14 + $0x10] sm:$0xff] }
 0xb7c   :  { %v6935_v33 = vpop.f32.mrf.mxu1 }
 0xb7d   :  { %v2348_v11 = vadd.f32 %v6935_v33, %v6275_v34  ;;  %v3019_v33 = vld [vmem:[%s8412_s14] sm:$0xff] }
 0xb7e   :  { %v2342_v35 = vpop.f32.mrf.mxu1 }
 0xb7f   :  { %v2343_v37 = vadd.f32 %v6275_v34, %v2342_v35  ;;  %v6298_v34 = vld [vmem:[%s8413_s13] ss:$0 sm:$0xff] }
 0xb81   :  { %6948 = vmatpush3.xpose.msk.msra.mxu1 %vm436_vm4, %v2343_v37 }
 0xb82   :  { %6952 = vmatprep.subr.mxu1 %v7357_v20 }
 0xb84   :  { %6950 = vmatmul.mubr.msk.f32.vlgmr.msra.gmra.mxu1 %vm436_vm4, %v2255_v22 }
 0xb85   :  { %6953 = vmatpush3.xpose.msk.msra.mxu1 %vm436_vm4, %v2348_v11  ;;  %6954 = vmatprep.mubr.msk.f32.mxu1 %vm7358_vm3, %v7357_v20 }
 0xb86   :  { %6962 = vmatprep.subr.mxu1 %v7357_v20 }
 0xb88   :  { %6955 = vmatmul.mubr.msk.f32.vlgmr.msra.gmra.mxu1 %vm436_vm4, %v2260_v23 }
 0xb89   :  { %6963 = vmatpush3.msra.mxu1 %v2436_v24  ;;  %6964 = vmatprep.mubr.msk.f32.mxu1 %vm7358_vm3, %v7357_v20  ;;  %v6297_v24 = vld [vmem:[%s8411_s17] ss:$0 sm:$0xff] }
 0xb8a   :  { %6972 = vmatprep.subr.mxu1 %v2876_v2 }
 0xc44   :  { %v2511_v39 = vpop.f32.mrf.mxu1 }
 0xc45   :  { %v2512_v40 = vadd.f32 %v7562_v38, %v2511_v39 }
 0xc46   :  { %v6951_v41 = vpop.f32.mrf.mxu1 }
 0xc47   :  { %v2591_v42 = vsel %vm436_vm4, %v2512_v40, -inf }
 0xc48   :  { %2592 = vmax.xlane.f32.xlu0 %v2591_v42  ;;  %v2587_v43 = vpop.f32.mrf.mxu1 }
 0xc49   :  { %v2588_v44 = vadd.f32 %v7557_v36, %v2587_v43 }
 0xc4a   :  { %v6956_v45 = vpop.f32.mrf.mxu1 }
 0xc4b   :  { %v2594_v46 = vsel %vm436_vm4, %v2588_v44, -inf }
 0xc4c   :  { %2595 = vmax.xlane.f32.xlu1 %v2594_v46 }
 0xcd1   :  { %v2593_v47 = vpop.xlane.xlu0 %2592 }
 0xcd2   :  { %v2597_v48 = vsub.f32 %v2512_v40, %v2593_v47 }
 0xcd4   :  { %v2599_v49 = vmul.f32 1.442695, %v2597_v48 }
 0xcd5   :  { %v2596_v50 = vpop.xlane.xlu1 %2595 }
 0xcd6   :  { %7291 = vpow2.f32 %v2599_v49  ;;  %v2598_v51 = vsub.f32 %v2588_v44, %v2596_v50 }
 0xcd8   :  { %v2601_v52 = vmul.f32 1.442695, %v2598_v51 }
 0xcda   :  { %7293 = vpow2.f32 %v2601_v52 }
 0xce3   :  { %v7292_v38 = vpop.eup %7291 }
 0xce4   :  { %v2603_v53 = vsel %vm436_vm4, %v7292_v38, 0.0 }
 0xce5   :  { %2604 = vadd.xlane.f32.xlu0 %v2603_v53 }
 0xce7   :  { %v7294_v54 = vpop.eup %7293 }
 0xce8   :  { %v2606_v55 = vsel %vm436_vm4, %v7294_v54, 0.0 }
 0xce9   :  { %2607 = vadd.xlane.f32.xlu1 %v2606_v55 }
 0xd6e   :  { %v2605_v36 = vpop.xlane.xlu0 %2604 }
 0xd6f   :  { %7295 = vrcp.f32 %v2605_v36 }
 0xd72   :  { %v2608_v56 = vpop.xlane.xlu1 %2607 }
 0xd73   :  { %7297 = vrcp.f32 %v2608_v56 }
 0xd7c   :  { %v7296_v57 = vpop.eup %7295 }
 0xd7d   :  { %v2610_v58 = vmul.f32 %v7296_v57, %v7292_v38 }
 0xd7f   :  { %6960 = vmatmul.mubr.msk.f32.vlgmr.msra.gmra.mxu0 %vm436_vm4, %v2610_v58 }
 0xd80   :  { %v7298_v59 = vpop.eup %7297  ;;  %6968 = vmatpush3.msra.mxu0 %v6292_v61 }
 0xd81   :  { %v2612_v60 = vmul.f32 %v7298_v59, %v7294_v54 }
 0xd83   :  { %6965 = vmatmul.mubr.msk.f32.vlgmr.msra.gmra.mxu1 %vm436_vm4, %v2612_v60 }
 0xd84   :  { %6973 = vmatpush3.msra.mxu1 %v2876_v2 }
 0xd85   :  { %6974 = vmatprep.subr.mxu1 %v2875_v3 }
 0xd86   :  { %6975 = vmatpush3.msra.mxu1 %v2875_v3 }
 0xd87   :  { %6976 = vmatprep.subr.mxu1 %v2874_v4 }
 0xd88   :  { %6977 = vmatpush3.msra.mxu1 %v2874_v4 }
 0xd89   :  { %6978 = vmatprep.subr.mxu1 %v2873_v5 }
 0xd8a   :  { %6979 = vmatpush3.msra.mxu1 %v2873_v5 }
 0xe3f   :  { %v2682_v62 = vpop.f32.mrf.mxu0 }
 0xe40   :  { %6969 = vmatprep.mubr.msk.f32.mxu0 %vm436_vm4, %v2682_v62 }
 0xe41   :  { %v6961_v63 = vpop.f32.mrf.mxu0 }
 0xe43   :  { %v2755_v0 = vpop.f32.mrf.mxu1 }
 0xe44   :  { %6970 = vmatmul.mubr.msk.f32.vlgmr.msra.gmra.mxu0 %vm436_vm4, %v2755_v0 }
 0xe45   :  { %v6966_v1 = vpop.f32.mrf.mxu1 }
 0xf04   :  { %v6971_v6 = vpop.f32.mrf.mxu0 }
 0xf05   :  { %v2843_v9 = vadd.f32 %v6971_v6, %v7824_v30  ;;  %v3022_v30 = vld [vmem:[%s8412_s14 + $0x18] sm:$0xff] }
 0xf06   :  { %v2833_v10 = vpop.f32.mrf.mxu0 }
 0xf07   :  { %v2852_v12 = vadd.f32 %v6295_v7, %v2843_v9  ;;  %v2842_v13 = vadd.f32 %v2833_v10, %v7826_v32  ;;  %v3020_v32 = vld [vmem:[%s8412_s14 + $0x8] sm:$0xff]  ;;  %v7359_v10 = vmov -1.0  }
 0xf09   :  { %v2854_v14 = vadd.f32 %v2852_v12, %v7506_v16  ;;  %v2851_v18 = vadd.f32 %v6295_v7, %v2842_v13  ;;  %v3025_v16 = vld [vmem:[%s8412_s14 + $0x30] sm:$0xff] }
 0xf0b   :  { %v2853_v19 = vadd.f32 %v2851_v18, %v7504_v15  ;;  %v2863_v21 = vmul.f32 %v6296_v17, %v2854_v14  ;;  %v3026_v15 = vld [vmem:[%s8412_s14 + $0x38] sm:$0xff] }
 0xf0c   :  { %6983 = vmatprep.subr.mxu0 %v3026_v15 }
 0xf0d   :  { %v2862_v25 = vmul.f32 %v6296_v17, %v2853_v19  ;;  %v7884_v27 = vadd.f32 %v6297_v24, %v2863_v21  ;;  %6984 = vmatpush3.msra.mxu0 %v3026_v15 }
 0xf0e   :  { %6985 = vmatprep.subr.mxu0 %v3025_v16 }
 0xf0f   :  { %v7882_v26 = vadd.f32 %v6297_v24, %v2862_v25  ;;  %6986 = vmatpush3.msra.mxu0 %v3025_v16 }
 0xf10   :  { %6987 = vmatprep.subr.mxu0 %v3024_v28 }
 0xf11   :  { %6980 = vmatprep.mubr.msk.f32.mxu1 %vm170_vm2, %v7882_v26  ;;  %6988 = vmatpush3.msra.mxu0 %v3024_v28 }
 0xf12   :  { %6981 = vmatmul.mubr.msk.f32.vlgmr.msra.gmra.mxu1 %vm170_vm2, %v7884_v27  ;;  %6989 = vmatprep.subr.mxu0 %v3023_v29 }
 0xf13   :  { %6990 = vmatpush3.msra.mxu0 %v3023_v29  ;;  %v6309_v29 = vld [vmem:[%s8429_s8 + $0x98] sm:$0xff] }
 0xf14   :  { %6991 = vmatprep.subr.mxu0 %v3022_v30  ;;  %7002 = vmatprep.subr.mxu1 %v6309_v29 }
 0xf15   :  { %6992 = vmatpush3.msra.mxu0 %v3022_v30  ;;  %v6325_v30 = vld [vmem:[%s8431_s0 + $0x98] sm:$0xff]  ;;  %7003 = vmatpush3.msra.mxu1 %v6309_v29 }
 0xf16   :  { %6993 = vmatprep.subr.mxu0 %v3021_v31 }
 0xf17   :  { %6994 = vmatpush3.msra.mxu0 %v3021_v31  ;;  %v6308_v31 = vld [vmem:[%s8429_s8 + $0x90] sm:$0xff] }
 0xf18   :  { %6995 = vmatprep.subr.mxu0 %v3020_v32  ;;  %7004 = vmatprep.subr.mxu1 %v6308_v31 }
 0xf19   :  { %6996 = vmatpush3.msra.mxu0 %v3020_v32  ;;  %v6324_v32 = vld [vmem:[%s8431_s0 + $0x90] sm:$0xff]  ;;  %7005 = vmatpush3.msra.mxu1 %v6308_v31 }
 0xf1a   :  { %6997 = vmatprep.subr.mxu0 %v3019_v33 }
 0xf1b   :  { %6998 = vmatpush3.msra.mxu0 %v3019_v33  ;;  %v6307_v33 = vld [vmem:[%s8429_s8 + $0x88] sm:$0xff] }
 0xf1c   :  { %7024 = vmatprep.subr.mxu0 %v6325_v30  ;;  %7006 = vmatprep.subr.mxu1 %v6307_v33 }
 0xf1d   :  { %7007 = vmatpush3.msra.mxu1 %v6307_v33 }
 0xfd2   :  { %v6982_v35 = vpop.f32.mrf.mxu1 }
 0xfd3   :  { %v2962_v37 = vadd.f32 %v6982_v35, %v6298_v34  ;;  %v6306_v35 = vld [vmem:[%s8429_s8 + $0x80] sm:$0xff] }
 0xfd4   :  { %v2956_v8 = vpop.f32.mrf.mxu1  ;;  %7008 = vmatprep.subr.mxu1 %v6306_v35 }
 0xfd5   :  { %v2968_v22 = vmul.f32 0.70710677, %v2962_v37  ;;  %v2957_v11 = vadd.f32 %v6298_v34, %v2956_v8  ;;  %v2966_v15 = vmul.f32 0.5, %v2962_v37  ;;  %v6323_v34 = vld [vmem:[%s8431_s0 + $0x88] sm:$0xff]  ;;  %v6322_v37 = vld [vmem:[%s8431_s0 + $0x80] sm:$0xff]  ;;  %7009 = vmatpush3.msra.mxu1 %v6306_v35  ;;  %v6317_v8 = vld [vmem:[%s8430_s2 + $0x98] sm:$0xff] }
 0xfd6   :  { %7013 = vmatprep.subr.mxu1 %v6317_v8 }
 0xfd7   :  { %v2974_v23 = vand.u32 2147483647, %v2968_v22  ;;  %v2967_v39 = vmul.f32 0.70710677, %v2957_v11  ;;  %vm2970_vm5 = vcmp.ge.f32.partialorder %v2968_v22, 0.0  ;;  %v2965_v24 = vmul.f32 0.5, %v2957_v11 }
 0xfd8   :  { %v2972_v12 = vsel %vm2970_vm5, 1.0, %v7359_v10  ;;  %v6301_v22 = vld [vmem:[%s8414_s15] ss:$0 sm:$0xff] }
 0xfd9   :  { %v2976_v40 = vmul.f32 0.3275911, %v2974_v23  ;;  %v2973_v41 = vand.u32 2147483647, %v2967_v39  ;;  %v3002_v45 = vsub.f32 0.0, %v2974_v23  ;;  %vm2969_vm6 = vcmp.ge.f32.partialorder %v2967_v39, 0.0 }
 0xfda   :  { %v2971_v18 = vsel %vm2969_vm6, 1.0, %v7359_v10 }
 0xfdb   :  { %v2978_v42 = vadd.f32 1.0, %v2976_v40  ;;  %v2975_v43 = vmul.f32 0.3275911, %v2973_v41  ;;  %v3001_v46 = vsub.f32 0.0, %v2973_v41  ;;  %v3004_v47 = vmul.f32 %v3002_v45, %v2974_v23  ;;  %v6305_v45 = vld [vmem:[%s8416_s19] ss:$0 sm:$0xff] }
 0xfdd   :  { %7299 = vrcp.f32 %v2978_v42  ;;  %v2977_v44 = vadd.f32 1.0, %v2975_v43  ;;  %v3003_v49 = vmul.f32 %v3001_v46, %v2973_v41  ;;  %v3007_v51 = vmul.f32 1.442695, %v3004_v47  ;;  %v6304_v41 = vld [vmem:[%s8415_s18] ss:$0 sm:$0xff] }
 0xfdf   :  { %7301 = vrcp.f32 %v2977_v44  ;;  %v3005_v54 = vmul.f32 1.442695, %v3003_v49  ;;  %v6314_v49 = vld [vmem:[%s8430_s2 + $0x80] sm:$0xff] }
 0xfe0   :  { %7303 = vpow2.f32 %v3007_v51 }
 0xfe1   :  { %7305 = vpow2.f32 %v3005_v54  ;;  %v6311_v54 = vld [vmem:[%s8404_s5 + $0x4] ss:$0 sm:$0xff] }
 0xfea   :  { %v7300_v48 = vpop.eup %7299 }
 0xfeb   :  { %v2984_v50 = vmul.f32 1.0614054, %v7300_v48 }
 0xfec   :  { %v7302_v52 = vpop.eup %7301 }
 0xfed   :  { %v2986_v38 = vadd.f32 -1.4531521, %v2984_v50  ;;  %v2983_v53 = vmul.f32 1.0614054, %v7302_v52  ;;  %v7304_v3 = vpop.eup %7303 }
 0xfee   :  { %v7306_v7 = vpop.eup %7305 }
 0xfef   :  { %v2988_v55 = vmul.f32 %v7300_v48, %v2986_v38  ;;  %v2985_v36 = vadd.f32 -1.4531521, %v2983_v53 }
 0xff1   :  { %v2990_v56 = vadd.f32 1.4214138, %v2988_v55  ;;  %v2987_v57 = vmul.f32 %v7302_v52, %v2985_v36  ;;  %v6327_v36 = vld [vmem:[%s8405_s9 + $0x4] ss:$0 sm:$0xff] }
 0xff3   :  { %v2992_v58 = vmul.f32 %v7300_v48, %v2990_v56  ;;  %v2989_v59 = vadd.f32 1.4214138, %v2987_v57 }
 0xff5   :  { %v2994_v60 = vadd.f32 -0.28449672, %v2992_v58  ;;  %v2991_v61 = vmul.f32 %v7302_v52, %v2989_v59 }
 0xff7   :  { %v2996_v62 = vmul.f32 %v7300_v48, %v2994_v60  ;;  %v2993_v63 = vadd.f32 -0.28449672, %v2991_v61 }
 0xff9   :  { %v2998_v0 = vadd.f32 0.2548296, %v2996_v62  ;;  %v2995_v1 = vmul.f32 %v7302_v52, %v2993_v63 }
 0xffb   :  { %v3000_v2 = vmul.f32 %v7300_v48, %v2998_v0  ;;  %v2997_v4 = vadd.f32 0.2548296, %v2995_v1  ;;  %v8012_v0 = vld [vmem:[%s8406_s1 + $0x1] ss:$0 sm:$0xff] }
 0xffd   :  { %v3010_v5 = vmul.f32 %v7304_v3, %v3000_v2  ;;  %v2999_v6 = vmul.f32 %v7302_v52, %v2997_v4  ;;  %v6319_v52 = vld [vmem:[%s8403_s7 + $0x4] ss:$0 sm:$0xff]  ;;  %v8018_v4 = vld [vmem:[%s8406_s1] ss:$0 sm:$0xff] }
 0xfff   :  { %v3012_v9 = vsub.f32 1.0, %v3010_v5  ;;  %v3009_v13 = vmul.f32 %v7306_v7, %v2999_v6 }
0x1001   :  { %v3014_v14 = vmul.f32 %v3012_v9, %v2972_v12  ;;  %v3011_v17 = vsub.f32 1.0, %v3009_v13 }
0x1003   :  { %v3013_v19 = vmul.f32 %v3011_v17, %v2971_v18  ;;  %v3016_v21 = vadd.f32 1.0, %v3014_v14 }
0x1005   :  { %v3015_v25 = vadd.f32 1.0, %v3013_v19  ;;  %v3018_v28 = vmul.f32 %v3016_v21, %v2966_v15 }
0x1007   :  { %v3017_v16 = vmul.f32 %v3015_v25, %v2965_v24 }
0x1009   :  { %6999 = vmatprep.mubr.msk.f32.mxu0 %vm3034_vm7, %v3017_v16  ;;  %v6348_v16 = vld [vmem:[%s8430_s2 + $0xb8] sm:$0xff] }
0x100a   :  { %7000 = vmatmul.mubr.msk.f32.vlgmr.msra.gmra.mxu0 %vm3034_vm7, %v3018_v28  ;;  %v6340_v28 = vld [vmem:[%s8429_s8 + $0xb8] sm:$0xff] }
0x100b   :  { %7025 = vmatpush3.msra.mxu0 %v6325_v30 }
0x100c   :  { %7026 = vmatprep.subr.mxu0 %v6324_v32 }
0x100d   :  { %7027 = vmatpush3.msra.mxu0 %v6324_v32 }
0x100e   :  { %7028 = vmatprep.subr.mxu0 %v6323_v34 }
0x100f   :  { %7029 = vmatpush3.msra.mxu0 %v6323_v34  ;;  %v6347_v34 = vld [vmem:[%s8430_s2 + $0xb0] sm:$0xff] }
0x1010   :  { %7030 = vmatprep.subr.mxu0 %v6322_v37 }
0x1011   :  { %7031 = vmatpush3.msra.mxu0 %v6322_v37  ;;  %v6339_v37 = vld [vmem:[%s8429_s8 + $0xb0] sm:$0xff] }
0x1012   :  { %7040 = vmatprep.subr.mxu0 %v7357_v20 }
0x10ca   :  { %v7001_v11 = vpop.f32.mrf.mxu0 }
0x10cb   :  { %v3113_v23 = vadd.f32 %v7001_v11, %v6301_v22  ;;  %v6345_v11 = vld [vmem:[%s8430_s2 + $0xa0] sm:$0xff] }
0x10cc   :  { %v3107_v39 = vpop.f32.mrf.mxu0 }
0x10cd   :  { %v3117_v40 = vadd.f32 %v3113_v23, %v7884_v27  ;;  %v3108_v42 = vadd.f32 %v6301_v22, %v3107_v39  ;;  %v6315_v27 = vld [vmem:[%s8430_s2 + $0x88] sm:$0xff]  ;;  %v6337_v23 = vld [vmem:[%s8429_s8 + $0xa0] sm:$0xff]  ;;  %v6356_v39 = vld [vmem:[%s8431_s0 + $0xb8] sm:$0xff] }
0x10ce   :  { %v6338_v22 = vld [vmem:[%s8429_s8 + $0xa8] sm:$0xff] }
0x10cf   :  { %v3116_v43 = vadd.f32 %v3108_v42, %v7882_v26  ;;  %v3126_v44 = vmul.f32 %v6304_v41, %v3117_v40  ;;  %v6316_v26 = vld [vmem:[%s8430_s2 + $0x90] sm:$0xff]  ;;  %v6353_v42 = vld [vmem:[%s8431_s0 + $0xa0] sm:$0xff] }
0x10d0   :  { %v6355_v40 = vld [vmem:[%s8431_s0 + $0xb0] sm:$0xff] }
0x10d1   :  { %v3125_v46 = vmul.f32 %v6304_v41, %v3116_v43  ;;  %v7962_v48 = vadd.f32 %v6305_v45, %v3126_v44  ;;  %v6354_v41 = vld [vmem:[%s8431_s0 + $0xa8] sm:$0xff] }
0x10d3   :  { %v7960_v47 = vadd.f32 %v6305_v45, %v3125_v46 }
0x10d5   :  { %7010 = vmatprep.mubr.msk.f32.mxu1 %vm170_vm2, %v7960_v47  ;;  %7032 = vmatprep.mubr.msk.f32.mxu0 %vm170_vm2, %v7960_v47 }
0x10d6   :  { %7011 = vmatmul.mubr.msk.f32.vlgmr.msra.gmra.mxu1 %vm170_vm2, %v7962_v48  ;;  %7033 = vmatmul.mubr.msk.f32.vlgmr.msra.gmra.mxu0 %vm170_vm2, %v7962_v48 }
0x10d7   :  { %7014 = vmatpush3.msra.mxu1 %v6317_v8  ;;  %7021 = vmatprep.mubr.msk.f32.mxu1 %vm170_vm2, %v7960_v47  ;;  %v6346_v8 = vld [vmem:[%s8430_s2 + $0xa8] sm:$0xff] }
0x10d8   :  { %7015 = vmatprep.subr.mxu1 %v6316_v26  ;;  %7042 = vmatprep.mubr.msk.f32.mxu0 %vm7358_vm3, %v7357_v20 }
0x10d9   :  { %7016 = vmatpush3.msra.mxu1 %v6316_v26 }
0x10da   :  { %7017 = vmatprep.subr.mxu1 %v6315_v27 }
0x10db   :  { %7018 = vmatpush3.msra.mxu1 %v6315_v27 }
0x10dc   :  { %7019 = vmatprep.subr.mxu1 %v6314_v49 }
0x10dd   :  { %7020 = vmatpush3.msra.mxu1 %v6314_v49  ;;  %v6350_v49 = vld [vmem:[%s8403_s7 + $0x5] ss:$0 sm:$0xff] }
0x10de   :  { %7022 = vmatmul.mubr.msk.f32.vlgmr.msra.gmra.mxu1 %vm170_vm2, %v7962_v48  ;;  %7035 = vmatprep.subr.mxu1 %v7357_v20 }
0x10df   :  { %7037 = vmatprep.mubr.msk.f32.mxu1 %vm7358_vm3, %v7357_v20 }
0x1196   :  { %v7012_v50 = vpop.f32.mrf.mxu1  ;;  %v7034_v38 = vpop.f32.mrf.mxu0 }
0x1197   :  { %v3227_v58 = vadd.f32 %v7012_v50, %v6311_v54  ;;  %v3403_v60 = vadd.f32 %v7034_v38, %v6327_v36 }
0x1198   :  { %v3221_v51 = vpop.f32.mrf.mxu1  ;;  %v3397_v59 = vpop.f32.mrf.mxu0 }
0x1199   :  { %v3222_v61 = vadd.f32 %v6311_v54, %v3221_v51  ;;  %v3398_v62 = vadd.f32 %v6327_v36, %v3397_v59  ;;  %v6342_v51 = vld [vmem:[%s8404_s5 + $0x5] ss:$0 sm:$0xff] }
0x119e   :  { %v7023_v53 = vpop.f32.mrf.mxu1 }
0x119f   :  { %v3315_v55 = vadd.f32 %v7023_v53, %v6319_v52 }
0x11a0   :  { %v3309_v56 = vpop.f32.mrf.mxu1 }
0x11a1   :  { %v3310_v57 = vadd.f32 %v6319_v52, %v3309_v56  ;;  %7041 = vmatpush3.xpose.msk.msra.mxu0 %vm436_vm4, %v3315_v55  ;;  %v6358_v55 = vld [vmem:[%s8405_s9 + $0x5] ss:$0 sm:$0xff] }
0x11a2   :  { %7050 = vmatprep.subr.mxu0 %v7357_v20 }
0x11a3   :  { %7036 = vmatpush3.xpose.msk.msra.mxu1 %vm436_vm4, %v3310_v57 }
0x11a4   :  { %7043 = vmatmul.mubr.msk.f32.vlgmr.msra.gmra.mxu0 %vm436_vm4, %v3227_v58  ;;  %7045 = vmatprep.subr.mxu1 %v7357_v20 }
0x11a5   :  { %7051 = vmatpush3.msra.mxu0 %v3403_v60  ;;  %7052 = vmatprep.mubr.msk.f32.mxu0 %vm7358_vm3, %v7357_v20 }
0x11a6   :  { %7038 = vmatmul.mubr.msk.f32.vlgmr.msra.gmra.mxu1 %vm436_vm4, %v3222_v61  ;;  %7066 = vmatprep.subr.mxu0 %v6348_v16 }
0x11a7   :  { %7046 = vmatpush3.msra.mxu1 %v3398_v62  ;;  %7047 = vmatprep.mubr.msk.f32.mxu1 %vm7358_vm3, %v7357_v20 }
0x11a8   :  { %7055 = vmatprep.subr.mxu1 %v6340_v28 }
0x1264   :  { %v3554_v63 = vpop.f32.mrf.mxu0 }
0x1265   :  { %v3555_v1 = vadd.f32 %v8012_v0, %v3554_v63 }
0x1266   :  { %v3478_v2 = vpop.f32.mrf.mxu1  ;;  %v7044_v3 = vpop.f32.mrf.mxu0 }
0x1267   :  { %v3479_v5 = vadd.f32 %v8018_v4, %v3478_v2  ;;  %v3561_v6 = vsel %vm436_vm4, %v3555_v1, -inf }
0x1268   :  { %3562 = vmax.xlane.f32.xlu0 %v3561_v6  ;;  %v7039_v7 = vpop.f32.mrf.mxu1 }
0x1269   :  { %v3558_v9 = vsel %vm436_vm4, %v3479_v5, -inf }
0x126a   :  { %3559 = vmax.xlane.f32.xlu1 %v3558_v9 }
0x12f1   :  { %v3563_v12 = vpop.xlane.xlu0 %3562 }
0x12f2   :  { %v3565_v13 = vsub.f32 %v3555_v1, %v3563_v12 }
0x12f3   :  { %v3560_v14 = vpop.xlane.xlu1 %3559 }
0x12f4   :  { %v3568_v17 = vmul.f32 1.442695, %v3565_v13  ;;  %v3564_v18 = vsub.f32 %v3479_v5, %v3560_v14 }
0x12f6   :  { %7307 = vpow2.f32 %v3568_v17  ;;  %v3566_v19 = vmul.f32 1.442695, %v3564_v18 }
0x12f8   :  { %7309 = vpow2.f32 %v3566_v19 }
0x1303   :  { %v7308_v21 = vpop.eup %7307 }
0x1304   :  { %v3573_v24 = vsel %vm436_vm4, %v7308_v21, 0.0 }
0x1305   :  { %v7310_v25 = vpop.eup %7309  ;;  %3574 = vadd.xlane.f32.xlu0 %v3573_v24  ;;  %v6336_v24 = vld [vmem:[%s8407_s10 + $0x20] sm:$0xff] }
0x1306   :  { %v3570_v15 = vsel %vm436_vm4, %v7310_v25, 0.0 }
0x1307   :  { %3571 = vadd.xlane.f32.xlu1 %v3570_v15 }
0x138e   :  { %v3575_v29 = vpop.xlane.xlu0 %3574 }
0x138f   :  { %7311 = vrcp.f32 %v3575_v29 }
0x1390   :  { %v3572_v30 = vpop.xlane.xlu1 %3571 }
0x1391   :  { %7313 = vrcp.f32 %v3572_v30 }
0x139c   :  { %v7312_v31 = vpop.eup %7311 }
0x139d   :  { %v3579_v32 = vmul.f32 %v7312_v31, %v7308_v21  ;;  %v6383_v31 = vld [vmem:[%s8430_s2 + $0xd8] sm:$0xff] }
0x139e   :  { %v7314_v33 = vpop.eup %7313 }
0x139f   :  { %7053 = vmatmul.mubr.msk.f32.vlgmr.msra.gmra.mxu0 %vm436_vm4, %v3579_v32  ;;  %v3577_v35 = vmul.f32 %v7314_v33, %v7310_v25  ;;  %v6382_v32 = vld [vmem:[%s8430_s2 + $0xd0] sm:$0xff]  ;;  %v6381_v33 = vld [vmem:[%s8430_s2 + $0xc8] sm:$0xff] }
0x13a0   :  { %7067 = vmatpush3.msra.mxu0 %v6348_v16  ;;  %7074 = vmatprep.mubr.msk.f32.mxu0 %vm170_vm2, %v7960_v47 }
0x13a1   :  { %7068 = vmatprep.subr.mxu0 %v6347_v34  ;;  %7048 = vmatmul.mubr.msk.f32.vlgmr.msra.gmra.mxu1 %vm436_vm4, %v3577_v35  ;;  %v6367_v35 = vld [vmem:[%s8407_s10 + $0x28] sm:$0xff] }
0x13a2   :  { %7056 = vmatpush3.msra.mxu1 %v6340_v28  ;;  %7069 = vmatpush3.msra.mxu0 %v6347_v34  ;;  %v6380_v34 = vld [vmem:[%s8430_s2 + $0xc0] sm:$0xff] }
0x13a3   :  { %7057 = vmatprep.subr.mxu1 %v6339_v37  ;;  %7063 = vmatprep.mubr.msk.f32.mxu1 %vm170_vm2, %v7960_v47 }
0x13a4   :  { %7070 = vmatprep.subr.mxu0 %v6346_v8  ;;  %7058 = vmatpush3.msra.mxu1 %v6339_v37  ;;  %v6375_v37 = vld [vmem:[%s8429_s8 + $0xd8] sm:$0xff] }
0x13a5   :  { %7071 = vmatpush3.msra.mxu0 %v6346_v8  ;;  %7059 = vmatprep.subr.mxu1 %v6338_v22 }
0x13a6   :  { %7072 = vmatprep.subr.mxu0 %v6345_v11  ;;  %7060 = vmatpush3.msra.mxu1 %v6338_v22 }
0x13a7   :  { %7073 = vmatpush3.msra.mxu0 %v6345_v11  ;;  %7061 = vmatprep.subr.mxu1 %v6337_v23 }
0x13a8   :  { %7075 = vmatmul.mubr.msk.f32.vlgmr.msra.gmra.mxu0 %vm170_vm2, %v7962_v48  ;;  %7062 = vmatpush3.msra.mxu1 %v6337_v23  ;;  %v6374_v23 = vld [vmem:[%s8429_s8 + $0xd0] sm:$0xff] }
0x13a9   :  { %7064 = vmatmul.mubr.msk.f32.vlgmr.msra.gmra.mxu1 %vm170_vm2, %v7962_v48  ;;  %7077 = vmatprep.subr.mxu1 %v6356_v39 }
0x13aa   :  { %7078 = vmatpush3.msra.mxu1 %v6356_v39  ;;  %7085 = vmatprep.mubr.msk.f32.mxu1 %vm170_vm2, %v7960_v47 }
0x13ab   :  { %7079 = vmatprep.subr.mxu1 %v6355_v40  ;;  %7088 = vmatprep.subr.mxu0 %v7357_v20 }
0x13ac   :  { %7080 = vmatpush3.msra.mxu1 %v6355_v40  ;;  %7090 = vmatprep.mubr.msk.f32.mxu0 %vm7358_vm3, %v7357_v20  ;;  %v6373_v40 = vld [vmem:[%s8429_s8 + $0xc8] sm:$0xff] }
0x13ad   :  { %7081 = vmatprep.subr.mxu1 %v6354_v41 }
0x13ae   :  { %7082 = vmatpush3.msra.mxu1 %v6354_v41  ;;  %v6372_v41 = vld [vmem:[%s8429_s8 + $0xc0] sm:$0xff] }
0x13af   :  { %7083 = vmatprep.subr.mxu1 %v6353_v42 }
0x13b0   :  { %7084 = vmatpush3.msra.mxu1 %v6353_v42 }
0x13b1   :  { %7086 = vmatmul.mubr.msk.f32.vlgmr.msra.gmra.mxu1 %vm170_vm2, %v7962_v48  ;;  %7098 = vmatprep.subr.mxu1 %v7357_v20 }
0x13b2   :  { %7100 = vmatprep.mubr.msk.f32.mxu1 %vm7358_vm3, %v7357_v20 }
0x145f   :  { %v8081_v43 = vpop.f32.mrf.mxu0 }
0x1461   :  { %v8083_v44 = vpop.f32.mrf.mxu1  ;;  %v7054_v45 = vpop.f32.mrf.mxu0 }
0x1463   :  { %v7049_v46 = vpop.f32.mrf.mxu1 }
0x1464   :  { %v6385_v46 = vld [vmem:[%s8403_s7 + $0x6] ss:$0 sm:$0xff] }
0x1468   :  { %v7076_v26 = vpop.f32.mrf.mxu0 }
0x1469   :  { %v7065_v27 = vpop.f32.mrf.mxu1  ;;  %v3901_v54 = vadd.f32 %v7076_v26, %v6350_v49  ;;  %v6389_v26 = vld [vmem:[%s8431_s0 + $0xc8] sm:$0xff] }
0x146a   :  { %v3895_v50 = vpop.f32.mrf.mxu0  ;;  %v3813_v56 = vadd.f32 %v7065_v27, %v6342_v51 }
0x146b   :  { %v3896_v52 = vadd.f32 %v6350_v49, %v3895_v50  ;;  %v3807_v38 = vpop.f32.mrf.mxu1  ;;  %v6388_v49 = vld [vmem:[%s8431_s0 + $0xc0] sm:$0xff] }
0x146c   :  { %v3808_v53 = vadd.f32 %v6342_v51, %v3807_v38 }
0x146d   :  { %7089 = vmatpush3.xpose.msk.msra.mxu0 %vm436_vm4, %v3896_v52 }
0x146e   :  { %7093 = vmatprep.subr.mxu0 %v7357_v20 }
0x1470   :  { %7091 = vmatmul.mubr.msk.f32.vlgmr.msra.gmra.mxu0 %vm436_vm4, %v3808_v53 }
0x1471   :  { %7094 = vmatpush3.xpose.msk.msra.mxu0 %vm436_vm4, %v3901_v54  ;;  %v7087_v36 = vpop.f32.mrf.mxu1  ;;  %7095 = vmatprep.mubr.msk.f32.mxu0 %vm7358_vm3, %v7357_v20 }
0x1472   :  { %v3989_v57 = vadd.f32 %v7087_v36, %v6358_v55  ;;  %7103 = vmatprep.subr.mxu0 %v7357_v20 }
0x1473   :  { %v3983_v58 = vpop.f32.mrf.mxu1 }
0x1474   :  { %v3984_v59 = vadd.f32 %v6358_v55, %v3983_v58  ;;  %7096 = vmatmul.mubr.msk.f32.vlgmr.msra.gmra.mxu0 %vm436_vm4, %v3813_v56  ;;  %v6377_v55 = vld [vmem:[%s8404_s5 + $0x6] ss:$0 sm:$0xff] }
0x1475   :  { %7104 = vmatpush3.msra.mxu0 %v3989_v57  ;;  %7105 = vmatprep.mubr.msk.f32.mxu0 %vm7358_vm3, %v7357_v20  ;;  %v6393_v57 = vld [vmem:[%s8405_s9 + $0x6] ss:$0 sm:$0xff] }
0x1476   :  { %7099 = vmatpush3.msra.mxu1 %v3984_v59  ;;  %7113 = vmatprep.subr.mxu0 %v6336_v24 }
0x1477   :  { %7108 = vmatprep.subr.mxu1 %v6367_v35 }
0x1530   :  { %v4064_v60 = vpop.f32.mrf.mxu0 }
0x1531   :  { %v4065_v61 = vadd.f32 %v8018_v4, %v4064_v60 }
0x1532   :  { %v7092_v62 = vpop.f32.mrf.mxu0 }
0x1533   :  { %v4144_v63 = vsel %vm436_vm4, %v4065_v61, -inf }
0x1534   :  { %4145 = vmax.xlane.f32.xlu0 %v4144_v63  ;;  %v4140_v1 = vpop.f32.mrf.mxu0 }
0x1535   :  { %v4141_v2 = vadd.f32 %v8012_v0, %v4140_v1 }
0x1536   :  { %v7097_v3 = vpop.f32.mrf.mxu0 }
0x1537   :  { %v4147_v5 = vsel %vm436_vm4, %v4141_v2, -inf }
0x1538   :  { %4148 = vmax.xlane.f32.xlu1 %v4147_v5 }
0x15bd   :  { %v4146_v6 = vpop.xlane.xlu0 %4145 }
0x15be   :  { %v4150_v7 = vsub.f32 %v4065_v61, %v4146_v6 }
0x15c0   :  { %v4152_v9 = vmul.f32 1.442695, %v4150_v7 }
0x15c1   :  { %v4149_v12 = vpop.xlane.xlu1 %4148 }
0x15c2   :  { %7315 = vpow2.f32 %v4152_v9  ;;  %v4151_v13 = vsub.f32 %v4141_v2, %v4149_v12 }
0x15c4   :  { %v4154_v14 = vmul.f32 1.442695, %v4151_v13 }
0x15c6   :  { %7317 = vpow2.f32 %v4154_v14 }
0x15cf   :  { %v7316_v17 = vpop.eup %7315 }
0x15d0   :  { %v4156_v18 = vsel %vm436_vm4, %v7316_v17, 0.0 }
0x15d1   :  { %4157 = vadd.xlane.f32.xlu0 %v4156_v18 }
0x15d3   :  { %v7318_v19 = vpop.eup %7317 }
0x15d4   :  { %v4159_v21 = vsel %vm436_vm4, %v7318_v19, 0.0 }
0x15d5   :  { %4160 = vadd.xlane.f32.xlu1 %v4159_v21 }
0x165a   :  { %v4158_v25 = vpop.xlane.xlu0 %4157 }
0x165b   :  { %7319 = vrcp.f32 %v4158_v25 }
0x165e   :  { %v4161_v15 = vpop.xlane.xlu1 %4160 }
0x165f   :  { %7321 = vrcp.f32 %v4161_v15 }
0x1668   :  { %v7320_v16 = vpop.eup %7319 }
0x1669   :  { %v4163_v28 = vmul.f32 %v7320_v16, %v7316_v17  ;;  %v6408_v16 = vld [vmem:[%s8429_s8 + $0xf8] sm:$0xff] }
0x166b   :  { %7101 = vmatmul.mubr.msk.f32.vlgmr.msra.gmra.mxu1 %vm436_vm4, %v4163_v28 }
0x166c   :  { %v7322_v29 = vpop.eup %7321  ;;  %7109 = vmatpush3.msra.mxu1 %v6367_v35  ;;  %v6406_v35 = vld [vmem:[%s8429_s8 + $0xe8] sm:$0xff] }
0x166d   :  { %v4165_v30 = vmul.f32 %v7322_v29, %v7318_v19  ;;  %7118 = vmatprep.subr.mxu1 %v6375_v37 }
0x166f   :  { %7106 = vmatmul.mubr.msk.f32.vlgmr.msra.gmra.mxu0 %vm436_vm4, %v4165_v30 }
0x1670   :  { %7115 = vmatprep.mubr.msk.f32.mxu0 %vm436_vm4, %v8083_v44  ;;  %7114 = vmatpush3.msra.mxu0 %v6336_v24  ;;  %v6390_v44 = vld [vmem:[%s8431_s0 + $0xd0] sm:$0xff] }
0x1671   :  { %7129 = vmatprep.subr.mxu0 %v6383_v31 }
0x1673   :  { %7116 = vmatmul.mubr.msk.f32.vlgmr.msra.gmra.mxu0 %vm436_vm4, %v8081_v43  ;;  %v6391_v43 = vld [vmem:[%s8431_s0 + $0xd8] sm:$0xff] }
0x1674   :  { %7130 = vmatpush3.msra.mxu0 %v6383_v31  ;;  %7137 = vmatprep.mubr.msk.f32.mxu0 %vm170_vm2, %v7960_v47 }
0x1675   :  { %7131 = vmatprep.subr.mxu0 %v6382_v32 }
0x1676   :  { %7132 = vmatpush3.msra.mxu0 %v6382_v32 }
0x1677   :  { %7133 = vmatprep.subr.mxu0 %v6381_v33 }
0x1678   :  { %7134 = vmatpush3.msra.mxu0 %v6381_v33 }
0x1679   :  { %7135 = vmatprep.subr.mxu0 %v6380_v34 }
0x167a   :  { %7136 = vmatpush3.msra.mxu0 %v6380_v34  ;;  %v6407_v34 = vld [vmem:[%s8429_s8 + $0xf0] sm:$0xff] }
0x167b   :  { %7138 = vmatmul.mubr.msk.f32.vlgmr.msra.gmra.mxu0 %vm170_vm2, %v7962_v48  ;;  %7151 = vmatprep.subr.mxu0 %v7357_v20 }
0x167c   :  { %7153 = vmatprep.mubr.msk.f32.mxu0 %vm7358_vm3, %v7357_v20 }
0x172b   :  { %v4235_v8 = vpop.f32.mrf.mxu1 }
0x172c   :  { %7110 = vmatprep.mubr.msk.f32.mxu1 %vm436_vm4, %v4235_v8  ;;  %v6424_v8 = vld [vmem:[%s8431_s0 + $0xf8] sm:$0xff] }
0x172d   :  { %v7102_v22 = vpop.f32.mrf.mxu1 }
0x172e   :  { %v6423_v22 = vld [vmem:[%s8431_s0 + $0xf0] sm:$0xff] }
0x172f   :  { %v4308_v11 = vpop.f32.mrf.mxu0 }
0x1730   :  { %7111 = vmatmul.mubr.msk.f32.vlgmr.msra.gmra.mxu1 %vm436_vm4, %v4308_v11  ;;  %v6422_v11 = vld [vmem:[%s8431_s0 + $0xe8] sm:$0xff] }
0x1731   :  { %7119 = vmatpush3.msra.mxu1 %v6375_v37  ;;  %v7107_v39 = vpop.f32.mrf.mxu0  ;;  %7126 = vmatprep.mubr.msk.f32.mxu1 %vm170_vm2, %v7960_v47  ;;  %v6405_v37 = vld [vmem:[%s8429_s8 + $0xe0] sm:$0xff] }
0x1732   :  { %7120 = vmatprep.subr.mxu1 %v6374_v23  ;;  %v6402_v39 = vld [vmem:[%s8407_s10 + $0x30] sm:$0xff] }
0x1733   :  { %7121 = vmatpush3.msra.mxu1 %v6374_v23  ;;  %v8157_v42 = vpop.f32.mrf.mxu0  ;;  %v6421_v23 = vld [vmem:[%s8431_s0 + $0xe0] sm:$0xff] }
0x1734   :  { %7122 = vmatprep.subr.mxu1 %v6373_v40 }
0x1735   :  { %7123 = vmatpush3.msra.mxu1 %v6373_v40  ;;  %v8167_v45 = vpop.f32.mrf.mxu0  ;;  %v6416_v40 = vld [vmem:[%s8430_s2 + $0xf8] sm:$0xff] }
0x1736   :  { %7124 = vmatprep.subr.mxu1 %v6372_v41 }
0x1737   :  { %7125 = vmatpush3.msra.mxu1 %v6372_v41 }
0x1738   :  { %7127 = vmatmul.mubr.msk.f32.vlgmr.msra.gmra.mxu1 %vm170_vm2, %v7962_v48  ;;  %7140 = vmatprep.subr.mxu1 %v6391_v43 }
0x1739   :  { %7141 = vmatpush3.msra.mxu1 %v6391_v43  ;;  %7148 = vmatprep.mubr.msk.f32.mxu1 %vm170_vm2, %v7960_v47 }
0x173a   :  { %7142 = vmatprep.subr.mxu1 %v6390_v44 }
0x173b   :  { %v7139_v27 = vpop.f32.mrf.mxu0  ;;  %7143 = vmatpush3.msra.mxu1 %v6390_v44 }
0x173c   :  { %v4649_v50 = vadd.f32 %v7139_v27, %v6385_v46  ;;  %7144 = vmatprep.subr.mxu1 %v6389_v26  ;;  %v6414_v27 = vld [vmem:[%s8430_s2 + $0xe8] sm:$0xff] }
0x173d   :  { %v4643_v51 = vpop.f32.mrf.mxu0  ;;  %7145 = vmatpush3.msra.mxu1 %v6389_v26 }
0x173e   :  { %v4644_v52 = vadd.f32 %v6385_v46, %v4643_v51  ;;  %7146 = vmatprep.subr.mxu1 %v6388_v49  ;;  %v6415_v46 = vld [vmem:[%s8430_s2 + $0xf0] sm:$0xff] }
0x173f   :  { %7147 = vmatpush3.msra.mxu1 %v6388_v49  ;;  %v6413_v49 = vld [vmem:[%s8430_s2 + $0xe0] sm:$0xff] }
0x1740   :  { %7149 = vmatmul.mubr.msk.f32.vlgmr.msra.gmra.mxu1 %vm170_vm2, %v7962_v48  ;;  %7152 = vmatpush3.xpose.msk.msra.mxu0 %vm436_vm4, %v4644_v52  ;;  %v6426_v52 = vld [vmem:[%s8405_s9 + $0x7] ss:$0 sm:$0xff] }
0x1741   :  { %7156 = vmatprep.subr.mxu0 %v7357_v20  ;;  %7161 = vmatprep.subr.mxu1 %v7357_v20 }
0x1742   :  { %7163 = vmatprep.mubr.msk.f32.mxu1 %vm7358_vm3, %v7357_v20 }
0x17f0   :  { %v8187_v38 = vpop.f32.mrf.mxu1 }
0x17f2   :  { %v8189_v53 = vpop.f32.mrf.mxu1 }
0x17f8   :  { %v7128_v54 = vpop.f32.mrf.mxu1 }
0x17f9   :  { %v4561_v58 = vadd.f32 %v7128_v54, %v6377_v55 }
0x17fa   :  { %v4555_v36 = vpop.f32.mrf.mxu1 }
0x17fb   :  { %v4556_v56 = vadd.f32 %v6377_v55, %v4555_v36 }
0x17fd   :  { %7154 = vmatmul.mubr.msk.f32.vlgmr.msra.gmra.mxu0 %vm436_vm4, %v4556_v56 }
0x17fe   :  { %7157 = vmatpush3.xpose.msk.msra.mxu0 %vm436_vm4, %v4649_v50  ;;  %7158 = vmatprep.mubr.msk.f32.mxu0 %vm7358_vm3, %v7357_v20 }
0x17ff   :  { %7166 = vmatprep.subr.mxu0 %v7357_v20 }
0x1800   :  { %v7150_v59 = vpop.f32.mrf.mxu1 }
0x1801   :  { %v4737_v60 = vadd.f32 %v7150_v59, %v6393_v57  ;;  %7159 = vmatmul.mubr.msk.f32.vlgmr.msra.gmra.mxu0 %vm436_vm4, %v4561_v58  ;;  %v4468_v59 = vadd.f32 %v8167_v45, %v8189_v53 }
0x1802   :  { %v4731_v61 = vpop.f32.mrf.mxu1  ;;  %7168 = vmatprep.mubr.msk.f32.mxu0 %vm7358_vm3, %v7357_v20 }
0x1803   :  { %v4732_v62 = vadd.f32 %v6393_v57, %v4731_v61  ;;  %7167 = vmatpush3.msra.mxu0 %v4737_v60  ;;  %v4473_v57 = vadd.f32 %v8157_v42, %v8187_v38  ;;  %v6410_v42 = vld [vmem:[%s8404_s5 + $0x7] ss:$0 sm:$0xff] }
0x1804   :  { %7176 = vmatprep.subr.mxu0 %v6408_v16 }
0x1805   :  { %7162 = vmatpush3.msra.mxu1 %v4732_v62 }
0x1806   :  { %7171 = vmatprep.subr.mxu1 %v6402_v39 }
0x18bd   :  { %v4812_v63 = vpop.f32.mrf.mxu0 }
0x18be   :  { %v4813_v1 = vadd.f32 %v8018_v4, %v4812_v63 }
0x18bf   :  { %v7155_v2 = vpop.f32.mrf.mxu0 }
0x18c0   :  { %v4892_v3 = vsel %vm436_vm4, %v4813_v1, -inf }
0x18c1   :  { %4893 = vmax.xlane.f32.xlu0 %v4892_v3  ;;  %v4888_v5 = vpop.f32.mrf.mxu0 }
0x18c2   :  { %v4889_v6 = vadd.f32 %v8012_v0, %v4888_v5 }
0x18c3   :  { %v7160_v7 = vpop.f32.mrf.mxu0 }
0x18c4   :  { %v4895_v9 = vsel %vm436_vm4, %v4889_v6, -inf }
0x18c5   :  { %4896 = vmax.xlane.f32.xlu1 %v4895_v9 }
0x194a   :  { %v4894_v12 = vpop.xlane.xlu0 %4893 }
0x194b   :  { %v4898_v13 = vsub.f32 %v4813_v1, %v4894_v12  ;;  %v6418_v1 = vld [vmem:[%s8403_s7 + $0x7] ss:$0 sm:$0xff] }
0x194d   :  { %v4900_v14 = vmul.f32 1.442695, %v4898_v13 }
0x194e   :  { %v4897_v17 = vpop.xlane.xlu1 %4896 }
0x194f   :  { %7323 = vpow2.f32 %v4900_v14  ;;  %v4899_v18 = vsub.f32 %v4889_v6, %v4897_v17 }
0x1951   :  { %v4902_v19 = vmul.f32 1.442695, %v4899_v18 }
0x1953   :  { %7325 = vpow2.f32 %v4902_v19 }
0x195c   :  { %v7324_v21 = vpop.eup %7323 }
0x195d   :  { %v4904_v24 = vsel %vm436_vm4, %v7324_v21, 0.0 }
0x195e   :  { %4905 = vadd.xlane.f32.xlu0 %v4904_v24 }
0x1960   :  { %v7326_v25 = vpop.eup %7325 }
0x1961   :  { %v4907_v15 = vsel %vm436_vm4, %v7326_v25, 0.0 }
0x1962   :  { %4908 = vadd.xlane.f32.xlu1 %v4907_v15 }
0x19e7   :  { %v4906_v28 = vpop.xlane.xlu0 %4905 }
0x19e8   :  { %7327 = vrcp.f32 %v4906_v28 }
0x19eb   :  { %v4909_v29 = vpop.xlane.xlu1 %4908 }
0x19ec   :  { %7329 = vrcp.f32 %v4909_v29 }
0x19f5   :  { %v7328_v30 = vpop.eup %7327 }
0x19f6   :  { %v4911_v31 = vmul.f32 %v7328_v30, %v7324_v21 }
0x19f8   :  { %7164 = vmatmul.mubr.msk.f32.vlgmr.msra.gmra.mxu1 %vm436_vm4, %v4911_v31 }
0x19f9   :  { %v7330_v32 = vpop.eup %7329  ;;  %7172 = vmatpush3.msra.mxu1 %v6402_v39  ;;  %v6445_v39 = vld [vmem:[%s8408_s12 + $0x28] sm:$0xff] }
0x19fa   :  { %v4913_v33 = vmul.f32 %v7330_v32, %v7326_v25  ;;  %7187 = vmatprep.subr.mxu1 %v6416_v40 }
0x19fc   :  { %7169 = vmatmul.mubr.msk.f32.vlgmr.msra.gmra.mxu0 %vm436_vm4, %v4913_v33 }
0x19fd   :  { %7177 = vmatpush3.msra.mxu0 %v6408_v16  ;;  %7184 = vmatprep.mubr.msk.f32.mxu0 %vm170_vm2, %v7960_v47 }
0x19fe   :  { %7178 = vmatprep.subr.mxu0 %v6407_v34 }
0x19ff   :  { %7179 = vmatpush3.msra.mxu0 %v6407_v34  ;;  %v6435_v34 = vld [vmem:[%s8407_s10 + $0x38] sm:$0xff] }
0x1a00   :  { %7180 = vmatprep.subr.mxu0 %v6406_v35 }
0x1a01   :  { %7181 = vmatpush3.msra.mxu0 %v6406_v35 }
0x1a02   :  { %7182 = vmatprep.subr.mxu0 %v6405_v37 }
0x1a03   :  { %7183 = vmatpush3.msra.mxu0 %v6405_v37 }
0x1a04   :  { %7185 = vmatmul.mubr.msk.f32.vlgmr.msra.gmra.mxu0 %vm170_vm2, %v7962_v48  ;;  %7198 = vmatprep.subr.mxu0 %v6424_v8 }
0x1a05   :  { %7199 = vmatpush3.msra.mxu0 %v6424_v8  ;;  %7206 = vmatprep.mubr.msk.f32.mxu0 %vm170_vm2, %v7960_v47 }
0x1a06   :  { %7200 = vmatprep.subr.mxu0 %v6423_v22 }
0x1a07   :  { %7201 = vmatpush3.msra.mxu0 %v6423_v22 }
0x1a08   :  { %7202 = vmatprep.subr.mxu0 %v6422_v11 }
0x1a09   :  { %7203 = vmatpush3.msra.mxu0 %v6422_v11  ;;  %v6447_v11 = vld [vmem:[%s8408_s12 + $0x38] sm:$0xff] }
0x1a0a   :  { %7204 = vmatprep.subr.mxu0 %v6421_v23 }
0x1a0b   :  { %7205 = vmatpush3.msra.mxu0 %v6421_v23  ;;  %v6446_v23 = vld [vmem:[%s8408_s12 + $0x30] sm:$0xff] }
0x1a0c   :  { %7207 = vmatmul.mubr.msk.f32.vlgmr.msra.gmra.mxu0 %vm170_vm2, %v7962_v48  ;;  %7219 = vmatprep.subr.mxu0 %v7357_v20 }
0x1a0d   :  { %7221 = vmatprep.mubr.msk.f32.mxu0 %vm7358_vm3, %v7357_v20 }
0x1ab8   :  { %v4983_v41 = vpop.f32.mrf.mxu1 }
0x1ab9   :  { %7173 = vmatprep.mubr.msk.f32.mxu1 %vm436_vm4, %v4983_v41 }
0x1aba   :  { %v7165_v43 = vpop.f32.mrf.mxu1 }
0x1abb   :  { %v6439_v43 = vld [vmem:[%s8409_s11 + $0x1] ss:$0 sm:$0xff] }
0x1abc   :  { %v5056_v44 = vpop.f32.mrf.mxu0 }
0x1abd   :  { %7174 = vmatmul.mubr.msk.f32.vlgmr.msra.gmra.mxu1 %vm436_vm4, %v5056_v44 }
0x1abe   :  { %7188 = vmatpush3.msra.mxu1 %v6416_v40  ;;  %v7170_v26 = vpop.f32.mrf.mxu0  ;;  %7195 = vmatprep.mubr.msk.f32.mxu1 %vm170_vm2, %v7960_v47  ;;  %v6444_v40 = vld [vmem:[%s8408_s12 + $0x20] sm:$0xff] }
0x1abf   :  { %7189 = vmatprep.subr.mxu1 %v6415_v46 }
0x1ac0   :  { %7190 = vmatpush3.msra.mxu1 %v6415_v46 }
0x1ac1   :  { %7191 = vmatprep.subr.mxu1 %v6414_v27 }
0x1ac2   :  { %7192 = vmatpush3.msra.mxu1 %v6414_v27 }
0x1ac3   :  { %7193 = vmatprep.subr.mxu1 %v6413_v49 }
0x1ac4   :  { %7194 = vmatpush3.msra.mxu1 %v6413_v49  ;;  %v7186_v50 = vpop.f32.mrf.mxu0 }
0x1ac5   :  { %7196 = vmatmul.mubr.msk.f32.vlgmr.msra.gmra.mxu1 %vm170_vm2, %v7962_v48  ;;  %7209 = vmatprep.subr.mxu1 %v7357_v20  ;;  %v5230_v53 = vadd.f32 %v7186_v50, %v6410_v42  ;;  %v6441_v50 = vld [vmem:[%s8410_s16 + $0x1] ss:$0 sm:$0xff] }
0x1ac6   :  { %7211 = vmatprep.mubr.msk.f32.mxu1 %vm7358_vm3, %v7357_v20  ;;  %v5224_v51 = vpop.f32.mrf.mxu0 }
0x1ac7   :  { %v5225_v38 = vadd.f32 %v6410_v42, %v5224_v51 }
0x1acc   :  { %v7208_v54 = vpop.f32.mrf.mxu0 }
0x1acd   :  { %v5406_v55 = vadd.f32 %v7208_v54, %v6426_v52 }
0x1ace   :  { %v5400_v36 = vpop.f32.mrf.mxu0 }
0x1acf   :  { %v5401_v56 = vadd.f32 %v6426_v52, %v5400_v36 }
0x1ad1   :  { %7220 = vmatpush3.msra.mxu0 %v5401_v56 }
0x1ad2   :  { %7229 = vmatprep.subr.mxu0 %v6435_v34 }
0x1b7d   :  { %v7175_v58 = vpop.f32.mrf.mxu1 }
0x1b7e   :  { %v8279_v60 = vadd.f32 %v7175_v58, %v4473_v57  ;;  %v6457_v58 = vld [vmem:[%s8412_s14 + $0x68] sm:$0xff] }
0x1b7f   :  { %v5134_v61 = vpop.f32.mrf.mxu1 }
0x1b80   :  { %v8281_v62 = vadd.f32 %v5134_v61, %v4468_v59  ;;  %v6456_v59 = vld [vmem:[%s8412_s14 + $0x60] sm:$0xff]  ;;  %v6454_v61 = vld [vmem:[%s8412_s14 + $0x50] sm:$0xff] }
0x1b85   :  { %v7197_v63 = vpop.f32.mrf.mxu1 }
0x1b86   :  { %v5318_v45 = vadd.f32 %v7197_v63, %v6418_v1  ;;  %v6452_v63 = vld [vmem:[%s8412_s14 + $0x40] sm:$0xff] }
0x1b87   :  { %v5312_v2 = vpop.f32.mrf.mxu1 }
0x1b88   :  { %v5313_v3 = vadd.f32 %v6418_v1, %v5312_v2  ;;  %v6449_v1 = vld [vmem:[%s8413_s13 + $0x1] ss:$0 sm:$0xff] }
0x1b8a   :  { %7210 = vmatpush3.xpose.msk.msra.mxu1 %vm436_vm4, %v5313_v3 }
0x1b8b   :  { %7214 = vmatprep.subr.mxu1 %v7357_v20 }
0x1b8d   :  { %7212 = vmatmul.mubr.msk.f32.vlgmr.msra.gmra.mxu1 %vm436_vm4, %v5225_v38 }
0x1b8e   :  { %7215 = vmatpush3.xpose.msk.msra.mxu1 %vm436_vm4, %v5318_v45  ;;  %7216 = vmatprep.mubr.msk.f32.mxu1 %vm7358_vm3, %v7357_v20 }
0x1b8f   :  { %7224 = vmatprep.subr.mxu1 %v7357_v20 }
0x1b91   :  { %7217 = vmatmul.mubr.msk.f32.vlgmr.msra.gmra.mxu1 %vm436_vm4, %v5230_v53 }
0x1b92   :  { %7225 = vmatpush3.msra.mxu1 %v5406_v55  ;;  %7226 = vmatprep.mubr.msk.f32.mxu1 %vm7358_vm3, %v7357_v20  ;;  %v6443_v55 = vld [vmem:[%s8411_s17 + $0x1] ss:$0 sm:$0xff] }
0x1b93   :  { %7234 = vmatprep.subr.mxu1 %v6447_v11 }
0x1c4d   :  { %v5481_v5 = vpop.f32.mrf.mxu1 }
0x1c4e   :  { %v5482_v6 = vadd.f32 %v8018_v4, %v5481_v5 }
0x1c4f   :  { %v7213_v7 = vpop.f32.mrf.mxu1 }
0x1c50   :  { %v5561_v9 = vsel %vm436_vm4, %v5482_v6, -inf }
0x1c51   :  { %5562 = vmax.xlane.f32.xlu0 %v5561_v9  ;;  %v5557_v12 = vpop.f32.mrf.mxu1 }
0x1c52   :  { %v5558_v13 = vadd.f32 %v8012_v0, %v5557_v12 }
0x1c53   :  { %v7218_v14 = vpop.f32.mrf.mxu1 }
0x1c54   :  { %v5564_v17 = vsel %vm436_vm4, %v5558_v13, -inf }
0x1c55   :  { %5565 = vmax.xlane.f32.xlu1 %v5564_v17 }
0x1cda   :  { %v5563_v18 = vpop.xlane.xlu0 %5562 }
0x1cdb   :  { %v5567_v19 = vsub.f32 %v5482_v6, %v5563_v18 }
0x1cdd   :  { %v5569_v21 = vmul.f32 1.442695, %v5567_v19 }
0x1cde   :  { %v5566_v24 = vpop.xlane.xlu1 %5565 }
0x1cdf   :  { %7331 = vpow2.f32 %v5569_v21  ;;  %v5568_v20 = vsub.f32 %v5558_v13, %v5566_v24 }
0x1ce1   :  { %v5571_v25 = vmul.f32 1.442695, %v5568_v20 }
0x1ce3   :  { %7333 = vpow2.f32 %v5571_v25 }
0x1cec   :  { %v7332_v4 = vpop.eup %7331 }
0x1ced   :  { %v5573_v15 = vsel %vm436_vm4, %v7332_v4, 0.0 }
0x1cee   :  { %5574 = vadd.xlane.f32.xlu0 %v5573_v15 }
0x1cf0   :  { %v7334_v16 = vpop.eup %7333 }
0x1cf1   :  { %v5576_v28 = vsel %vm436_vm4, %v7334_v16, 0.0 }
0x1cf2   :  { %5577 = vadd.xlane.f32.xlu1 %v5576_v28 }
0x1d77   :  { %v5575_v0 = vpop.xlane.xlu0 %5574 }
0x1d78   :  { %7335 = vrcp.f32 %v5575_v0 }
0x1d7b   :  { %v5578_v29 = vpop.xlane.xlu1 %5577 }
0x1d7c   :  { %7337 = vrcp.f32 %v5578_v29 }
0x1d85   :  { %v7336_v30 = vpop.eup %7335 }
0x1d86   :  { %v5580_v31 = vmul.f32 %v7336_v30, %v7332_v4 }
0x1d88   :  { %7222 = vmatmul.mubr.msk.f32.vlgmr.msra.gmra.mxu0 %vm436_vm4, %v5580_v31 }
0x1d89   :  { %v7338_v32 = vpop.eup %7337  ;;  %7230 = vmatpush3.msra.mxu0 %v6435_v34 }
0x1d8a   :  { %v5582_v33 = vmul.f32 %v7338_v32, %v7334_v16 }
0x1d8c   :  { %7227 = vmatmul.mubr.msk.f32.vlgmr.msra.gmra.mxu1 %vm436_vm4, %v5582_v33 }
0x1d8d   :  { %7235 = vmatpush3.msra.mxu1 %v6447_v11 }
0x1d8e   :  { %7236 = vmatprep.subr.mxu1 %v6446_v23 }
0x1d8f   :  { %7237 = vmatpush3.msra.mxu1 %v6446_v23 }
0x1d90   :  { %7238 = vmatprep.subr.mxu1 %v6445_v39 }
0x1d91   :  { %7239 = vmatpush3.msra.mxu1 %v6445_v39 }
0x1d92   :  { %7240 = vmatprep.subr.mxu1 %v6444_v40 }
0x1d93   :  { %7241 = vmatpush3.msra.mxu1 %v6444_v40 }
0x1e48   :  { %v5652_v35 = vpop.f32.mrf.mxu0 }
0x1e49   :  { %7231 = vmatprep.mubr.msk.f32.mxu0 %vm436_vm4, %v5652_v35 }
0x1e4a   :  { %v7223_v37 = vpop.f32.mrf.mxu0 }
0x1e4c   :  { %v5725_v8 = vpop.f32.mrf.mxu1 }
0x1e4d   :  { %7232 = vmatmul.mubr.msk.f32.vlgmr.msra.gmra.mxu0 %vm436_vm4, %v5725_v8 }
0x1e4e   :  { %v7228_v22 = vpop.f32.mrf.mxu1 }
0x1f0d   :  { %v7233_v41 = vpop.f32.mrf.mxu0 }
0x1f0e   :  { %v5813_v44 = vadd.f32 %v7233_v41, %v8279_v60  ;;  %v6455_v60 = vld [vmem:[%s8412_s14 + $0x58] sm:$0xff] }
0x1f0f   :  { %v5803_v46 = vpop.f32.mrf.mxu0 }
0x1f10   :  { %v5823_v26 = vadd.f32 %v6439_v43, %v5813_v44  ;;  %v5812_v27 = vadd.f32 %v5803_v46, %v8281_v62  ;;  %v6453_v62 = vld [vmem:[%s8412_s14 + $0x48] sm:$0xff] }
0x1f12   :  { %v5825_v49 = vadd.f32 %v5823_v26, %v7962_v48  ;;  %v5822_v51 = vadd.f32 %v6439_v43, %v5812_v27  ;;  %v6458_v48 = vld [vmem:[%s8412_s14 + $0x70] sm:$0xff] }
0x1f14   :  { %v5824_v52 = vadd.f32 %v5822_v51, %v7960_v47  ;;  %v5835_v54 = vmul.f32 %v6441_v50, %v5825_v49  ;;  %v6459_v47 = vld [vmem:[%s8412_s14 + $0x78] sm:$0xff] }
0x1f15   :  { %7245 = vmatprep.subr.mxu0 %v6459_v47 }
0x1f16   :  { %v5834_v36 = vmul.f32 %v6441_v50, %v5824_v52  ;;  %v8339_v57 = vadd.f32 %v6443_v55, %v5835_v54  ;;  %7246 = vmatpush3.msra.mxu0 %v6459_v47 }
0x1f17   :  { %7247 = vmatprep.subr.mxu0 %v6458_v48 }
0x1f18   :  { %v8337_v56 = vadd.f32 %v6443_v55, %v5834_v36  ;;  %7248 = vmatpush3.msra.mxu0 %v6458_v48 }
0x1f19   :  { %7249 = vmatprep.subr.mxu0 %v6457_v58 }
0x1f1a   :  { %7242 = vmatprep.mubr.msk.f32.mxu1 %vm170_vm2, %v8337_v56  ;;  %7250 = vmatpush3.msra.mxu0 %v6457_v58  ;;  %v6461_v58 = vld [vmem:[%s8414_s15 + $0x1] ss:$0 sm:$0xff] }
0x1f1b   :  { %7243 = vmatmul.mubr.msk.f32.vlgmr.msra.gmra.mxu1 %vm170_vm2, %v8339_v57  ;;  %7251 = vmatprep.subr.mxu0 %v6456_v59 }
0x1f1c   :  { %7252 = vmatpush3.msra.mxu0 %v6456_v59 }
0x1f1d   :  { %7253 = vmatprep.subr.mxu0 %v6455_v60 }
0x1f1e   :  { %7254 = vmatpush3.msra.mxu0 %v6455_v60 }
0x1f1f   :  { %7255 = vmatprep.subr.mxu0 %v6454_v61 }
0x1f20   :  { %7256 = vmatpush3.msra.mxu0 %v6454_v61  ;;  %v6465_v61 = vld [vmem:[%s8415_s18 + $0x1] ss:$0 sm:$0xff] }
0x1f21   :  { %7257 = vmatprep.subr.mxu0 %v6453_v62 }
0x1f22   :  { %7258 = vmatpush3.msra.mxu0 %v6453_v62 }
0x1f23   :  { %7259 = vmatprep.subr.mxu0 %v6452_v63 }
0x1f24   :  { %7260 = vmatpush3.msra.mxu0 %v6452_v63 }
0x1fdb   :  { %v7244_v2 = vpop.f32.mrf.mxu1 }
0x1fdc   :  { %v5937_v3 = vadd.f32 %v7244_v2, %v6449_v1  ;;  %v6467_v2 = vld [vmem:[%s8416_s19 + $0x1] ss:$0 sm:$0xff] }
0x1fdd   :  { %v5931_v42 = vpop.f32.mrf.mxu1 }
0x1fde   :  { %v5943_v38 = vmul.f32 0.70710677, %v5937_v3  ;;  %v5932_v45 = vadd.f32 %v6449_v1, %v5931_v42  ;;  %v5941_v36 = vmul.f32 0.5, %v5937_v3 }
0x1fe0   :  { %v5949_v53 = vand.u32 2147483647, %v5943_v38  ;;  %v5942_v5 = vmul.f32 0.70710677, %v5932_v45  ;;  %vm5945_vm8 = vcmp.ge.f32.partialorder %v5943_v38, 0.0  ;;  %v5940_v54 = vmul.f32 0.5, %v5932_v45 }
0x1fe1   :  { %v5947_v46 = vsel %vm5945_vm8, 1.0, %v7359_v10 }
0x1fe2   :  { %v5951_v6 = vmul.f32 0.3275911, %v5949_v53  ;;  %v5948_v7 = vand.u32 2147483647, %v5942_v5  ;;  %v5977_v14 = vsub.f32 0.0, %v5949_v53  ;;  %vm5944_vm9 = vcmp.ge.f32.partialorder %v5942_v5, 0.0 }
0x1fe3   :  { %v5946_v50 = vsel %vm5944_vm9, 1.0, %v7359_v10 }
0x1fe4   :  { %v5953_v9 = vadd.f32 1.0, %v5951_v6  ;;  %v5950_v12 = vmul.f32 0.3275911, %v5948_v7  ;;  %v5976_v17 = vsub.f32 0.0, %v5948_v7  ;;  %v5979_v18 = vmul.f32 %v5977_v14, %v5949_v53 }
0x1fe6   :  { %7339 = vrcp.f32 %v5953_v9  ;;  %v5952_v13 = vadd.f32 1.0, %v5950_v12  ;;  %v5978_v21 = vmul.f32 %v5976_v17, %v5948_v7  ;;  %v5982_v20 = vmul.f32 1.442695, %v5979_v18 }
0x1fe8   :  { %7341 = vrcp.f32 %v5952_v13  ;;  %v5980_v16 = vmul.f32 1.442695, %v5978_v21 }
0x1fe9   :  { %7343 = vpow2.f32 %v5982_v20 }
0x1fea   :  { %7345 = vpow2.f32 %v5980_v16 }
0x1ff3   :  { %v7340_v19 = vpop.eup %7339 }
0x1ff4   :  { %v5959_v24 = vmul.f32 1.0614054, %v7340_v19 }
0x1ff5   :  { %v7342_v25 = vpop.eup %7341 }
0x1ff6   :  { %v5961_v4 = vadd.f32 -1.4531521, %v5959_v24  ;;  %v5958_v15 = vmul.f32 1.0614054, %v7342_v25  ;;  %v7344_v23 = vpop.eup %7343 }
0x1ff7   :  { %v7346_v43 = vpop.eup %7345 }
0x1ff8   :  { %v5963_v28 = vmul.f32 %v7340_v19, %v5961_v4  ;;  %v5960_v0 = vadd.f32 -1.4531521, %v5958_v15 }
0x1ffa   :  { %v5965_v29 = vadd.f32 1.4214138, %v5963_v28  ;;  %v5962_v30 = vmul.f32 %v7342_v25, %v5960_v0 }
0x1ffc   :  { %v5967_v31 = vmul.f32 %v7340_v19, %v5965_v29  ;;  %v5964_v32 = vadd.f32 1.4214138, %v5962_v30 }
0x1ffe   :  { %v5969_v33 = vadd.f32 -0.28449672, %v5967_v31  ;;  %v5966_v34 = vmul.f32 %v7342_v25, %v5964_v32 }
0x2000   :  { %v5971_v35 = vmul.f32 %v7340_v19, %v5969_v33  ;;  %v5968_v37 = vadd.f32 -0.28449672, %v5966_v34 }
0x2002   :  { %v5973_v8 = vadd.f32 0.2548296, %v5971_v35  ;;  %v5970_v22 = vmul.f32 %v7342_v25, %v5968_v37 }
0x2004   :  { %v5975_v11 = vmul.f32 %v7340_v19, %v5973_v8  ;;  %v5972_v39 = vadd.f32 0.2548296, %v5970_v22 }
0x2006   :  { %v5985_v40 = vmul.f32 %v7344_v23, %v5975_v11  ;;  %v5974_v41 = vmul.f32 %v7342_v25, %v5972_v39 }
0x2008   :  { %v5987_v44 = vsub.f32 1.0, %v5985_v40  ;;  %v5984_v26 = vmul.f32 %v7346_v43, %v5974_v41 }
0x200a   :  { %v5989_v27 = vmul.f32 %v5987_v44, %v5947_v46  ;;  %v5986_v49 = vsub.f32 1.0, %v5984_v26 }
0x200c   :  { %v5988_v51 = vmul.f32 %v5986_v49, %v5946_v50  ;;  %v5991_v52 = vadd.f32 1.0, %v5989_v27 }
0x200e   :  { %v5990_v55 = vadd.f32 1.0, %v5988_v51  ;;  %v5993_v48 = vmul.f32 %v5991_v52, %v5941_v36 }
0x2010   :  { %v5992_v47 = vmul.f32 %v5990_v55, %v5940_v54 }
0x2012   :  { %7261 = vmatprep.mubr.msk.f32.mxu0 %vm3034_vm7, %v5992_v47 }
0x2013   :  { %7262 = vmatmul.mubr.msk.f32.vlgmr.msra.gmra.mxu0 %vm3034_vm7, %v5993_v48 }
0x20d3   :  { %v7263_v59 = vpop.f32.mrf.mxu0 }
0x20d4   :  { %v6089_v60 = vadd.f32 %v7263_v59, %v6461_v58 }
0x20d5   :  { %v6083_v62 = vpop.f32.mrf.mxu0 }
0x20d6   :  { %v6093_v63 = vadd.f32 %v6089_v60, %v8339_v57  ;;  %v6084_v1 = vadd.f32 %v6461_v58, %v6083_v62 }
0x20d8   :  { %v6103_v3 = vmul.f32 %v6465_v61, %v6093_v63  ;;  %v6092_v42 = vadd.f32 %v6084_v1, %v8337_v56 }
0x20da   :  { %v6113_v38 = vadd.f32 %v6467_v2, %v6103_v3  ;;  %v6102_v45 = vmul.f32 %v6465_v61, %v6092_v42 }
0x20dc   :  { %v6117_v53 = vmul.f32 0.70710677, %v6113_v38  ;;  %v6112_v5 = vadd.f32 %v6467_v2, %v6102_v45  ;;  %v6115_v50 = vmul.f32 0.5, %v6113_v38 }
0x20de   :  { %v6123_v6 = vand.u32 2147483647, %v6117_v53  ;;  %v6116_v7 = vmul.f32 0.70710677, %v6112_v5  ;;  %vm6119_vm10 = vcmp.ge.f32.partialorder %v6117_v53, 0.0  ;;  %v6114_v36 = vmul.f32 0.5, %v6112_v5 }
0x20df   :  { %v6121_v46 = vsel %vm6119_vm10, 1.0, %v7359_v10 }
0x20e0   :  { %v6125_v9 = vmul.f32 0.3275911, %v6123_v6  ;;  %v6122_v12 = vand.u32 2147483647, %v6116_v7  ;;  %v6151_v17 = vsub.f32 0.0, %v6123_v6  ;;  %vm6118_vm11 = vcmp.ge.f32.partialorder %v6116_v7, 0.0 }
0x20e1   :  { %v6120_v52 = vsel %vm6118_vm11, 1.0, %v7359_v10 }
0x20e2   :  { %v6127_v13 = vadd.f32 1.0, %v6125_v9  ;;  %v6124_v14 = vmul.f32 0.3275911, %v6122_v12  ;;  %v6150_v18 = vsub.f32 0.0, %v6122_v12  ;;  %v6153_v19 = vmul.f32 %v6151_v17, %v6123_v6 }
0x20e4   :  { %7347 = vrcp.f32 %v6127_v13  ;;  %v6126_v57 = vadd.f32 1.0, %v6124_v14  ;;  %v6152_v24 = vmul.f32 %v6150_v18, %v6122_v12  ;;  %v6156_v56 = vmul.f32 1.442695, %v6153_v19 }
0x20e6   :  { %7349 = vrcp.f32 %v6126_v57  ;;  %v6154_v16 = vmul.f32 1.442695, %v6152_v24 }
0x20e7   :  { %7351 = vpow2.f32 %v6156_v56 }
0x20e8   :  { %7353 = vpow2.f32 %v6154_v16 }
0x20f1   :  { %v7348_v21 = vpop.eup %7347 }
0x20f2   :  { %v6133_v20 = vmul.f32 1.0614054, %v7348_v21 }
0x20f3   :  { %v7350_v25 = vpop.eup %7349 }
0x20f4   :  { %v6135_v4 = vadd.f32 -1.4531521, %v6133_v20  ;;  %v6132_v15 = vmul.f32 1.0614054, %v7350_v25  ;;  %v7352_v23 = vpop.eup %7351 }
0x20f5   :  { %v7354_v43 = vpop.eup %7353 }
0x20f6   :  { %v6137_v28 = vmul.f32 %v7348_v21, %v6135_v4  ;;  %v6134_v0 = vadd.f32 -1.4531521, %v6132_v15 }
0x20f8   :  { %v6139_v29 = vadd.f32 1.4214138, %v6137_v28  ;;  %v6136_v30 = vmul.f32 %v7350_v25, %v6134_v0 }
0x20fa   :  { %v6141_v31 = vmul.f32 %v7348_v21, %v6139_v29  ;;  %v6138_v32 = vadd.f32 1.4214138, %v6136_v30 }
0x20fc   :  { %v6143_v33 = vadd.f32 -0.28449672, %v6141_v31  ;;  %v6140_v34 = vmul.f32 %v7350_v25, %v6138_v32 }
0x20fe   :  { %v6145_v35 = vmul.f32 %v7348_v21, %v6143_v33  ;;  %v6142_v37 = vadd.f32 -0.28449672, %v6140_v34 }
0x2100   :  { %v6147_v8 = vadd.f32 0.2548296, %v6145_v35  ;;  %v6144_v22 = vmul.f32 %v7350_v25, %v6142_v37 }
0x2102   :  { %v6149_v11 = vmul.f32 %v7348_v21, %v6147_v8  ;;  %v6146_v39 = vadd.f32 0.2548296, %v6144_v22 }
0x2104   :  { %v6159_v40 = vmul.f32 %v7352_v23, %v6149_v11  ;;  %v6148_v41 = vmul.f32 %v7350_v25, %v6146_v39 }
0x2106   :  { %v6161_v44 = vsub.f32 1.0, %v6159_v40  ;;  %v6158_v26 = vmul.f32 %v7354_v43, %v6148_v41 }
0x2108   :  { %v6163_v27 = vmul.f32 %v6161_v44, %v6121_v46  ;;  %v6160_v49 = vsub.f32 1.0, %v6158_v26 }
0x210a   :  { %v6165_v51 = vadd.f32 1.0, %v6163_v27  ;;  %v6162_v54 = vmul.f32 %v6160_v49, %v6120_v52 }
0x210c   :  { %v6167_v55 = vmul.f32 %v6165_v51, %v6115_v50  ;;  %v6164_v47 = vadd.f32 1.0, %v6162_v54 }
0x210e   :  { %6169 = vst.msk [vmem:[%s8417_s20 + $0x8] sm:$0xff] %vm170_vm2, %v6167_v55  ;;  %v6166_v48 = vmul.f32 %v6164_v47, %v6114_v36 }
0x2110   :  { %6168 = vst.msk [vmem:[%s8417_s20] sm:$0xff] %vm170_vm2, %v6166_v48 }

</bundles_post_ra>
